<compile_context>
chip_gen: v5e
topology: v5e:2x2
jax: 0.10.0
libtpu: 0.0.40
codegen_flags: <defaults>
</compile_context>

<pallas_src>
import functools

import jax
import jax.numpy as jnp
from jax import lax
from jax.experimental import pallas as pl
from jax.experimental.pallas import tpu as pltpu


def _pair(v):
    if isinstance(v, (tuple, list)):
        return (int(v[0]), int(v[1]))
    return (int(v), int(v))


def _round_up(v, m):
    return ((v + m - 1) // m) * m


def _vmem_limit_bytes():
    """Generation-aware scoped-VMEM limit (v7x has 64 MiB physical, v5e/v6e 128 MiB)."""
    try:
        cap = int(pltpu.get_tpu_info().vmem_capacity_bytes)
    except Exception:
        cap = 64 * 1024 * 1024                       # conservative (v7x-sized) fallback
    return min(max(cap // 2, 32 * 1024 * 1024), 96 * 1024 * 1024)


def _pick_tile_oh(n_imgs, oh, ow, wp, cin, cout, kh, kw, sh, dh, budget_bytes):
    """Largest output-row tile whose input slab + output block + weight fit the budget."""
    def slab_h(t):
        return (t - 1) * sh + dh * (kh - 1) + 1

    def vmem_bytes(t):
        x_blk = slab_h(t) * _round_up(wp, 16) * _round_up(cin, 128) * 2    # bf16 slab
        o_blk = _round_up(t * ow, 8) * _round_up(cout, 128) * 4            # f32 out tile
        w_blk = kh * kw * _round_up(cin, 16) * _round_up(cout, 128) * 2    # bf16 weight
        acc = _round_up(t * ow, 8) * _round_up(cout, 128) * 4              # f32 accumulator
        return 2 * x_blk + 2 * o_blk + 2 * w_blk + acc                     # double-buffered

    divs = [t for t in range(1, oh + 1) if oh % t == 0]
    fits = [t for t in divs
            if vmem_bytes(t) <= budget_bytes and (t == oh or (t * ow) % 8 == 0)]
    tile = max(fits) if fits else oh                  # correctness first if nothing fits

    # Keep both v7x TensorCores busy: want >= 2 "parallel" grid steps when N == 1.
    if n_imgs * (oh // tile) < 2:
        smaller = [t for t in fits if t < tile]
        if smaller:
            tile = max(smaller)
    return tile


# ----------------------------- Pallas kernel ---------------------------------

def _conv_kernel(x_ref, w_ref, sc_ref, sh_ref, al_ref, o_ref, *,
                 tile_oh, ow, kh, kw, stride_h, stride_w, dh, dw,
                 use_affine, use_prelu):
    # x_ref : (1, 1, slab_h, Wp, Cin)   bf16 row slab (incl. halo) for this (n, row_block)
    # w_ref : (kh*kw, Cin, Cout)        bf16 block-diagonal (group-packed) weight taps
    # sc/sh/al : (1, Cout)              f32 fused scale / shift(+bias) / PReLU slope
    # o_ref : (1, tile_oh*ow, Cout)     f32 flat output rows
    cin = x_ref.shape[-1]
    cout = o_ref.shape[-1]
    m = tile_oh * ow

    def _ds(start, size, stride):
        return pl.ds(start, size) if stride == 1 else pl.ds(start, size, stride)

    acc = jnp.zeros((m, cout), jnp.float32)
    for t in range(kh * kw):
        i, j = divmod(t, kw)
        xs = x_ref[0, 0, _ds(i * dh, tile_oh, stride_h), _ds(j * dw, ow, stride_w), :]
        a = xs.reshape(m, cin)
        acc = acc + jnp.dot(a, w_ref[t], preferred_element_type=jnp.float32)

    y = acc                                              # f32 epilogue (also best on v5e)
    if use_affine:
        y = y * sc_ref[...] + sh_ref[...]
    if use_prelu:
        y = jnp.where(y >= 0.0, y, al_ref[...] * y)
    o_ref[...] = y[None].astype(o_ref.dtype)


def _fused_conv(x_slabs, w, sc, shf, al, *, oh, ow, tile_oh, kh, kw,
                stride, dilation, use_affine, use_prelu, vmem_limit):
    """Grouped conv (groups pre-packed block-diagonally) + fused scale/shift/PReLU."""
    N, n_rb, slab_h, Wp, Cin = x_slabs.shape
    T, _, Cout = w.shape
    sh, sw = stride
    dh, dw = dilation
    tile_m = tile_oh * ow

    kernel = functools.partial(
        _conv_kernel, tile_oh=tile_oh, ow=ow, kh=kh, kw=kw,
        stride_h=sh, stride_w=sw, dh=dh, dw=dw,
        use_affine=use_affine, use_prelu=use_prelu)

    vec_spec = pl.BlockSpec((1, Cout), lambda n, r: (0, 0))
    flops = 2 * N * oh * ow * T * Cin * Cout
    bytes_accessed = (x_slabs.size * 2 + w.size * 2
                      + (sc.size + shf.size + al.size) * 4
                      + N * oh * ow * Cout * 4)

    return pl.pallas_call(
        kernel,
        out_shape=jax.ShapeDtypeStruct((N, oh * ow, Cout), jnp.float32),
        grid_spec=pltpu.PrefetchScalarGridSpec(
            num_scalar_prefetch=0,
            grid=(N, n_rb),
            in_specs=[
                pl.BlockSpec((1, 1, slab_h, Wp, Cin), lambda n, r: (n, r, 0, 0, 0)),
                pl.BlockSpec((T, Cin, Cout), lambda n, r: (0, 0, 0)),   # weight resident
                vec_spec, vec_spec, vec_spec,
            ],
            out_specs=pl.BlockSpec((1, tile_m, Cout), lambda n, r: (n, r, 0)),
        ),
        compiler_params=pltpu.CompilerParams(
            dimension_semantics=("parallel", "parallel"),
            vmem_limit_bytes=int(vmem_limit),
        ),
        cost_estimate=pl.CostEstimate(flops=int(flops), transcendentals=0,
                                      bytes_accessed=int(bytes_accessed)),
    )(x_slabs, w, sc, shf, al)


# ----------------------------- Conv module ------------------------------------

class ConvPallas:
    """JAX/Pallas equivalent of MSRAformer `Conv` (Conv2d [+ BN(eps=1e-3) + PReLU])."""

    def __init__(self, nIn, nOut, kSize, stride, padding, dilation=(1, 1),
                 groups=1, bn_acti=False, bias=False, key=None):
        assert nIn % groups == 0 and nOut % groups == 0, "groups must divide nIn and nOut"
        self.nIn, self.nOut = nIn, nOut
        self.ksize = _pair(kSize)
        self.stride = _pair(stride)
        self.padding = _pair(padding)
        self.dilation = _pair(dilation)
        self.groups = groups
        self.bn_acti = bn_acti
        self.eps = 0.001

        key = jax.random.PRNGKey(0) if key is None else key
        kw_, kb, kg, kbe, krm, krv, ka = jax.random.split(key, 7)
        kh, kw = self.ksize
        cin_g = nIn // groups
        fan_in = cin_g * kh * kw
        # conv weight: (Cout, Cin/groups, kh, kw)  (PyTorch OIHW)
        self.weight = (jax.random.normal(kw_, (nOut, cin_g, kh, kw), jnp.float32)
                       * (1.0 / jnp.sqrt(fan_in)))
        self.bias = (jax.random.normal(kb, (nOut,), jnp.float32) * 0.1) if bias else None
        if bn_acti:
            self.gamma = 0.5 + jax.random.uniform(kg, (nOut,), jnp.float32)
            self.beta = jax.random.normal(kbe, (nOut,), jnp.float32) * 0.1
            self.running_mean = jax.random.normal(krm, (nOut,), jnp.float32) * 0.1
            self.running_var = 0.5 + jax.random.uniform(krv, (nOut,), jnp.float32)
            # PyTorch PReLU default 0.25; jitter per-channel so the path is exercised.
            self.alpha = 0.25 + jax.random.normal(ka, (nOut,), jnp.float32) * 0.01

    def __call__(self, x_nchw):
        N, Cin, H, W = x_nchw.shape
        assert Cin == self.nIn
        kh, kw = self.ksize
        sh, sw = self.stride
        ph, pw = self.padding
        dh, dw = self.dilation
        G = self.groups
        cin_g = Cin // G
        cout_g = self.nOut // G

        Hp, Wp = H + 2 * ph, W + 2 * pw
        oh = (Hp - dh * (kh - 1) - 1) // sh + 1
        ow = (Wp - dw * (kw - 1) - 1) // sw + 1

        vmem_limit = _vmem_limit_bytes()
        tile_budget = int(0.70 * vmem_limit)
        tile_oh = _pick_tile_oh(N, oh, ow, Wp, Cin, self.nOut, kh, kw, sh, dh, tile_budget)
        n_rb = oh // tile_oh
        slab_h = (tile_oh - 1) * sh + dh * (kh - 1) + 1

        # NCHW -> NHWC, zero pad, slice into overlapping row slabs (one fused XLA pass).
        x = jnp.transpose(x_nchw, (0, 2, 3, 1)).astype(jnp.bfloat16)
        xp = jnp.pad(x, ((0, 0), (ph, ph), (pw, pw), (0, 0)))
        row_idx = (jnp.arange(n_rb) * (tile_oh * sh))[:, None] + jnp.arange(slab_h)[None, :]
        x_slabs = xp[:, row_idx]                          # (N, n_rb, slab_h, Wp, Cin)

        # Block-diagonal weight packs groups into the lane dim: (kh*kw, Cin, nOut) bf16.
        # TODO(synk): for huge Cin*nOut with very many groups this wastes weight memory;
        #             a per-group path would be preferable there.
        w5 = self.weight.reshape(G, cout_g, cin_g, kh, kw)
        w5 = jnp.transpose(w5, (3, 4, 0, 2, 1)).reshape(kh * kw, G, cin_g, cout_g)
        eye = jnp.eye(G, dtype=w5.dtype)
        wbd = jnp.einsum("tgio,gh->tgiho", w5, eye).reshape(kh * kw, Cin, self.nOut)
        wbd = wbd.astype(jnp.bfloat16)

        # Fused epilogue: y = conv*scale + shift ; y = where(y>=0, y, alpha*y).
        if self.bn_acti:
            scale = self.gamma / jnp.sqrt(self.running_var + self.eps)
            shift = self.beta - self.running_mean * scale
            if self.bias is not None:
                shift = shift + self.bias * scale          # fold conv bias into BN shift
            alpha = self.alpha
            use_affine, use_prelu = True, True
        elif self.bias is not None:
            scale = jnp.ones((self.nOut,), jnp.float32)
            shift = self.bias
            alpha = jnp.ones((self.nOut,), jnp.float32)
            use_affine, use_prelu = True, False
        else:
            scale = jnp.ones((self.nOut,), jnp.float32)
            shift = jnp.zeros((self.nOut,), jnp.float32)
            alpha = jnp.ones((self.nOut,), jnp.float32)
            use_affine, use_prelu = False, False

        sc = scale.reshape(1, self.nOut).astype(jnp.float32)
        shf = shift.reshape(1, self.nOut).astype(jnp.float32)
        al = alpha.reshape(1, self.nOut).astype(jnp.float32)

        out = _fused_conv(x_slabs, wbd, sc, shf, al, oh=oh, ow=ow, tile_oh=tile_oh,
                          kh=kh, kw=kw, stride=(sh, sw), dilation=(dh, dw),
                          use_affine=use_affine, use_prelu=use_prelu,
                          vmem_limit=vmem_limit)

        out = out.reshape(N, oh, ow, self.nOut)
        return jnp.transpose(out, (0, 3, 1, 2))            # NCHW, f32


# ------------------------------ reference -------------------------------------

def _reference(x, m: ConvPallas):
    ph, pw = m.padding
    # Same bf16 operand rounding as the kernel; f32 accumulation everywhere.
    xr = x.astype(jnp.bfloat16).astype(jnp.float32)
    wr = m.weight.astype(jnp.bfloat16).astype(jnp.float32)
    y = lax.conv_general_dilated(
        xr, wr, window_strides=m.stride, padding=[(ph, ph), (pw, pw)],
        rhs_dilation=m.dilation, feature_group_count=m.groups,
        dimension_numbers=("NCHW", "OIHW", "NCHW"))
    if m.bias is not None:
        y = y + m.bias[None, :, None, None]
    if m.bn_acti:
        yh = ((y - m.running_mean[None, :, None, None])
              / jnp.sqrt(m.running_var[None, :, None, None] + m.eps)
              * m.gamma[None, :, None, None] + m.beta[None, :, None, None])
        y = jnp.where(yh >= 0.0, yh, m.alpha[None, :, None, None] * yh)
    return y


# ------------------------------ main -------------------------------------------

if __name__ == "__main__":
    key = jax.random.PRNGKey(0)
    kx, kp = jax.random.split(key)

    # Conv(nIn=4, nOut=8, kSize=3, stride=1, padding=1, bn_acti=True)
    module = ConvPallas(nIn=4, nOut=8, kSize=3, stride=1, padding=1,
                        dilation=(1, 1), groups=1, bn_acti=True, bias=False, key=kp)

    x = jax.random.normal(kx, (2, 4, 16, 16), jnp.float32)

    conv_fn = jax.jit(module.__call__)
    out = jax.block_until_ready(conv_fn(x))

    ref = jax.block_until_ready(_reference(x, module))
    assert out.shape == ref.shape == (2, 8, 16, 16)
    err = float(jnp.max(jnp.abs(out - ref)))
    assert jnp.allclose(out, ref, rtol=2e-4, atol=2e-4), err
    print("KERNEL_OK")
</pallas_src>

<mosaic_0001>
module attributes {stable_mosaic.version = 11 : i64} {
  func.func @_conv_kernel(%arg0: i32, %arg1: i32, %arg2: memref<1x1x18x18x4xbf16, #tpu.memory_space<vmem>>, %arg3: memref<9x4x8xbf16, #tpu.memory_space<vmem>>, %arg4: memref<1x8xf32, #tpu.memory_space<vmem>>, %arg5: memref<1x8xf32, #tpu.memory_space<vmem>>, %arg6: memref<1x8xf32, #tpu.memory_space<vmem>>, %arg7: memref<1x256x8xf32, #tpu.memory_space<vmem>>) attributes {dimension_semantics = [#tpu.dimension_semantics<parallel>, #tpu.dimension_semantics<parallel>], iteration_bounds = array<i64: 2, 1>, scalar_prefetch = 0 : i64, scratch_operands = 0 : i64, tpu.core_type = #tpu.core_type<tc>, window_params = [{transform_indices = @transform_0, window_bounds = array<i64: 1, 1, 18, 18, 4>}, {pipeline_mode = #tpu.pipeline_mode<synchronous>, transform_indices = @transform_1, window_bounds = array<i64: 9, 4, 8>}, {pipeline_mode = #tpu.pipeline_mode<synchronous>, transform_indices = @transform_2, window_bounds = array<i64: 1, 8>}, {pipeline_mode = #tpu.pipeline_mode<synchronous>, transform_indices = @transform_3, window_bounds = array<i64: 1, 8>}, {pipeline_mode = #tpu.pipeline_mode<synchronous>, transform_indices = @transform_4, window_bounds = array<i64: 1, 8>}, {transform_indices = @transform_5, window_bounds = array<i64: 1, 256, 8>}]} {
    %cst = arith.constant 0.000000e+00 : f32
    %0 = vector.broadcast %cst : f32 to vector<256x8xf32>
    %c0 = arith.constant 0 : index
    %c0_0 = arith.constant 0 : index
    %c0_1 = arith.constant 0 : index
    %c0_2 = arith.constant 0 : index
    %c0_3 = arith.constant 0 : index
    %1 = vector.load %arg2[%c0, %c0_0, %c0_1, %c0_2, %c0_3] : memref<1x1x18x18x4xbf16, #tpu.memory_space<vmem>>, vector<1x1x16x16x4xbf16>
    %2 = vector.shape_cast %1 : vector<1x1x16x16x4xbf16> to vector<16x16x4xbf16>
    %3 = vector.shape_cast %2 : vector<16x16x4xbf16> to vector<256x4xbf16>
    %c0_4 = arith.constant 0 : index
    %c0_5 = arith.constant 0 : index
    %c0_6 = arith.constant 0 : index
    %4 = vector.load %arg3[%c0_4, %c0_5, %c0_6] : memref<9x4x8xbf16, #tpu.memory_space<vmem>>, vector<1x4x8xbf16>
    %5 = vector.shape_cast %4 : vector<1x4x8xbf16> to vector<4x8xbf16>
    %cst_7 = arith.constant dense<0.000000e+00> : vector<256x8xf32>
    %6 = tpu.matmul %3, %5, %cst_7 {dimension_numbers = #tpu.dot_dimension_numbers<[1], [0], [0], [1], [0, 0, 1, 1], [], []>} : vector<256x4xbf16>, vector<4x8xbf16>, vector<256x8xf32> -> vector<256x8xf32>
    %7 = arith.addf %0, %6 : vector<256x8xf32>
    %c0_8 = arith.constant 0 : index
    %c0_9 = arith.constant 0 : index
    %c0_10 = arith.constant 0 : index
    %c1 = arith.constant 1 : index
    %c0_11 = arith.constant 0 : index
    %8 = vector.load %arg2[%c0_8, %c0_9, %c0_10, %c1, %c0_11] : memref<1x1x18x18x4xbf16, #tpu.memory_space<vmem>>, vector<1x1x16x16x4xbf16>
    %9 = vector.shape_cast %8 : vector<1x1x16x16x4xbf16> to vector<16x16x4xbf16>
    %10 = vector.shape_cast %9 : vector<16x16x4xbf16> to vector<256x4xbf16>
    %c1_12 = arith.constant 1 : index
    %c0_13 = arith.constant 0 : index
    %c0_14 = arith.constant 0 : index
    %11 = vector.load %arg3[%c1_12, %c0_13, %c0_14] : memref<9x4x8xbf16, #tpu.memory_space<vmem>>, vector<1x4x8xbf16>
    %12 = vector.shape_cast %11 : vector<1x4x8xbf16> to vector<4x8xbf16>
    %cst_15 = arith.constant dense<0.000000e+00> : vector<256x8xf32>
    %13 = tpu.matmul %10, %12, %cst_15 {dimension_numbers = #tpu.dot_dimension_numbers<[1], [0], [0], [1], [0, 0, 1, 1], [], []>} : vector<256x4xbf16>, vector<4x8xbf16>, vector<256x8xf32> -> vector<256x8xf32>
    %14 = arith.addf %7, %13 : vector<256x8xf32>
    %c0_16 = arith.constant 0 : index
    %c0_17 = arith.constant 0 : index
    %c0_18 = arith.constant 0 : index
    %c2 = arith.constant 2 : index
    %c0_19 = arith.constant 0 : index
    %15 = vector.load %arg2[%c0_16, %c0_17, %c0_18, %c2, %c0_19] : memref<1x1x18x18x4xbf16, #tpu.memory_space<vmem>>, vector<1x1x16x16x4xbf16>
    %16 = vector.shape_cast %15 : vector<1x1x16x16x4xbf16> to vector<16x16x4xbf16>
    %17 = vector.shape_cast %16 : vector<16x16x4xbf16> to vector<256x4xbf16>
    %c2_20 = arith.constant 2 : index
    %c0_21 = arith.constant 0 : index
    %c0_22 = arith.constant 0 : index
    %18 = vector.load %arg3[%c2_20, %c0_21, %c0_22] : memref<9x4x8xbf16, #tpu.memory_space<vmem>>, vector<1x4x8xbf16>
    %19 = vector.shape_cast %18 : vector<1x4x8xbf16> to vector<4x8xbf16>
    %cst_23 = arith.constant dense<0.000000e+00> : vector<256x8xf32>
    %20 = tpu.matmul %17, %19, %cst_23 {dimension_numbers = #tpu.dot_dimension_numbers<[1], [0], [0], [1], [0, 0, 1, 1], [], []>} : vector<256x4xbf16>, vector<4x8xbf16>, vector<256x8xf32> -> vector<256x8xf32>
    %21 = arith.addf %14, %20 : vector<256x8xf32>
    %c0_24 = arith.constant 0 : index
    %c0_25 = arith.constant 0 : index
    %c1_26 = arith.constant 1 : index
    %c0_27 = arith.constant 0 : index
    %c0_28 = arith.constant 0 : index
    %22 = vector.load %arg2[%c0_24, %c0_25, %c1_26, %c0_27, %c0_28] : memref<1x1x18x18x4xbf16, #tpu.memory_space<vmem>>, vector<1x1x16x16x4xbf16>
    %23 = vector.shape_cast %22 : vector<1x1x16x16x4xbf16> to vector<16x16x4xbf16>
    %24 = vector.shape_cast %23 : vector<16x16x4xbf16> to vector<256x4xbf16>
    %c3 = arith.constant 3 : index
    %c0_29 = arith.constant 0 : index
    %c0_30 = arith.constant 0 : index
    %25 = vector.load %arg3[%c3, %c0_29, %c0_30] : memref<9x4x8xbf16, #tpu.memory_space<vmem>>, vector<1x4x8xbf16>
    %26 = vector.shape_cast %25 : vector<1x4x8xbf16> to vector<4x8xbf16>
    %cst_31 = arith.constant dense<0.000000e+00> : vector<256x8xf32>
    %27 = tpu.matmul %24, %26, %cst_31 {dimension_numbers = #tpu.dot_dimension_numbers<[1], [0], [0], [1], [0, 0, 1, 1], [], []>} : vector<256x4xbf16>, vector<4x8xbf16>, vector<256x8xf32> -> vector<256x8xf32>
    %28 = arith.addf %21, %27 : vector<256x8xf32>
    %c0_32 = arith.constant 0 : index
    %c0_33 = arith.constant 0 : index
    %c1_34 = arith.constant 1 : index
    %c1_35 = arith.constant 1 : index
    %c0_36 = arith.constant 0 : index
    %29 = vector.load %arg2[%c0_32, %c0_33, %c1_34, %c1_35, %c0_36] : memref<1x1x18x18x4xbf16, #tpu.memory_space<vmem>>, vector<1x1x16x16x4xbf16>
    %30 = vector.shape_cast %29 : vector<1x1x16x16x4xbf16> to vector<16x16x4xbf16>
    %31 = vector.shape_cast %30 : vector<16x16x4xbf16> to vector<256x4xbf16>
    %c4 = arith.constant 4 : index
    %c0_37 = arith.constant 0 : index
    %c0_38 = arith.constant 0 : index
    %32 = vector.load %arg3[%c4, %c0_37, %c0_38] : memref<9x4x8xbf16, #tpu.memory_space<vmem>>, vector<1x4x8xbf16>
    %33 = vector.shape_cast %32 : vector<1x4x8xbf16> to vector<4x8xbf16>
    %cst_39 = arith.constant dense<0.000000e+00> : vector<256x8xf32>
    %34 = tpu.matmul %31, %33, %cst_39 {dimension_numbers = #tpu.dot_dimension_numbers<[1], [0], [0], [1], [0, 0, 1, 1], [], []>} : vector<256x4xbf16>, vector<4x8xbf16>, vector<256x8xf32> -> vector<256x8xf32>
    %35 = arith.addf %28, %34 : vector<256x8xf32>
    %c0_40 = arith.constant 0 : index
    %c0_41 = arith.constant 0 : index
    %c1_42 = arith.constant 1 : index
    %c2_43 = arith.constant 2 : index
    %c0_44 = arith.constant 0 : index
    %36 = vector.load %arg2[%c0_40, %c0_41, %c1_42, %c2_43, %c0_44] : memref<1x1x18x18x4xbf16, #tpu.memory_space<vmem>>, vector<1x1x16x16x4xbf16>
    %37 = vector.shape_cast %36 : vector<1x1x16x16x4xbf16> to vector<16x16x4xbf16>
    %38 = vector.shape_cast %37 : vector<16x16x4xbf16> to vector<256x4xbf16>
    %c5 = arith.constant 5 : index
    %c0_45 = arith.constant 0 : index
    %c0_46 = arith.constant 0 : index
    %39 = vector.load %arg3[%c5, %c0_45, %c0_46] : memref<9x4x8xbf16, #tpu.memory_space<vmem>>, vector<1x4x8xbf16>
    %40 = vector.shape_cast %39 : vector<1x4x8xbf16> to vector<4x8xbf16>
    %cst_47 = arith.constant dense<0.000000e+00> : vector<256x8xf32>
    %41 = tpu.matmul %38, %40, %cst_47 {dimension_numbers = #tpu.dot_dimension_numbers<[1], [0], [0], [1], [0, 0, 1, 1], [], []>} : vector<256x4xbf16>, vector<4x8xbf16>, vector<256x8xf32> -> vector<256x8xf32>
    %42 = arith.addf %35, %41 : vector<256x8xf32>
    %c0_48 = arith.constant 0 : index
    %c0_49 = arith.constant 0 : index
    %c2_50 = arith.constant 2 : index
    %c0_51 = arith.constant 0 : index
    %c0_52 = arith.constant 0 : index
    %43 = vector.load %arg2[%c0_48, %c0_49, %c2_50, %c0_51, %c0_52] : memref<1x1x18x18x4xbf16, #tpu.memory_space<vmem>>, vector<1x1x16x16x4xbf16>
    %44 = vector.shape_cast %43 : vector<1x1x16x16x4xbf16> to vector<16x16x4xbf16>
    %45 = vector.shape_cast %44 : vector<16x16x4xbf16> to vector<256x4xbf16>
    %c6 = arith.constant 6 : index
    %c0_53 = arith.constant 0 : index
    %c0_54 = arith.constant 0 : index
    %46 = vector.load %arg3[%c6, %c0_53, %c0_54] : memref<9x4x8xbf16, #tpu.memory_space<vmem>>, vector<1x4x8xbf16>
    %47 = vector.shape_cast %46 : vector<1x4x8xbf16> to vector<4x8xbf16>
    %cst_55 = arith.constant dense<0.000000e+00> : vector<256x8xf32>
    %48 = tpu.matmul %45, %47, %cst_55 {dimension_numbers = #tpu.dot_dimension_numbers<[1], [0], [0], [1], [0, 0, 1, 1], [], []>} : vector<256x4xbf16>, vector<4x8xbf16>, vector<256x8xf32> -> vector<256x8xf32>
    %49 = arith.addf %42, %48 : vector<256x8xf32>
    %c0_56 = arith.constant 0 : index
    %c0_57 = arith.constant 0 : index
    %c2_58 = arith.constant 2 : index
    %c1_59 = arith.constant 1 : index
    %c0_60 = arith.constant 0 : index
    %50 = vector.load %arg2[%c0_56, %c0_57, %c2_58, %c1_59, %c0_60] : memref<1x1x18x18x4xbf16, #tpu.memory_space<vmem>>, vector<1x1x16x16x4xbf16>
    %51 = vector.shape_cast %50 : vector<1x1x16x16x4xbf16> to vector<16x16x4xbf16>
    %52 = vector.shape_cast %51 : vector<16x16x4xbf16> to vector<256x4xbf16>
    %c7 = arith.constant 7 : index
    %c0_61 = arith.constant 0 : index
    %c0_62 = arith.constant 0 : index
    %53 = vector.load %arg3[%c7, %c0_61, %c0_62] : memref<9x4x8xbf16, #tpu.memory_space<vmem>>, vector<1x4x8xbf16>
    %54 = vector.shape_cast %53 : vector<1x4x8xbf16> to vector<4x8xbf16>
    %cst_63 = arith.constant dense<0.000000e+00> : vector<256x8xf32>
    %55 = tpu.matmul %52, %54, %cst_63 {dimension_numbers = #tpu.dot_dimension_numbers<[1], [0], [0], [1], [0, 0, 1, 1], [], []>} : vector<256x4xbf16>, vector<4x8xbf16>, vector<256x8xf32> -> vector<256x8xf32>
    %56 = arith.addf %49, %55 : vector<256x8xf32>
    %c0_64 = arith.constant 0 : index
    %c0_65 = arith.constant 0 : index
    %c2_66 = arith.constant 2 : index
    %c2_67 = arith.constant 2 : index
    %c0_68 = arith.constant 0 : index
    %57 = vector.load %arg2[%c0_64, %c0_65, %c2_66, %c2_67, %c0_68] : memref<1x1x18x18x4xbf16, #tpu.memory_space<vmem>>, vector<1x1x16x16x4xbf16>
    %58 = vector.shape_cast %57 : vector<1x1x16x16x4xbf16> to vector<16x16x4xbf16>
    %59 = vector.shape_cast %58 : vector<16x16x4xbf16> to vector<256x4xbf16>
    %c8 = arith.constant 8 : index
    %c0_69 = arith.constant 0 : index
    %c0_70 = arith.constant 0 : index
    %60 = vector.load %arg3[%c8, %c0_69, %c0_70] : memref<9x4x8xbf16, #tpu.memory_space<vmem>>, vector<1x4x8xbf16>
    %61 = vector.shape_cast %60 : vector<1x4x8xbf16> to vector<4x8xbf16>
    %cst_71 = arith.constant dense<0.000000e+00> : vector<256x8xf32>
    %62 = tpu.matmul %59, %61, %cst_71 {dimension_numbers = #tpu.dot_dimension_numbers<[1], [0], [0], [1], [0, 0, 1, 1], [], []>} : vector<256x4xbf16>, vector<4x8xbf16>, vector<256x8xf32> -> vector<256x8xf32>
    %63 = arith.addf %56, %62 : vector<256x8xf32>
    %c0_72 = arith.constant 0 : index
    %c0_73 = arith.constant 0 : index
    %64 = vector.load %arg4[%c0_72, %c0_73] : memref<1x8xf32, #tpu.memory_space<vmem>>, vector<1x8xf32>
    %65 = vector.broadcast %64 : vector<1x8xf32> to vector<256x8xf32>
    %66 = arith.mulf %63, %65 : vector<256x8xf32>
    %c0_74 = arith.constant 0 : index
    %c0_75 = arith.constant 0 : index
    %67 = vector.load %arg5[%c0_74, %c0_75] : memref<1x8xf32, #tpu.memory_space<vmem>>, vector<1x8xf32>
    %68 = vector.broadcast %67 : vector<1x8xf32> to vector<256x8xf32>
    %69 = arith.addf %66, %68 : vector<256x8xf32>
    %cst_76 = arith.constant 0.000000e+00 : f32
    %70 = vector.broadcast %cst_76 : f32 to vector<256x8xf32>
    %71 = arith.cmpf oge, %69, %70 : vector<256x8xf32>
    %c0_77 = arith.constant 0 : index
    %c0_78 = arith.constant 0 : index
    %72 = vector.load %arg6[%c0_77, %c0_78] : memref<1x8xf32, #tpu.memory_space<vmem>>, vector<1x8xf32>
    %73 = vector.broadcast %72 : vector<1x8xf32> to vector<256x8xf32>
    %74 = arith.mulf %73, %69 : vector<256x8xf32>
    %75 = arith.select %71, %69, %74 : vector<256x8xi1>, vector<256x8xf32>
    %76 = vector.shape_cast %75 : vector<256x8xf32> to vector<1x256x8xf32>
    %c0_79 = arith.constant 0 : index
    %c0_80 = arith.constant 0 : index
    %c0_81 = arith.constant 0 : index
    %77 = vector.load %arg7[%c0_79, %c0_80, %c0_81] : memref<1x256x8xf32, #tpu.memory_space<vmem>>, vector<1x256x8xf32>
    tpu.vector_store %arg7[%c0_79, %c0_80, %c0_81], %76 {strides = array<i32>} : memref<1x256x8xf32, #tpu.memory_space<vmem>>, vector<1x256x8xf32>,
    return
  }
  func.func @transform_0(%arg0: i32, %arg1: i32) -> (i32, i32, i32, i32, i32) {
    %c0_i32 = arith.constant 0 : i32
    %c0_i32_0 = arith.constant 0 : i32
    %c0_i32_1 = arith.constant 0 : i32
    %c0_i32_2 = arith.constant 0 : i32
    return %arg0, %arg1, %c0_i32, %c0_i32_0, %c0_i32_1 : i32, i32, i32, i32, i32
  }
  func.func @transform_1(%arg0: i32, %arg1: i32) -> (i32, i32, i32) {
    %c0_i32 = arith.constant 0 : i32
    %c0_i32_0 = arith.constant 0 : i32
    %c0_i32_1 = arith.constant 0 : i32
    %c0_i32_2 = arith.constant 0 : i32
    return %c0_i32, %c0_i32_0, %c0_i32_1 : i32, i32, i32
  }
  func.func @transform_2(%arg0: i32, %arg1: i32) -> (i32, i32) {
    %c0_i32 = arith.constant 0 : i32
    %c0_i32_0 = arith.constant 0 : i32
    %c0_i32_1 = arith.constant 0 : i32
    return %c0_i32, %c0_i32_0 : i32, i32
  }
  func.func @transform_3(%arg0: i32, %arg1: i32) -> (i32, i32) {
    %c0_i32 = arith.constant 0 : i32
    %c0_i32_0 = arith.constant 0 : i32
    %c0_i32_1 = arith.constant 0 : i32
    return %c0_i32, %c0_i32_0 : i32, i32
  }
  func.func @transform_4(%arg0: i32, %arg1: i32) -> (i32, i32) {
    %c0_i32 = arith.constant 0 : i32
    %c0_i32_0 = arith.constant 0 : i32
    %c0_i32_1 = arith.constant 0 : i32
    return %c0_i32, %c0_i32_0 : i32, i32
  }
  func.func @transform_5(%arg0: i32, %arg1: i32) -> (i32, i32, i32) {
    %c0_i32 = arith.constant 0 : i32
    %c0_i32_0 = arith.constant 0 : i32
    return %arg0, %arg1, %c0_i32 : i32, i32, i32
  }
}

</mosaic_0001>

<bundles_post_ra>
// kernel: a_call__.1
= control target key start
LH: loop header
LB: loop body
LE: loop exit
PB: predicated region body
PF: predicated region fallthrough
CT: control target
= control target key end

     0   :  { %s5250_s18 = smov 0   ;;  %s5252_s19 = smov 0   ;;  %s6799_s0 = inlined_call_operand.vmem [shape: bf16[2,1,18,18,4], index: 0, kind: input, shape index: {}]   ;;  %s6800_s1 = inlined_call_operand.vmem [shape: bf16[9,4,8], index: 1, kind: input, shape index: {}]   ;;  %s6801_s2 = inlined_call_operand.vmem [shape: f32[1,8], index: 2, kind: input, shape index: {}]   ;;  %s6802_s3 = inlined_call_operand.vmem [shape: f32[1,8], index: 3, kind: input, shape index: {}]   ;;  %s6803_s4 = inlined_call_operand.vmem [shape: f32[1,8], index: 4, kind: input, shape index: {}]   ;;  %s6804_s5 = inlined_call_operand.vmem [shape: f32[2,256,8], index: 5, kind: output, shape index: {}]  }
   0x1   :  { %s5254_s20 = smov 0  }
   0x2 LB: > { %s27_s21 = sadd.s32 1, %s5214_s19  ;;  %p4473_p0 = scmp.ge.s32.totalorder %s5218_s20, 1  ;;  %s5218_s20 = sphi %s5254_s20, %s15_s20   ;;  %s5214_s19 = sphi %s5252_s19, %s6818_s19   ;;  %s5210_s18 = sphi %s5250_s18, %s6817_s18  }
   0x3   : > { %p29_p1 = scmp.ge.s32.totalorder %s27_s21, 2  ;;  %p207_p2 = scmp.lt.s32.totalorder %s5218_s20, 3 }
   0x5   : > { %s6820_s21 = smov (%p29_p1, %s27_s21), 0  ;;  %p208_p3 = pnand %p4473_p0, %p207_p2 }
   0x7   : > { %211 = sbr.rel (%p208_p3) target bundleno = 762 (0x2fa), region = 40 }
   0xc   : > { %v4477_v0 = vld [vmem:[%s6800_s1 + $0x2] sm:$0x3]  ;;  %vm798_vm0 = vcmask 1041408   ;;  %p243_p4 = scmp.lt.s32.totalorder %s5210_s18, 1  ;;  %v4590_v2 = vld [vmem:[%s6800_s1 + $0x4] sm:$0x3] }
   0xd   : > { %v800_v1 = vsel %vm798_vm0, %v4477_v0, 0  ;;  %v1373_v3 = vsel %vm798_vm0, %v4590_v2, 0  ;;  %v4639_v4 = vld [vmem:[%s6800_s1 + $0x6] sm:$0x3]  ;;  %v295_v5 = vld [vmem:[%s6800_s1] sm:$0x3] }
   0xe   : > { %5112 = vmatpush.bf16.msra.mxu1 %v800_v1  ;;  %5113 = vmatpush.bf16.msra.mxu2 %v800_v1  ;;  %s6822_s18 = smov (!%p243_p4, %s5210_s18), 1  ;;  %v4768_v6 = vld [vmem:[%s6800_s1 + $0x8] sm:$0x3]  ;;  %v1660_v7 = vsel %vm798_vm0, %v4639_v4, 0  ;;  %v1020_v8 = vsel %vm798_vm0, %v295_v5, 0  ;;  %vm749_vm4 = vcmask 31744  }
   0xf   : > { %5114 = vmatpush.bf16.msra.mxu3 %v800_v1  ;;  %809 = vmatpush.bf16.msra.mxu0 %v800_v1  ;;  %s5115_s7 = smul.u32 216, %s6822_s18  ;;  %v2314_v9 = vsel %vm798_vm0, %v4768_v6, 0  ;;  %vm312_vm1 = vsmask.f32 3328  ;;  %vm313_vm2 = vsmask.f32 7440 }
  0x10   : > { %vm5306_vm3 = vmor %vm312_vm1, %vm313_vm2  ;;  %vm1159_vm5 = vcmask 1042432   ;;  %vm1160_vm6 = vcmask 1046532   ;;  %s5063_s29 = sshll.u32 %s6822_s18, 8  ;;  %vm4346_vm8 = vcmask 64512  }
  0x11   : > { %s5294_s10 = scalar_lea.vmem %s6799_s0, %s5115_s7  ;;  %vm5480_vm7 = vmor %vm1159_vm5, %vm1160_vm6  ;;  %s6387_s6 = scalar_lea.vmem %s6804_s5, %s5063_s29 }
  0x12   : > { %1382 = vmatpush.bf16.msrb.mxu2 %v1373_v3  ;;  %1029 = vmatpush.bf16.msrb.mxu1 %v1020_v8  ;;  %v271_v10 = vld [vmem:[%s5294_s10 + $0x30] sm:$0xf]  ;;  %v272_v11 = vld [vmem:[%s5294_s10 + $0x34] sm:$0xf]  ;;  %v300_v12 = vld [vmem:[%s5294_s10 + $0x38] sm:$0x1] }
  0x13   : > { %1669 = vmatpush.bf16.msrb.mxu3 %v1660_v7  ;;  %2323 = vmatpush.bf16.msrb.mxu0 %v2314_v9  ;;  %v412_v13 = vshrl.u32 %v271_v10, 16  ;;  %v415_v14 = vshll.u32 %v271_v10, 16  ;;  %v421_v15 = vshll.u32 %v272_v11, 16  ;;  %v425_v16 = vshrl.u32 %v272_v11, 16  ;;  %v279_v17 = vld [vmem:[%s5294_s10 + $0x60] sm:$0xf] }
  0x14   : > { %v431_v18 = vshll.u32 %v300_v12, 16  ;;  %v280_v19 = vld [vmem:[%s5294_s10 + $0x64] sm:$0xf]  ;;  %v304_v20 = vld [vmem:[%s5294_s10 + $0x68] sm:$0x1]  ;;  %v508_v21 = vshrl.u32 %v279_v17, 16 }
  0x15   : > { %v414_v22 = vrot.slane %v412_v13, 4  ;;  %v417_v23 = vrot.slane %v415_v14, 5  ;;  %v423_v24 = vrot.slane %v421_v15, 5  ;;  %v427_v25 = vrot.slane %v425_v16, 4  ;;  %v287_v26 = vld [vmem:[%s5294_s10 + $0x90] sm:$0xf] }
  0x16   : > { %v433_v27 = vrot.slane %v431_v18, 5  ;;  %v510_v28 = vrot.slane %v508_v21, 4  ;;  %v511_v29 = vshll.u32 %v279_v17, 16  ;;  %v517_v30 = vshll.u32 %v280_v19, 16  ;;  %v288_v35 = vld [vmem:[%s5294_s10 + $0x94] sm:$0xf] }
  0x17   : > { %v418_v31 = vor.u32 %v417_v23, %v414_v22  ;;  %v428_v32 = vor.u32 %v427_v25, %v423_v24  ;;  %v521_v33 = vshrl.u32 %v280_v19, 16  ;;  %v527_v34 = vshll.u32 %v304_v20, 16  ;;  %v308_v45 = vld [vmem:[%s5294_s10 + $0x98] sm:$0x1]  ;;  %v263_v61 = vld [vmem:[%s5294_s10] sm:$0xf] }
  0x18   : > { %v513_v37 = vrot.slane %v511_v29, 5  ;;  %v519_v38 = vrot.slane %v517_v30, 5  ;;  %v604_v39 = vshrl.u32 %v287_v26, 16  ;;  %v607_v47 = vshll.u32 %v287_v26, 16  ;;  %v5319_v1 = vld [vmem:[%s5294_s10 + $0x4] sm:$0xf] }
  0x19   : > { %v419_v40 = vrot.slane %v418_v31, 4  ;;  %v429_v41 = vrot.slane %v428_v32, 4  ;;  %v523_v42 = vrot.slane %v521_v33, 4  ;;  %v529_v43 = vrot.slane %v527_v34, 5  ;;  %v5322_v2 = vld [vmem:[%s5294_s10 + $0x8] sm:$0x1] }
  0x1a   : > { %v514_v44 = vor.u32 %v513_v37, %v510_v28  ;;  %v606_v46 = vrot.slane %v604_v39, 4  ;;  %v613_v48 = vshll.u32 %v288_v35, 16  ;;  %v617_v52 = vshrl.u32 %v288_v35, 16  ;;  %v273_v19 = vld [vmem:[%s5294_s10 + $0x3c] sm:$0xf] }
  0x1b   : > { %v424_v49 = vsel %vm5306_vm3, %v419_v40, %v423_v24  ;;  %v434_v50 = vsel %vm5306_vm3, %v429_v41, %v433_v27  ;;  %v524_v51 = vor.u32 %v523_v42, %v519_v38  ;;  %v609_v56 = vrot.slane %v607_v47, 5  ;;  %v5334_v20 = vld [vmem:[%s5294_s10 + $0x40] sm:$0xf]  ;;  %v5339_v25 = vld [vmem:[%s5294_s10 + $0x44] sm:$0x1] }
  0x1c   : > { %v709_v53 = vunpack.c.l.b16 %v424_v49  ;;  %v710_v54 = vunpack.c.l.b16 %v434_v50  ;;  %v515_v55 = vrot.slane %v514_v44, 4  ;;  %v615_v58 = vrot.slane %v613_v48, 5  ;;  %v281_v33 = vld [vmem:[%s5294_s10 + $0x6c] sm:$0xf]  ;;  %v305_v47 = vld [vmem:[%s5294_s10 + $0x74] sm:$0x1] }
  0x1d   : > { %v525_v57 = vrot.slane %v524_v51, 4  ;;  %v619_v59 = vrot.slane %v617_v52, 4  ;;  %v623_v60 = vshll.u32 %v308_v45, 16  ;;  %v610_v0 = vor.u32 %v609_v56, %v606_v46 }
  0x1e   : > { %v737_v62 = vpack.c.b16 %v710_v54, %v709_v53  ;;  %v520_v63 = vsel %vm5306_vm3, %v515_v55, %v519_v38  ;;  %v316_v9 = vshrl.u32 %v263_v61, 16  ;;  %v319_v10 = vshll.u32 %v263_v61, 16  ;;  %v289_v61 = vld [vmem:[%s5294_s10 + $0x9c] sm:$0xf] }
  0x1f   : > { %v530_v3 = vsel %vm5306_vm3, %v525_v57, %v529_v43  ;;  %v717_v4 = vunpack.c.l.b16 %v520_v63  ;;  %v620_v5 = vor.u32 %v619_v59, %v615_v58  ;;  %v625_v6 = vrot.slane %v623_v60, 5  ;;  %v282_v43 = vld [vmem:[%s5294_s10 + $0x70] sm:$0xf] }
  0x20   : > { %4482 = vmatmul.msk.bf16.vlgmr.msra.gmra.mxu1 %vm749_vm4, %v737_v62  ;;  %v718_v7 = vunpack.c.l.b16 %v530_v3  ;;  %v611_v8 = vrot.slane %v610_v0, 4  ;;  %v325_v12 = vshll.u32 %v5319_v1, 16  ;;  %v329_v13 = vshrl.u32 %v5319_v1, 16  ;;  %v290_v3 = vld [vmem:[%s5294_s10 + $0xa0] sm:$0xf] }
  0x21   : > { %v621_v11 = vrot.slane %v620_v5, 4  ;;  %v335_v14 = vshll.u32 %v5322_v2, 16  ;;  %v318_v17 = vrot.slane %v316_v9, 4  ;;  %v321_v18 = vrot.slane %v319_v10, 5 }
  0x22   : > { %v741_v15 = vpack.c.b16 %v718_v7, %v717_v4  ;;  %v616_v16 = vsel %vm5306_vm3, %v611_v8, %v615_v58  ;;  %v327_v23 = vrot.slane %v325_v12, 5  ;;  %v331_v24 = vrot.slane %v329_v13, 4  ;;  %v309_v8 = vld [vmem:[%s5294_s10 + $0xa4] sm:$0x1] }
  0x23   : > { %v626_v21 = vsel %vm5306_vm3, %v621_v11, %v625_v6  ;;  %v725_v22 = vunpack.c.l.b16 %v616_v16  ;;  %v322_v27 = vor.u32 %v321_v18, %v318_v17  ;;  %v337_v28 = vrot.slane %v335_v14, 5 }
  0x24   : > { %4486 = vmatmul.msk.bf16.vlgmr.msra.gmra.mxu2 %vm749_vm4, %v741_v15  ;;  %v726_v26 = vunpack.c.l.b16 %v626_v21  ;;  %v332_v29 = vor.u32 %v331_v24, %v327_v23  ;;  %v436_v30 = vshrl.u32 %v273_v19, 16  ;;  %v439_v31 = vshll.u32 %v273_v19, 16 }
  0x25   : > { %v445_v32 = vshll.u32 %v5334_v20, 16  ;;  %v323_v35 = vrot.slane %v322_v27, 4  ;;  %v449_v37 = vshrl.u32 %v5334_v20, 16  ;;  %v455_v38 = vshll.u32 %v5339_v25, 16 }
  0x26   : > { %v745_v34 = vpack.c.b16 %v726_v26, %v725_v22  ;;  %v333_v39 = vrot.slane %v332_v29, 4  ;;  %v438_v40 = vrot.slane %v436_v30, 4  ;;  %v441_v41 = vrot.slane %v439_v31, 5  ;;  %v265_v22 = vld [vmem:[%s5294_s10 + $0xc] sm:$0xf] }
  0x27   : > { %v447_v42 = vrot.slane %v445_v32, 5  ;;  %v328_v44 = vsel %vm5306_vm3, %v323_v35, %v327_v23  ;;  %v451_v45 = vrot.slane %v449_v37, 4  ;;  %v457_v46 = vrot.slane %v455_v38, 5  ;;  %v5368_v32 = vld [vmem:[%s5294_s10 + $0x14] sm:$0x1] }
  0x28   : > { %4490 = vmatmul.msk.bf16.vlgmr.msra.gmra.mxu3 %vm749_vm4, %v745_v34  ;;  %v532_v48 = vshrl.u32 %v281_v33, 16  ;;  %v338_v49 = vsel %vm5306_vm3, %v333_v39, %v337_v28  ;;  %v701_v50 = vunpack.c.l.b16 %v328_v44  ;;  %v442_v51 = vor.u32 %v441_v41, %v438_v40  ;;  %v5365_v28 = vld [vmem:[%s5294_s10 + $0x10] sm:$0xf] }
  0x29   : > { %v535_v52 = vshll.u32 %v281_v33, 16  ;;  %v702_v53 = vunpack.c.l.b16 %v338_v49  ;;  %v452_v54 = vor.u32 %v451_v45, %v447_v42  ;;  %v541_v56 = vshll.u32 %v282_v43, 16 }
  0x2a   : > { %v534_v55 = vrot.slane %v532_v48, 4  ;;  %v443_v57 = vrot.slane %v442_v51, 4  ;;  %v545_v59 = vshrl.u32 %v282_v43, 16  ;;  %v551_v60 = vshll.u32 %v305_v47, 16  ;;  %v5378_v47 = vld [vmem:[%s5294_s10 + $0x4c] sm:$0xf] }
  0x2b   : > { %v537_v58 = vrot.slane %v535_v52, 5  ;;  %v733_v62 = vpack.c.b16 %v702_v53, %v701_v50  ;;  %v453_v63 = vrot.slane %v452_v54, 4  ;;  %v543_v0 = vrot.slane %v541_v56, 5  ;;  %v5383_v56 = vld [vmem:[%s5294_s10 + $0x50] sm:$0x1] }
  0x2c   : > { %v448_v4 = vsel %vm5306_vm3, %v443_v57, %v447_v42  ;;  %v547_v6 = vrot.slane %v545_v59, 4  ;;  %v553_v7 = vrot.slane %v551_v60, 5  ;;  %v628_v11 = vshrl.u32 %v289_v61, 16  ;;  %v275_v42 = vld [vmem:[%s5294_s10 + $0x48] sm:$0xf] }
  0x2d   : > { %v538_v5 = vor.u32 %v537_v58, %v534_v55  ;;  %4478 = vmatmul.msk.bf16.vlgmr.msra.gmra.mxu0 %vm749_vm4, %v733_v62  ;;  %v458_v9 = vsel %vm5306_vm3, %v453_v63, %v457_v46  ;;  %v711_v10 = vunpack.c.l.b16 %v448_v4  ;;  %v631_v12 = vshll.u32 %v289_v61, 16 }
  0x2e   : > { %v712_v13 = vunpack.c.l.b16 %v458_v9  ;;  %v548_v15 = vor.u32 %v547_v6, %v543_v0  ;;  %v637_v16 = vshll.u32 %v290_v3, 16  ;;  %v630_v17 = vrot.slane %v628_v11, 4 }
  0x2f   : > { %v539_v14 = vrot.slane %v538_v5, 4  ;;  %v633_v18 = vrot.slane %v631_v12, 5  ;;  %v641_v19 = vshrl.u32 %v290_v3, 16  ;;  %v647_v21 = vshll.u32 %v309_v8, 16  ;;  %v283_v3 = vld [vmem:[%s5294_s10 + $0x78] sm:$0xf] }
  0x30   : > { %v738_v23 = vpack.c.b16 %v712_v13, %v711_v10  ;;  %v549_v26 = vrot.slane %v548_v15, 4  ;;  %v639_v27 = vrot.slane %v637_v16, 5  ;;  %v340_v35 = vshrl.u32 %v265_v22, 16  ;;  %v284_v8 = vld [vmem:[%s5294_s10 + $0x7c] sm:$0xf] }
  0x31   : > { %v544_v24 = vsel %vm5306_vm3, %v539_v14, %v543_v0  ;;  %v634_v30 = vor.u32 %v633_v18, %v630_v17  ;;  %v643_v31 = vrot.slane %v641_v19, 4  ;;  %v649_v34 = vrot.slane %v647_v21, 5  ;;  %v306_v16 = vld [vmem:[%s5294_s10 + $0x80] sm:$0x1] }
  0x32   : > { %v719_v29 = vunpack.c.l.b16 %v544_v24  ;;  %4483 = vmatmul.msk.bf16.gmra.mxu1 %vm749_vm4, %v738_v23  ;;  %v554_v33 = vsel %vm5306_vm3, %v549_v26, %v553_v7  ;;  %v343_v37 = vshll.u32 %v265_v22, 16  ;;  %v349_v41 = vshll.u32 %v5365_v28, 16 }
  0x33   : > { %v720_v38 = vunpack.c.l.b16 %v554_v33  ;;  %v635_v39 = vrot.slane %v634_v30, 4  ;;  %v644_v40 = vor.u32 %v643_v31, %v639_v27  ;;  %v342_v43 = vrot.slane %v340_v35, 4 }
  0x34   : > { %v345_v44 = vrot.slane %v343_v37, 5  ;;  %v353_v45 = vshrl.u32 %v5365_v28, 16  ;;  %v359_v46 = vshll.u32 %v5368_v32, 16  ;;  %v351_v51 = vrot.slane %v349_v41, 5 }
  0x35   : > { %v742_v48 = vpack.c.b16 %v720_v38, %v719_v29  ;;  %v640_v49 = vsel %vm5306_vm3, %v635_v39, %v639_v27  ;;  %v645_v50 = vrot.slane %v644_v40, 4  ;;  %v460_v58 = vshrl.u32 %v275_v42, 16  ;;  %v292_v39 = vld [vmem:[%s5294_s10 + $0xac] sm:$0xf]  ;;  %v310_v40 = vld [vmem:[%s5294_s10 + $0xb0] sm:$0x1] }
  0x36   : > { %v727_v52 = vunpack.c.l.b16 %v640_v49  ;;  %v346_v53 = vor.u32 %v345_v44, %v342_v43  ;;  %v355_v54 = vrot.slane %v353_v45, 4  ;;  %v361_v55 = vrot.slane %v359_v46, 5 }
  0x37   : > { %4487 = vmatmul.msk.bf16.gmra.mxu2 %vm749_vm4, %v742_v48  ;;  %v650_v57 = vsel %vm5306_vm3, %v645_v50, %v649_v34  ;;  %v463_v59 = vshll.u32 %v275_v42, 16  ;;  %v469_v60 = vshll.u32 %v5378_v47, 16  ;;  %v473_v0 = vshrl.u32 %v5378_v47, 16  ;;  %v291_v34 = vld [vmem:[%s5294_s10 + $0xa8] sm:$0xf] }
  0x38   : > { %v728_v61 = vunpack.c.l.b16 %v650_v57  ;;  %v347_v62 = vrot.slane %v346_v53, 4  ;;  %v356_v63 = vor.u32 %v355_v54, %v351_v51  ;;  %v462_v4 = vrot.slane %v460_v58, 4 }
  0x39   : > { %v465_v5 = vrot.slane %v463_v59, 5  ;;  %v471_v6 = vrot.slane %v469_v60, 5  ;;  %v479_v7 = vshll.u32 %v5383_v56, 16  ;;  %v475_v12 = vrot.slane %v473_v0, 4  ;;  %v267_v59 = vld [vmem:[%s5294_s10 + $0x18] sm:$0xf] }
  0x3a   : > { %v746_v9 = vpack.c.b16 %v728_v61, %v727_v52  ;;  %v352_v10 = vsel %vm5306_vm3, %v347_v62, %v351_v51  ;;  %v357_v11 = vrot.slane %v356_v63, 4  ;;  %v556_v17 = vshrl.u32 %v283_v3, 16  ;;  %v5411_v63 = vld [vmem:[%s5294_s10 + $0x1c] sm:$0xf]  ;;  %v5414_v0 = vld [vmem:[%s5294_s10 + $0x20] sm:$0x1] }
  0x3b   : > { %v703_v13 = vunpack.c.l.b16 %v352_v10  ;;  %v466_v14 = vor.u32 %v465_v5, %v462_v4  ;;  %v481_v15 = vrot.slane %v479_v7, 5  ;;  %v476_v19 = vor.u32 %v475_v12, %v471_v6 }
  0x3c   : > { %4491 = vmatmul.msk.bf16.gmra.mxu3 %vm749_vm4, %v746_v9  ;;  %v362_v18 = vsel %vm5306_vm3, %v357_v11, %v361_v55  ;;  %v559_v21 = vshll.u32 %v283_v3, 16  ;;  %v565_v22 = vshll.u32 %v284_v8, 16  ;;  %v558_v26 = vrot.slane %v556_v17, 4 }
  0x3d   : > { %v704_v23 = vunpack.c.l.b16 %v362_v18  ;;  %v467_v24 = vrot.slane %v466_v14, 4  ;;  %v569_v27 = vshrl.u32 %v284_v8, 16  ;;  %v477_v29 = vrot.slane %v476_v19, 4 }
  0x3e   : > { %v561_v30 = vrot.slane %v559_v21, 5  ;;  %v567_v31 = vrot.slane %v565_v22, 5  ;;  %v575_v33 = vshll.u32 %v306_v16, 16  ;;  %v652_v48 = vshrl.u32 %v291_v34, 16  ;;  %v5424_v21 = vld [vmem:[%s5294_s10 + $0x58] sm:$0xf] }
  0x3f   : > { %v734_v35 = vpack.c.b16 %v704_v23, %v703_v13  ;;  %v472_v37 = vsel %vm5306_vm3, %v467_v24, %v471_v6  ;;  %v571_v38 = vrot.slane %v569_v27, 4  ;;  %v482_v41 = vsel %vm5306_vm3, %v477_v29, %v481_v15  ;;  %v277_v15 = vld [vmem:[%s5294_s10 + $0x54] sm:$0xf]  ;;  %v5429_v27 = vld [vmem:[%s5294_s10 + $0x5c] sm:$0x1] }
  0x40   : > { %v713_v42 = vunpack.c.l.b16 %v472_v37  ;;  %v562_v43 = vor.u32 %v561_v30, %v558_v26  ;;  %v577_v44 = vrot.slane %v575_v33, 5  ;;  %v714_v45 = vunpack.c.l.b16 %v482_v41 }
  0x41   : > { %4479 = vmatmul.msk.bf16.gmra.mxu0 %vm749_vm4, %v734_v35  ;;  %v572_v46 = vor.u32 %v571_v38, %v567_v31  ;;  %v655_v49 = vshll.u32 %v291_v34, 16  ;;  %v661_v51 = vshll.u32 %v292_v39, 16  ;;  %v665_v52 = vshrl.u32 %v292_v39, 16  ;;  %v285_v39 = vld [vmem:[%s5294_s10 + $0x84] sm:$0xf] }
  0x42   : > { %v563_v50 = vrot.slane %v562_v43, 4  ;;  %v671_v53 = vshll.u32 %v310_v40, 16  ;;  %v739_v54 = vpack.c.b16 %v714_v45, %v713_v42  ;;  %v654_v57 = vrot.slane %v652_v48, 4 }
  0x43   : > { %v573_v55 = vrot.slane %v572_v46, 4  ;;  %v657_v58 = vrot.slane %v655_v49, 5  ;;  %v663_v61 = vrot.slane %v661_v51, 5  ;;  %v667_v62 = vrot.slane %v665_v52, 4  ;;  %v286_v49 = vld [vmem:[%s5294_s10 + $0x88] sm:$0xf] }
  0x44   : > { %v568_v60 = vsel %vm5306_vm3, %v563_v50, %v567_v31  ;;  %4484 = vmatmul.msk.bf16.gmra.mxu1 %vm749_vm4, %v739_v54  ;;  %v673_v6 = vrot.slane %v671_v53, 5  ;;  %v364_v9 = vshrl.u32 %v267_v59, 16  ;;  %v367_v10 = vshll.u32 %v267_v59, 16  ;;  %v307_v53 = vld [vmem:[%s5294_s10 + $0x8c] sm:$0x1] }
  0x45   : > { %v578_v3 = vsel %vm5306_vm3, %v573_v55, %v577_v44  ;;  %v721_v4 = vunpack.c.l.b16 %v568_v60  ;;  %v658_v5 = vor.u32 %v657_v58, %v654_v57  ;;  %v668_v8 = vor.u32 %v667_v62, %v663_v61 }
  0x46   : > { %v722_v7 = vunpack.c.l.b16 %v578_v3  ;;  %v373_v12 = vshll.u32 %v5411_v63, 16  ;;  %v377_v13 = vshrl.u32 %v5411_v63, 16  ;;  %v383_v14 = vshll.u32 %v5414_v0, 16 }
  0x47   : > { %v659_v11 = vrot.slane %v658_v5, 4  ;;  %v669_v17 = vrot.slane %v668_v8, 4  ;;  %v366_v18 = vrot.slane %v364_v9, 4  ;;  %v369_v19 = vrot.slane %v367_v10, 5  ;;  %v293_v8 = vld [vmem:[%s5294_s10 + $0xb4] sm:$0xf] }
  0x48   : > { %v743_v16 = vpack.c.b16 %v722_v7, %v721_v4  ;;  %v375_v23 = vrot.slane %v373_v12, 5  ;;  %v379_v24 = vrot.slane %v377_v13, 4  ;;  %v385_v26 = vrot.slane %v383_v14, 5  ;;  %v294_v12 = vld [vmem:[%s5294_s10 + $0xb8] sm:$0xf] }
  0x49   : > { %v664_v22 = vsel %vm5306_vm3, %v659_v11, %v663_v61  ;;  %v674_v29 = vsel %vm5306_vm3, %v669_v17, %v673_v6  ;;  %v370_v31 = vor.u32 %v369_v19, %v366_v18  ;;  %v484_v33 = vshrl.u32 %v277_v15, 16  ;;  %v311_v17 = vld [vmem:[%s5294_s10 + $0xbc] sm:$0x1] }
  0x4a   : > { %4488 = vmatmul.msk.bf16.gmra.mxu2 %vm749_vm4, %v743_v16  ;;  %v729_v30 = vunpack.c.l.b16 %v664_v22  ;;  %v730_v34 = vunpack.c.l.b16 %v674_v29  ;;  %v380_v35 = vor.u32 %v379_v24, %v375_v23  ;;  %v487_v37 = vshll.u32 %v277_v15, 16 }
  0x4b   : > { %v493_v38 = vshll.u32 %v5424_v21, 16  ;;  %v371_v40 = vrot.slane %v370_v31, 4  ;;  %v486_v41 = vrot.slane %v484_v33, 4  ;;  %v497_v42 = vshrl.u32 %v5424_v21, 16 }
  0x4c   : > { %v503_v43 = vshll.u32 %v5429_v27, 16  ;;  %v747_v44 = vpack.c.b16 %v730_v34, %v729_v30  ;;  %v381_v45 = vrot.slane %v380_v35, 4  ;;  %v489_v46 = vrot.slane %v487_v37, 5  ;;  %v269_v37 = vld [vmem:[%s5294_s10 + $0x24] sm:$0xf] }
  0x4d   : > { %v495_v48 = vrot.slane %v493_v38, 5  ;;  %v376_v50 = vsel %vm5306_vm3, %v371_v40, %v375_v23  ;;  %v499_v51 = vrot.slane %v497_v42, 4  ;;  %v580_v54 = vshrl.u32 %v285_v39, 16  ;;  %v5457_v42 = vld [vmem:[%s5294_s10 + $0x28] sm:$0xf] }
  0x4e   : > { %v505_v52 = vrot.slane %v503_v43, 5  ;;  %4492 = vmatmul.msk.bf16.gmra.mxu3 %vm749_vm4, %v747_v44  ;;  %v386_v55 = vsel %vm5306_vm3, %v381_v45, %v385_v26  ;;  %v705_v57 = vunpack.c.l.b16 %v376_v50  ;;  %v490_v58 = vor.u32 %v489_v46, %v486_v41 }
  0x4f   : > { %v583_v59 = vshll.u32 %v285_v39, 16  ;;  %v706_v60 = vunpack.c.l.b16 %v386_v55  ;;  %v500_v61 = vor.u32 %v499_v51, %v495_v48  ;;  %v582_v62 = vrot.slane %v580_v54, 4 }
  0x50   : > { %v589_v3 = vshll.u32 %v286_v49, 16  ;;  %v491_v4 = vrot.slane %v490_v58, 4  ;;  %v593_v6 = vshrl.u32 %v286_v49, 16  ;;  %v599_v7 = vshll.u32 %v307_v53, 16 }
  0x51   : > { %v585_v5 = vrot.slane %v583_v59, 5  ;;  %v735_v9 = vpack.c.b16 %v706_v60, %v705_v57  ;;  %v501_v10 = vrot.slane %v500_v61, 4  ;;  %v676_v22 = vshrl.u32 %v293_v8, 16  ;;  %v1111_v61 = vld [vmem:[%s5294_s10] sm:$0xe] }
  0x52   : > { %v591_v11 = vrot.slane %v589_v3, 5  ;;  %v496_v13 = vsel %vm5306_vm3, %v491_v4, %v495_v48  ;;  %v595_v15 = vrot.slane %v593_v6, 4  ;;  %v601_v16 = vrot.slane %v599_v7, 5  ;;  %v5461_v48 = vld [vmem:[%s5294_s10 + $0x2c] sm:$0x1] }
  0x53   : > { %v586_v14 = vor.u32 %v585_v5, %v582_v62  ;;  %4480 = vmatmul.msk.bf16.gmra.mxu0 %vm749_vm4, %v735_v9  ;;  %v506_v18 = vsel %vm5306_vm3, %v501_v10, %v505_v52  ;;  %v715_v19 = vunpack.c.l.b16 %v496_v13  ;;  %v679_v23 = vshll.u32 %v293_v8, 16  ;;  %v4720_v6 = vld [vmem:[%s5294_s10 + $0xc] sm:$0xf] }
  0x54   : > { %v716_v24 = vunpack.c.l.b16 %v506_v18  ;;  %v596_v29 = vor.u32 %v595_v15, %v591_v11  ;;  %v685_v30 = vshll.u32 %v294_v12, 16  ;;  %v678_v31 = vrot.slane %v676_v22, 4 }
  0x55   : > { %v587_v26 = vrot.slane %v586_v14, 4  ;;  %v681_v33 = vrot.slane %v679_v23, 5  ;;  %v689_v34 = vshrl.u32 %v294_v12, 16  ;;  %v695_v35 = vshll.u32 %v311_v17, 16  ;;  %v4721_v12 = vld [vmem:[%s5294_s10 + $0x10] sm:$0xf] }
  0x56   : > { %v740_v38 = vpack.c.b16 %v716_v24, %v715_v19  ;;  %v597_v40 = vrot.slane %v596_v29, 4  ;;  %v687_v41 = vrot.slane %v685_v30, 5  ;;  %v1167_v43 = vrot.slane %v5322_v2, 5 }
  0x57   : > { %v592_v39 = vsel %vm5306_vm3, %v587_v26, %v591_v11  ;;  %v682_v45 = vor.u32 %v681_v33, %v678_v31  ;;  %v691_v46 = vrot.slane %v689_v34, 4  ;;  %v697_v50 = vrot.slane %v695_v35, 5  ;;  %v4866_v11 = vld [vmem:[%s6800_s1 + $0xc] sm:$0x3] }
  0x58   : > { %v723_v44 = vunpack.c.l.b16 %v592_v39  ;;  %4485 = vmatmul.msk.bf16.gmra.mxu1 %vm749_vm4, %v740_v38  ;;  %v602_v49 = vsel %vm5306_vm3, %v597_v40, %v601_v16  ;;  %v388_v51 = vshrl.u32 %v269_v37, 16  ;;  %v391_v52 = vshll.u32 %v269_v37, 16  ;;  %v4722_v38 = vld [vmem:[%s5294_s10 + $0x14] sm:$0x1] }
  0x59   : > { %v724_v53 = vunpack.c.l.b16 %v602_v49  ;;  %v683_v54 = vrot.slane %v682_v45, 4  ;;  %v692_v55 = vor.u32 %v691_v46, %v687_v41  ;;  %v397_v2 = vshll.u32 %v5457_v42, 16  ;;  %v4995_v45 = vld [vmem:[%s6800_s1 + $0xe] sm:$0x3] }
  0x5a   : > { %v390_v57 = vrot.slane %v388_v51, 4  ;;  %v393_v58 = vrot.slane %v391_v52, 5  ;;  %v401_v59 = vshrl.u32 %v5457_v42, 16  ;;  %v407_v60 = vshll.u32 %v5461_v48, 16  ;;  %v5064_v51 = vld [vmem:[%s5294_s10] sm:$0xff] }
  0x5b   : > { %v744_v62 = vpack.c.b16 %v724_v53, %v723_v44  ;;  %v688_v3 = vsel %vm5306_vm3, %v683_v54, %v687_v41  ;;  %v693_v4 = vrot.slane %v692_v55, 4  ;;  %v399_v5 = vrot.slane %v397_v2, 5  ;;  %v5044_v2 = vld [vmem:[%s6800_s1 + $0x10] sm:$0x3] }
  0x5c   : > { %v731_v7 = vunpack.c.l.b16 %v688_v3  ;;  %v394_v8 = vor.u32 %v393_v58, %v390_v57  ;;  %v403_v9 = vrot.slane %v401_v59, 4  ;;  %v409_v10 = vrot.slane %v407_v60, 5 }
  0x5d   : > { %4489 = vmatmul.msk.bf16.gmra.mxu2 %vm749_vm4, %v744_v62  ;;  %v698_v13 = vsel %vm5306_vm3, %v693_v4, %v697_v50  ;;  %v4574_v14 = vrot.slane %v1111_v61, 9  ;;  %v1164_v19 = vrot.slane %v5319_v1, 5  ;;  %v2999_v22 = vsel %vm798_vm0, %v4866_v11, 0  ;;  %v4817_v50 = vld [vmem:[%s6800_s1 + $0xa] sm:$0x3] }
  0x5e   : > { %v732_v15 = vunpack.c.l.b16 %v698_v13  ;;  %v395_v16 = vrot.slane %v394_v8, 4  ;;  %v404_v17 = vor.u32 %v403_v9, %v399_v5  ;;  %v1832_v23 = vshrl.u32 %v4720_v6, 16  ;;  %3008 = vmatpush.bf16.msra.mxu2 %v2999_v22  ;;  %v1112_v8 = vld [vmem:[%s5294_s10 + $0xc] sm:$0xe] }
  0x5f   : > { %v1835_v24 = vshll.u32 %v4720_v6, 16  ;;  %v1841_v26 = vshll.u32 %v4721_v12, 16  ;;  %v1165_v33 = vsel %vm5480_vm7, %v4574_v14, %v1164_v19  ;;  %v1166_v35 = vrot.slane %v1164_v19, 4  ;;  %v4724_v6 = vld [vmem:[%s5294_s10 + $0x1c] sm:$0xf] }
  0x60   : > { %v748_v29 = vpack.c.b16 %v732_v15, %v731_v7  ;;  %v400_v30 = vsel %vm5306_vm3, %v395_v16, %v399_v5  ;;  %v405_v31 = vrot.slane %v404_v17, 4  ;;  %v1276_v37 = vunpack.c.l.b16 %v1165_v33  ;;  %v4723_v5 = vld [vmem:[%s5294_s10 + $0x18] sm:$0xf]  ;;  %v5080_v15 = vld [vmem:[%s5294_s10 + $0xc] sm:$0xff] }
  0x61   : > { %v707_v34 = vunpack.c.l.b16 %v400_v30  ;;  %v1834_v1 = vrot.slane %v1832_v23, 4  ;;  %v1837_v40 = vrot.slane %v1835_v24, 5  ;;  %v1843_v41 = vrot.slane %v1841_v26, 5  ;;  %v4725_v30 = vld [vmem:[%s5294_s10 + $0x20] sm:$0x1] }
  0x62   : > { %4493 = vmatmul.msk.bf16.gmra.mxu3 %vm749_vm4, %v748_v29  ;;  %v410_v39 = vsel %vm5306_vm3, %v405_v31, %v409_v10  ;;  %v1845_v44 = vshrl.u32 %v4721_v12, 16  ;;  %v1168_v49 = vsel %vm5480_vm7, %v1166_v35, %v1167_v43  ;;  %v1851_v55 = vshll.u32 %v4722_v38, 16  ;;  %v5065_v35 = vld [vmem:[%s5294_s10 + $0xc] sm:$0xff] }
  0x63   : > { %v708_v46 = vunpack.c.l.b16 %v410_v39  ;;  %v1277_v52 = vunpack.c.l.b16 %v1168_v49  ;;  %v1838_v53 = vor.u32 %v1837_v40, %v1834_v1  ;;  %v3653_v58 = vsel %vm798_vm0, %v4995_v45, 0 }
  0x64   : > { %v1847_v54 = vrot.slane %v1845_v44, 4  ;;  %3662 = vmatpush.bf16.msra.mxu3 %v3653_v58  ;;  %v2712_v60 = vsel %vm798_vm0, %v4817_v50, 0  ;;  %v4051_v61 = vsel %vm798_vm0, %v5044_v2, 0  ;;  %v1853_v4 = vrot.slane %v1851_v55, 5  ;;  %v1113_v50 = vld [vmem:[%s5294_s10 + $0x18] sm:$0xe] }
  0x65   : > { %v736_v57 = vpack.c.b16 %v708_v46, %v707_v34  ;;  %v1308_v43 = vpack.c.b16 %v1277_v52, %v1276_v37  ;;  %2721 = vmatpush.bf16.msra.mxu1 %v2712_v60  ;;  %v1839_v62 = vrot.slane %v1838_v53, 4  ;;  %4060 = vmatpush.bf16.msra.mxu0 %v4051_v61  ;;  %v1171_v7 = vrot.slane %v5365_v28, 5  ;;  %v4727_v46 = vld [vmem:[%s5294_s10 + $0x28] sm:$0xf] }
  0x66   : > { %v1848_v59 = vor.u32 %v1847_v54, %v1843_v41  ;;  %v1856_v9 = vshrl.u32 %v4723_v5, 16  ;;  %v1859_v10 = vshll.u32 %v4723_v5, 16  ;;  %v1865_v13 = vshll.u32 %v4724_v6, 16 }
  0x67   : > { %4481 = vmatmul.msk.bf16.gmra.mxu0 %vm749_vm4, %v736_v57  ;;  %v1844_v11 = vsel %vm5306_vm3, %v1839_v62, %v1843_v41  ;;  %v1869_v14 = vshrl.u32 %v4724_v6, 16  ;;  %v4575_v16 = vrot.slane %v1112_v8, 9  ;;  %v1173_v17 = vrot.slane %v1171_v7, 4  ;;  %v4726_v41 = vld [vmem:[%s5294_s10 + $0x24] sm:$0xf] }
  0x68   : > { %4558 = vmatmul.msk.bf16.vlgmr.msrb.gmra.mxu1 %vm749_vm4, %v5064_v51  ;;  %v1849_v3 = vrot.slane %v1848_v59, 4  ;;  %v1174_v28 = vrot.slane %v5368_v32, 5  ;;  %v2217_v19 = vunpack.c.l.b16 %v1844_v11  ;;  %v1858_v23 = vrot.slane %v1856_v9, 4  ;;  %v4728_v6 = vld [vmem:[%s5294_s10 + $0x2c] sm:$0x1] }
  0x69   : > { %v1861_v24 = vrot.slane %v1859_v10, 5  ;;  %v1867_v26 = vrot.slane %v1865_v13, 5  ;;  %v1871_v29 = vrot.slane %v1869_v14, 4  ;;  %v1172_v31 = vsel %vm5480_vm7, %v4575_v16, %v1171_v7 }
  0x6a   : > { %v1854_v12 = vsel %vm5306_vm3, %v1849_v3, %v1853_v4  ;;  %v1175_v33 = vsel %vm5480_vm7, %v1173_v17, %v1174_v28  ;;  %v1875_v38 = vshll.u32 %v4725_v30, 16  ;;  %v1278_v1 = vunpack.c.l.b16 %v1172_v31 }
  0x6b   : > { %v2218_v22 = vunpack.c.l.b16 %v1854_v12  ;;  %v1862_v32 = vor.u32 %v1861_v24, %v1858_v23  ;;  %v1872_v37 = vor.u32 %v1871_v29, %v1867_v26  ;;  %v1279_v39 = vunpack.c.l.b16 %v1175_v33  ;;  %v5066_v12 = vld [vmem:[%s5294_s10 + $0x18] sm:$0xff]  ;;  %v1114_v29 = vld [vmem:[%s5294_s10 + $0x24] sm:$0xe] }
  0x6c   : > { %v1877_v45 = vrot.slane %v1875_v38, 5  ;;  %v1178_v51 = vrot.slane %v5411_v63, 5  ;;  %v1880_v52 = vshrl.u32 %v4726_v41, 16  ;;  %v1883_v54 = vshll.u32 %v4726_v41, 16 }
  0x6d   : > { %4591 = vmatmul.msk.bf16.vlgmr.msrb.gmra.mxu2 %vm749_vm4, %v1308_v43  ;;  %v2249_v34 = vpack.c.b16 %v2218_v22, %v2217_v19  ;;  %v1863_v40 = vrot.slane %v1862_v32, 4  ;;  %v1873_v44 = vrot.slane %v1872_v37, 4  ;;  %v1309_v49 = vpack.c.b16 %v1279_v39, %v1278_v1  ;;  %v5081_v43 = vld [vmem:[%s5294_s10 + $0x18] sm:$0xff]  ;;  %v4729_v19 = vld [vmem:[%s5294_s10 + $0x30] sm:$0xf]  ;;  %v5082_v32 = vld [vmem:[%s5294_s10 + $0x24] sm:$0xff] }
  0x6e   : > { %v1889_v55 = vshll.u32 %v4727_v46, 16  ;;  %v1893_v2 = vshrl.u32 %v4727_v46, 16  ;;  %v4576_v58 = vrot.slane %v1113_v50, 9  ;;  %v1180_v60 = vrot.slane %v1178_v51, 4  ;;  %v4730_v22 = vld [vmem:[%s5294_s10 + $0x34] sm:$0xf] }
  0x6f   : > { %v1868_v53 = vsel %vm5306_vm3, %v1863_v40, %v1867_v26  ;;  %v1878_v57 = vsel %vm5306_vm3, %v1873_v44, %v1877_v45  ;;  %v1181_v63 = vrot.slane %v5414_v0, 5  ;;  %v1882_v61 = vrot.slane %v1880_v52, 4  ;;  %v4731_v45 = vld [vmem:[%s5294_s10 + $0x38] sm:$0x1] }
  0x70   : > { %v2219_v59 = vunpack.c.l.b16 %v1868_v53  ;;  %v2220_v62 = vunpack.c.l.b16 %v1878_v57  ;;  %v1885_v3 = vrot.slane %v1883_v54, 5  ;;  %v1891_v4 = vrot.slane %v1889_v55, 5  ;;  %v4733_v57 = vld [vmem:[%s5294_s10 + $0x40] sm:$0xf] }
  0x71   : > { %v1895_v5 = vrot.slane %v1893_v2, 4  ;;  %v1179_v7 = vsel %vm5480_vm7, %v4576_v58, %v1178_v51  ;;  %v1182_v8 = vsel %vm5480_vm7, %v1180_v60, %v1181_v63  ;;  %v1899_v0 = vshll.u32 %v4728_v6, 16  ;;  %v4732_v2 = vld [vmem:[%s5294_s10 + $0x3c] sm:$0xf]  ;;  %v5143_v63 = vld [vmem:[%s5294_s10 + $0x34] sm:$0xf] }
  0x72   : > { %4704 = vmatmul.msk.bf16.vlgmr.msrb.gmra.mxu3 %vm749_vm4, %v5080_v15  ;;  %v2250_v9 = vpack.c.b16 %v2220_v62, %v2219_v59  ;;  %v1886_v10 = vor.u32 %v1885_v3, %v1882_v61  ;;  %v1280_v13 = vunpack.c.l.b16 %v1179_v7  ;;  %v1281_v14 = vunpack.c.l.b16 %v1182_v8  ;;  %v1115_v62 = vld [vmem:[%s5294_s10 + $0x30] sm:$0xe] }
  0x73   : > { %v1896_v11 = vor.u32 %v1895_v5, %v1891_v4  ;;  %v1901_v17 = vrot.slane %v1899_v0, 5  ;;  %v1185_v23 = vrot.slane %v5457_v42, 5  ;;  %v1904_v30 = vshrl.u32 %v4729_v19, 16  ;;  %v5144_v0 = vld [vmem:[%s5294_s10 + $0x38] sm:$0x1] }
  0x74   : > { %v1887_v15 = vrot.slane %v1886_v10, 4  ;;  %v1310_v28 = vpack.c.b16 %v1281_v14, %v1280_v13  ;;  %v1907_v31 = vshll.u32 %v4729_v19, 16  ;;  %v1913_v33 = vshll.u32 %v4730_v22, 16  ;;  %v5083_v13 = vld [vmem:[%s5294_s10 + $0x30] sm:$0xff] }
  0x75   : > { %v1897_v16 = vrot.slane %v1896_v11, 4  ;;  %v1187_v37 = vrot.slane %v1185_v23, 4  ;;  %v1188_v42 = vrot.slane %v5461_v48, 5  ;;  %v1906_v39 = vrot.slane %v1904_v30, 4  ;;  %v5067_v48 = vld [vmem:[%s5294_s10 + $0x24] sm:$0xff] }
  0x76   : > { %v1892_v24 = vsel %vm5306_vm3, %v1887_v15, %v1891_v4  ;;  %v1909_v40 = vrot.slane %v1907_v31, 5  ;;  %v1915_v41 = vrot.slane %v1913_v33, 5  ;;  %v1923_v53 = vshll.u32 %v4731_v45, 16  ;;  %v5068_v33 = vld [vmem:[%s5294_s10 + $0x30] sm:$0xff] }
  0x77   : > { %4769 = vmatmul.msk.bf16.vlgmr.msrb.gmra.mxu0 %vm749_vm4, %v2249_v34  ;;  %v1902_v26 = vsel %vm5306_vm3, %v1897_v16, %v1901_v17  ;;  %v1917_v34 = vshrl.u32 %v4730_v22, 16  ;;  %v2221_v38 = vunpack.c.l.b16 %v1892_v24  ;;  %v1192_v61 = vrot.slane %v5143_v63, 5  ;;  %v4734_v22 = vld [vmem:[%s5294_s10 + $0x44] sm:$0x1] }
  0x78   : > { %4559 = vmatmul.msk.bf16.gmra.mxu1 %vm749_vm4, %v5065_v35  ;;  %v4577_v35 = vrot.slane %v1114_v29, 9  ;;  %v2222_v1 = vunpack.c.l.b16 %v1902_v26  ;;  %v1910_v51 = vor.u32 %v1909_v40, %v1906_v39  ;;  %v1925_v59 = vrot.slane %v1923_v53, 5  ;;  %v4735_v39 = vld [vmem:[%s5294_s10 + $0x48] sm:$0xf]  ;;  %v4736_v40 = vld [vmem:[%s5294_s10 + $0x4c] sm:$0xf] }
  0x79   : > { %v1919_v44 = vrot.slane %v1917_v34, 4  ;;  %v1928_v3 = vshrl.u32 %v4732_v2, 16  ;;  %v1931_v4 = vshll.u32 %v4732_v2, 16  ;;  %v1937_v5 = vshll.u32 %v4733_v57, 16  ;;  %v5084_v2 = vld [vmem:[%s5294_s10 + $0x3c] sm:$0xff] }
  0x7a   : > { %v1186_v46 = vsel %vm5480_vm7, %v4577_v35, %v1185_v23  ;;  %v2251_v50 = vpack.c.b16 %v2222_v1, %v2221_v38  ;;  %v1911_v58 = vrot.slane %v1910_v51, 4  ;;  %v1941_v6 = vshrl.u32 %v4733_v57, 16 }
  0x7b   : > { %v1920_v52 = vor.u32 %v1919_v44, %v1915_v41  ;;  %v1282_v54 = vunpack.c.l.b16 %v1186_v46  ;;  %v4578_v10 = vrot.slane %v1115_v62, 9  ;;  %v1194_v11 = vrot.slane %v1192_v61, 4 }
  0x7c   : > { %v1916_v8 = vsel %vm5306_vm3, %v1911_v58, %v1915_v41  ;;  %v1930_v14 = vrot.slane %v1928_v3, 4  ;;  %v1933_v15 = vrot.slane %v1931_v4, 5  ;;  %v1939_v16 = vrot.slane %v1937_v5, 5  ;;  %v4737_v4 = vld [vmem:[%s5294_s10 + $0x50] sm:$0x1] }
  0x7d   : > { %4592 = vmatmul.msk.bf16.gmra.mxu2 %vm749_vm4, %v1309_v49  ;;  %v1189_v49 = vsel %vm5480_vm7, %v1187_v37, %v1188_v42  ;;  %v1943_v17 = vrot.slane %v1941_v6, 4  ;;  %v1193_v23 = vsel %vm5480_vm7, %v4578_v10, %v1192_v61  ;;  %v1947_v30 = vshll.u32 %v4734_v22, 16 }
  0x7e   : > { %v1283_v55 = vunpack.c.l.b16 %v1189_v49  ;;  %v1934_v26 = vor.u32 %v1933_v15, %v1930_v14  ;;  %v1952_v51 = vshrl.u32 %v4735_v39, 16  ;;  %v1961_v53 = vshll.u32 %v4736_v40, 16 }
  0x7f   : > { %v1944_v29 = vor.u32 %v1943_v17, %v1939_v16  ;;  %v1949_v1 = vrot.slane %v1947_v30, 5 }
  0x80   : > { %v1311_v60 = vpack.c.b16 %v1283_v55, %v1282_v54  ;;  %v1935_v42 = vrot.slane %v1934_v26, 4  ;;  %v1965_v54 = vshrl.u32 %v4736_v40, 16  ;;  %v1963_v62 = vrot.slane %v1961_v53, 5 }
  0x81   : > { %v1945_v38 = vrot.slane %v1944_v29, 4  ;;  %v1206_v26 = vrot.slane %v5378_v47, 5 }
  0x82   : > { %4705 = vmatmul.msk.bf16.gmra.mxu3 %vm749_vm4, %v5081_v43  ;;  %v1921_v43 = vrot.slane %v1920_v52, 4  ;;  %v1940_v45 = vsel %vm5306_vm3, %v1935_v42, %v1939_v16  ;;  %v1955_v52 = vshll.u32 %v4735_v39, 16  ;;  %v1967_v3 = vrot.slane %v1965_v54, 4  ;;  %v4740_v54 = vld [vmem:[%s5294_s10 + $0x5c] sm:$0x1] }
  0x83   : > { %v1950_v46 = vsel %vm5306_vm3, %v1945_v38, %v1949_v1  ;;  %v2225_v55 = vunpack.c.l.b16 %v1940_v45  ;;  %v5085_v1 = vld [vmem:[%s5294_s10 + $0x48] sm:$0xff]  ;;  %v1208_v40 = vrot.slane %v1206_v26, 4 }
  0x84   : > { %v2226_v57 = vunpack.c.l.b16 %v1950_v46  ;;  %v1957_v61 = vrot.slane %v1955_v52, 5  ;;  %v1968_v10 = vor.u32 %v1967_v3, %v1963_v62 }
  0x86   : > { %v1969_v16 = vrot.slane %v1968_v10, 4 }
  0x87   : > { %4770 = vmatmul.msk.bf16.gmra.mxu0 %vm749_vm4, %v2250_v9  ;;  %v1926_v9 = vsel %vm5306_vm3, %v1921_v43, %v1925_v59 }
  0x88   : > { %4560 = vmatmul.msk.bf16.gmra.mxu1 %vm749_vm4, %v5066_v12  ;;  %v1195_v12 = vrot.slane %v5144_v0, 5  ;;  %v2224_v19 = vunpack.c.l.b16 %v1926_v9 }
  0x8a   : > { %v1196_v24 = vsel %vm5480_vm7, %v1194_v11, %v1195_v12  ;;  %v1971_v11 = vshll.u32 %v4737_v4, 16  ;;  %v5069_v12 = vld [vmem:[%s5294_s10 + $0x3c] sm:$0xff] }
  0x8b   : > { %v1285_v35 = vunpack.c.l.b16 %v1196_v24  ;;  %v4739_v24 = vld [vmem:[%s5294_s10 + $0x58] sm:$0xf]  ;;  %v4741_v4 = vld [vmem:[%s5294_s10 + $0x60] sm:$0xf] }
  0x8c   : > { %v1973_v17 = vrot.slane %v1971_v11, 5  ;;  %v1989_v42 = vshrl.u32 %v4739_v24, 16 }
  0x8d   : > { %4593 = vmatmul.msk.bf16.gmra.mxu2 %vm749_vm4, %v1310_v28  ;;  %v2223_v28 = vunpack.c.l.b16 %v1916_v8  ;;  %v2253_v8 = vpack.c.b16 %v2226_v57, %v2225_v55 }
  0x8e   : > { %v1974_v30 = vsel %vm5306_vm3, %v1969_v16, %v1973_v17  ;;  %v1991_v52 = vrot.slane %v1989_v42, 4 }
  0x8f   : > { %v2252_v31 = vpack.c.b16 %v2224_v19, %v2223_v28  ;;  %v2228_v46 = vunpack.c.l.b16 %v1974_v30 }
  0x92   : > { %4706 = vmatmul.msk.bf16.gmra.mxu3 %vm749_vm4, %v5082_v32  ;;  %v1284_v32 = vunpack.c.l.b16 %v1193_v23  ;;  %v4738_v23 = vld [vmem:[%s5294_s10 + $0x54] sm:$0xf] }
  0x94   : > { %v1312_v44 = vpack.c.b16 %v1285_v35, %v1284_v32  ;;  %v1979_v32 = vshll.u32 %v4738_v23, 16  ;;  %v1985_v35 = vshll.u32 %v4739_v24, 16 }
  0x97   : > { %4771 = vmatmul.msk.bf16.gmra.mxu0 %vm749_vm4, %v2251_v50  ;;  %v1199_v50 = vrot.slane %v5334_v20, 5  ;;  %v1954_v20 = vrot.slane %v1952_v51, 4  ;;  %v1987_v51 = vrot.slane %v1985_v35, 5  ;;  %v1216_v35 = vrot.slane %v5429_v27, 5 }
  0x98   : > { %4561 = vmatmul.msk.bf16.gmra.mxu1 %vm749_vm4, %v5067_v48  ;;  %v1116_v48 = vld [vmem:[%s5294_s10 + $0x3c] sm:$0xe] }
  0x99   : > { %v4579_v43 = vrot.slane %v1116_v48, 9  ;;  %v1201_v59 = vrot.slane %v1199_v50, 4  ;;  %v1981_v48 = vrot.slane %v1979_v32, 5 }
  0x9b   : > { %v1200_v5 = vsel %vm5480_vm7, %v4579_v43, %v1199_v50  ;;  %v5070_v43 = vld [vmem:[%s5294_s10 + $0x48] sm:$0xff] }
  0x9d   : > { %v5575_v7 = vpop.f32.mrf.mxu1  ;;  %4594 = vmatmul.msk.bf16.gmra.mxu2 %vm749_vm4, %v1311_v60  ;;  %v1202_v60 = vrot.slane %v5339_v25, 5  ;;  %v1958_v25 = vor.u32 %v1957_v61, %v1954_v20  ;;  %v1995_v20 = vshll.u32 %v4740_v54, 16  ;;  %v5071_v54 = vld [vmem:[%s5294_s10 + $0x54] sm:$0xff] }
  0x9f   : > { %v1203_v6 = vsel %vm5480_vm7, %v1201_v59, %v1202_v60  ;;  %v1959_v15 = vrot.slane %v1958_v25, 4  ;;  %v1992_v60 = vor.u32 %v1991_v52, %v1987_v51  ;;  %v1997_v10 = vrot.slane %v1995_v20, 5 }
  0xa0   : > { %v1287_v14 = vunpack.c.l.b16 %v1203_v6 }
  0xa1   : > { %v1964_v29 = vsel %vm5306_vm3, %v1959_v15, %v1963_v62  ;;  %v1993_v25 = vrot.slane %v1992_v60, 4  ;;  %v1213_v15 = vrot.slane %v5424_v21, 5 }
  0xa2   : > { %4707 = vmatmul.msk.bf16.gmra.mxu3 %vm749_vm4, %v5083_v13  ;;  %v1286_v13 = vunpack.c.l.b16 %v1200_v5  ;;  %v2227_v45 = vunpack.c.l.b16 %v1964_v29  ;;  %v4742_v5 = vld [vmem:[%s5294_s10 + $0x64] sm:$0xf] }
  0xa3   : > { %v2013_v16 = vshrl.u32 %v4742_v5, 16  ;;  %v1998_v24 = vsel %vm5306_vm3, %v1993_v25, %v1997_v10  ;;  %v1215_v32 = vrot.slane %v1213_v15, 4  ;;  %v5145_v10 = vld [vmem:[%s5294_s10 + $0x64] sm:$0xf] }
  0xa4   : > { %v1313_v19 = vpack.c.b16 %v1287_v14, %v1286_v13  ;;  %v2254_v57 = vpack.c.b16 %v2228_v46, %v2227_v45  ;;  %v2003_v13 = vshll.u32 %v4741_v4, 16  ;;  %v2009_v14 = vshll.u32 %v4742_v5, 16 }
  0xa5   : > { %v5591_v34 = vpop.f32.mrf.mxu1  ;;  %v2015_v42 = vrot.slane %v2013_v16, 4 }
  0xa6   : > { %v2005_v30 = vrot.slane %v2003_v13, 5  ;;  %v1119_v13 = vld [vmem:[%s5294_s10 + $0x60] sm:$0xe] }
  0xa7   : > { %v5593_v37 = vpop.f32.mrf.mxu2  ;;  %4772 = vmatmul.msk.bf16.gmra.mxu0 %vm749_vm4, %v2252_v31  ;;  %v1117_v31 = vld [vmem:[%s5294_s10 + $0x48] sm:$0xe] }
  0xa8   : > { %4562 = vmatmul.msk.bf16.gmra.mxu1 %vm749_vm4, %v5068_v33  ;;  %v1976_v33 = vshrl.u32 %v4738_v23, 16  ;;  %v4580_v47 = vrot.slane %v1117_v31, 9  ;;  %v2011_v31 = vrot.slane %v2009_v14, 5 }
  0xaa   : > { %v5599_v41 = vpop.f32.mrf.mxu0  ;;  %v1978_v50 = vrot.slane %v1976_v33, 4  ;;  %v5086_v33 = vld [vmem:[%s5294_s10 + $0x54] sm:$0xff]  ;;  %v2016_v27 = vor.u32 %v2015_v42, %v2011_v31 }
  0xab   : > { %v5605_v49 = vpop.f32.mrf.mxu3 }
  0xac   : > { %v1982_v59 = vor.u32 %v1981_v48, %v1978_v50  ;;  %v1217_v48 = vsel %vm5480_vm7, %v1215_v32, %v1216_v35  ;;  %v2017_v60 = vrot.slane %v2016_v27, 4 }
  0xad   : > { %4595 = vmatmul.msk.bf16.gmra.mxu2 %vm749_vm4, %v1312_v44  ;;  %v1209_v44 = vrot.slane %v5383_v56, 5 }
  0xaf   : > { %v5611_v58 = vpop.f32.mrf.mxu1  ;;  %v5614_v63 = vpop.f32.mrf.mxu2  ;;  %v1210_v56 = vsel %vm5480_vm7, %v1208_v40, %v1209_v44  ;;  %v4743_v40 = vld [vmem:[%s5294_s10 + $0x68] sm:$0x1] }
  0xb0   : > { %v1289_v62 = vunpack.c.l.b16 %v1210_v56 }
  0xb2   : > { %4708 = vmatmul.msk.bf16.gmra.mxu3 %vm749_vm4, %v5084_v2  ;;  %v5622_v9 = vpop.f32.mrf.mxu0  ;;  %v1207_v2 = vsel %vm5480_vm7, %v4580_v47, %v1206_v26  ;;  %v2230_v47 = vunpack.c.l.b16 %v1998_v24 }
  0xb3   : > { %v5624_v0 = vpop.f32.mrf.mxu3  ;;  %v1288_v61 = vunpack.c.l.b16 %v1207_v2 }
  0xb5   : > { %v1314_v11 = vpack.c.b16 %v1289_v62, %v1288_v61  ;;  %v4744_v61 = vld [vmem:[%s5294_s10 + $0x6c] sm:$0xf]  ;;  %v4745_v62 = vld [vmem:[%s5294_s10 + $0x70] sm:$0xf] }
  0xb6   : > { %v2024_v14 = vshrl.u32 %v4744_v61, 16  ;;  %v2033_v16 = vshll.u32 %v4745_v62, 16 }
  0xb7   : > { %4773 = vmatmul.msk.bf16.gmra.mxu0 %vm749_vm4, %v2253_v8  ;;  %v5628_v28 = vpop.f32.mrf.mxu1  ;;  %v1983_v8 = vrot.slane %v1982_v59, 4 }
  0xb8   : > { %4563 = vmatmul.msk.bf16.gmra.mxu1 %vm749_vm4, %v5069_v12  ;;  %v2000_v12 = vshrl.u32 %v4741_v4, 16  ;;  %v2026_v35 = vrot.slane %v2024_v14, 4  ;;  %v4748_v14 = vld [vmem:[%s5294_s10 + $0x7c] sm:$0xf] }
  0xb9   : > { %v1988_v23 = vsel %vm5306_vm3, %v1983_v8, %v1987_v51  ;;  %v2019_v51 = vshll.u32 %v4743_v40, 16 }
  0xba   : > { %v5631_v22 = vpop.f32.mrf.mxu2  ;;  %v2002_v29 = vrot.slane %v2000_v12, 4 }
  0xbb   : > { %v2021_v20 = vrot.slane %v2019_v51, 5 }
  0xbc   : > { %v2006_v46 = vor.u32 %v2005_v30, %v2002_v29  ;;  %v5087_v30 = vld [vmem:[%s5294_s10 + $0x60] sm:$0xff] }
  0xbd   : > { %4596 = vmatmul.msk.bf16.gmra.mxu2 %vm749_vm4, %v1313_v19  ;;  %v1118_v19 = vld [vmem:[%s5294_s10 + $0x54] sm:$0xe]  ;;  %v2022_v25 = vsel %vm5306_vm3, %v2017_v60, %v2021_v20 }
  0xbe   : > { %v5641_v38 = vpop.f32.mrf.mxu0  ;;  %v4581_v21 = vrot.slane %v1118_v19, 9  ;;  %v2007_v59 = vrot.slane %v2006_v46, 4  ;;  %v2037_v19 = vshrl.u32 %v4745_v62, 16  ;;  %v4746_v46 = vld [vmem:[%s5294_s10 + $0x74] sm:$0x1] }
  0xbf   : > { %v5645_v39 = vpop.f32.mrf.mxu3 }
  0xc0   : > { %v1214_v50 = vsel %vm5480_vm7, %v4581_v21, %v1213_v15  ;;  %v2012_v8 = vsel %vm5306_vm3, %v2007_v59, %v2011_v31  ;;  %v2027_v15 = vshll.u32 %v4744_v61, 16  ;;  %v4582_v21 = vrot.slane %v1119_v13, 9  ;;  %v4747_v13 = vld [vmem:[%s5294_s10 + $0x78] sm:$0xf] }
  0xc1   : > { %v5648_v53 = vpop.f32.mrf.mxu1  ;;  %v1290_v56 = vunpack.c.l.b16 %v1214_v50  ;;  %v2231_v31 = vunpack.c.l.b16 %v2012_v8 }
  0xc2   : > { %4709 = vmatmul.msk.bf16.gmra.mxu3 %vm749_vm4, %v5085_v1  ;;  %v5652_v55 = vpop.f32.mrf.mxu2  ;;  %v2229_v1 = vunpack.c.l.b16 %v1988_v23  ;;  %v5146_v23 = vld [vmem:[%s5294_s10 + $0x68] sm:$0x1]  ;;  %v2029_v42 = vrot.slane %v2027_v15, 5  ;;  %v5147_v15 = vld [vmem:[%s5294_s10 + $0x70] sm:$0xf] }
  0xc3   : > { %v1223_v24 = vrot.slane %v5146_v23, 5  ;;  %v1120_v23 = vld [vmem:[%s5294_s10 + $0x6c] sm:$0xe] }
  0xc4   : > { %v2255_v52 = vpack.c.b16 %v2230_v47, %v2229_v1  ;;  %v2035_v1 = vrot.slane %v2033_v16, 5  ;;  %v2039_v47 = vrot.slane %v2037_v19, 4  ;;  %v2030_v51 = vor.u32 %v2029_v42, %v2026_v35  ;;  %v5148_v42 = vld [vmem:[%s5294_s10 + $0x74] sm:$0x1] }
  0xc5   : > { %v1227_v16 = vrot.slane %v5147_v15, 5 }
  0xc6   : > { %v5659_v3 = vpop.f32.mrf.mxu0 }
  0xc7   : > { %4774 = vmatmul.msk.bf16.gmra.mxu0 %vm749_vm4, %v2254_v57  ;;  %v5664_v6 = vpop.f32.mrf.mxu3  ;;  %v1291_v57 = vunpack.c.l.b16 %v1217_v48 }
  0xc8   : > { %4564 = vmatmul.msk.bf16.gmra.mxu1 %vm749_vm4, %v5070_v43 }
  0xc9   : > { %v5668_v17 = vpop.f32.mrf.mxu1  ;;  %v1315_v4 = vpack.c.b16 %v1291_v57, %v1290_v56  ;;  %v5072_v57 = vld [vmem:[%s5294_s10 + $0x60] sm:$0xff] }
  0xcd   : > { %v5675_v26 = vpop.f32.mrf.mxu2  ;;  %4597 = vmatmul.msk.bf16.gmra.mxu2 %vm749_vm4, %v1314_v11  ;;  %v1220_v11 = vrot.slane %v5145_v10, 5 }
  0xcf   : > { %v1222_v32 = vrot.slane %v1220_v11, 4  ;;  %v1221_v50 = vsel %vm5480_vm7, %v4582_v21, %v1220_v11  ;;  %v2061_v21 = vshrl.u32 %v4748_v14, 16 }
  0xd0   : > { %v5681_v44 = vpop.f32.mrf.mxu0  ;;  %v1292_v20 = vunpack.c.l.b16 %v1221_v50  ;;  %v4583_v50 = vrot.slane %v1120_v23, 9 }
  0xd1   : > { %v5683_v45 = vpop.f32.mrf.mxu3  ;;  %v1224_v48 = vsel %vm5480_vm7, %v1222_v32, %v1223_v24 }
  0xd2   : > { %4710 = vmatmul.msk.bf16.gmra.mxu3 %vm749_vm4, %v5086_v33  ;;  %v2232_v33 = vunpack.c.l.b16 %v2022_v25  ;;  %v1293_v61 = vunpack.c.l.b16 %v1224_v48  ;;  %v1229_v48 = vrot.slane %v1227_v16, 4 }
  0xd4   : > { %v2256_v27 = vpack.c.b16 %v2232_v33, %v2231_v31  ;;  %v1316_v11 = vpack.c.b16 %v1293_v61, %v1292_v20  ;;  %v2051_v31 = vshll.u32 %v4747_v13, 16  ;;  %v2057_v33 = vshll.u32 %v4748_v14, 16 }
  0xd5   : > { %v5691_v2 = vpop.f32.mrf.mxu1  ;;  %v5693_v43 = vpop.f32.mrf.mxu2  ;;  %v2063_v20 = vrot.slane %v2061_v21, 4 }
  0xd7   : > { %4775 = vmatmul.msk.bf16.gmra.mxu0 %vm749_vm4, %v2255_v52  ;;  %v2040_v52 = vor.u32 %v2039_v47, %v2035_v1  ;;  %v1230_v47 = vrot.slane %v5148_v42, 5 }
  0xd8   : > { %4565 = vmatmul.msk.bf16.gmra.mxu1 %vm749_vm4, %v5071_v54  ;;  %v5699_v5 = vpop.f32.mrf.mxu0  ;;  %v2043_v54 = vshll.u32 %v4746_v46, 16  ;;  %v5088_v46 = vld [vmem:[%s5294_s10 + $0x6c] sm:$0xff] }
  0xd9   : > { %v5706_v12 = vpop.f32.mrf.mxu3  ;;  %v2041_v8 = vrot.slane %v2040_v52, 4 }
  0xda   : > { %v2045_v25 = vrot.slane %v2043_v54, 5 }
  0xdd   : > { %4598 = vmatmul.msk.bf16.gmra.mxu2 %vm749_vm4, %v1315_v4  ;;  %v5711_v29 = vpop.f32.mrf.mxu1  ;;  %v2031_v4 = vrot.slane %v2030_v51, 4 }
  0xdf   : > { %v2036_v19 = vsel %vm5306_vm3, %v2031_v4, %v2035_v1  ;;  %v4749_v4 = vld [vmem:[%s5294_s10 + $0x80] sm:$0x1] }
  0xe0   : > { %v5714_v40 = vpop.f32.mrf.mxu2 }
  0xe2   : > { %4711 = vmatmul.msk.bf16.gmra.mxu3 %vm749_vm4, %v5087_v30  ;;  %v2048_v30 = vshrl.u32 %v4747_v13, 16  ;;  %v5073_v13 = vld [vmem:[%s5294_s10 + $0x6c] sm:$0xff] }
  0xe4   : > { %v5722_v56 = vpop.f32.mrf.mxu0  ;;  %v2050_v54 = vrot.slane %v2048_v30, 4 }
  0xe5   : > { %v5725_v59 = vpop.f32.mrf.mxu3  ;;  %v1031_v60 = vpop.f32.mrf.mxu1 }
  0xe6   : > { %v1032_v62 = vadd.f32 %v1031_v60, %v5599_v41  ;;  %v2046_v41 = vsel %vm5306_vm3, %v2041_v8, %v2045_v25  ;;  %v2059_v60 = vrot.slane %v2057_v33, 5  ;;  %v1228_v8 = vsel %vm5480_vm7, %v4583_v50, %v1227_v16 }
  0xe7   : > { %4776 = vmatmul.msk.bf16.gmra.mxu0 %vm749_vm4, %v2256_v27  ;;  %v2233_v27 = vunpack.c.l.b16 %v2036_v19  ;;  %v2234_v51 = vunpack.c.l.b16 %v2046_v41  ;;  %v2067_v19 = vshll.u32 %v4749_v4, 16 }
  0xe8   : > { %v5729_v10 = vpop.f32.mrf.mxu2  ;;  %4566 = vmatmul.msk.bf16.gmra.mxu1 %vm749_vm4, %v5072_v57  ;;  %v2053_v57 = vrot.slane %v2051_v31, 5  ;;  %v2064_v15 = vor.u32 %v2063_v20, %v2059_v60 }
  0xe9   : > { %v2257_v25 = vpack.c.b16 %v2234_v51, %v2233_v27  ;;  %v2069_v42 = vrot.slane %v2067_v19, 5  ;;  %v4751_v27 = vld [vmem:[%s5294_s10 + $0x88] sm:$0xf]  ;;  %v5149_v51 = vld [vmem:[%s5294_s10 + $0x7c] sm:$0xf] }
  0xea   : > { %v2054_v14 = vor.u32 %v2053_v57, %v2050_v54  ;;  %v1121_v54 = vld [vmem:[%s5294_s10 + $0x78] sm:$0xe] }
  0xec   : > { %v5740_v24 = vpop.f32.mrf.mxu0  ;;  %v2055_v21 = vrot.slane %v2054_v14, 4 }
  0xed   : > { %v5742_v32 = vpop.f32.mrf.mxu3  ;;  %4599 = vmatmul.msk.bf16.gmra.mxu2 %vm749_vm4, %v1316_v11  ;;  %v1033_v35 = vpop.f32.mrf.mxu1 }
  0xee   : > { %v1034_v1 = vadd.f32 %v1033_v35, %v5622_v9  ;;  %v1231_v9 = vsel %vm5480_vm7, %v1229_v48, %v1230_v47  ;;  %v2065_v35 = vrot.slane %v2064_v15, 4  ;;  %v4750_v47 = vld [vmem:[%s5294_s10 + $0x84] sm:$0xf]  ;;  %v5089_v15 = vld [vmem:[%s5294_s10 + $0x78] sm:$0xff] }
  0xef   : > { %v1295_v30 = vunpack.c.l.b16 %v1231_v9  ;;  %v2075_v57 = vshll.u32 %v4750_v47, 16  ;;  %v2085_v9 = vshrl.u32 %v4751_v27, 16 }
  0xf0   : > { %v1384_v52 = vpop.f32.mrf.mxu2  ;;  %v2070_v4 = vsel %vm5306_vm3, %v2065_v35, %v2069_v42 }
  0xf1   : > { %v1464_v61 = vadd.f32 %v1384_v52, %v1032_v62  ;;  %v1294_v62 = vunpack.c.l.b16 %v1228_v8  ;;  %v1234_v52 = vrot.slane %v5149_v51, 5  ;;  %v2081_v8 = vshll.u32 %v4751_v27, 16 }
  0xf2   : > { %4712 = vmatmul.msk.bf16.gmra.mxu3 %vm749_vm4, %v5088_v46  ;;  %v2087_v35 = vrot.slane %v2085_v9, 4 }
  0xf3   : > { %v1317_v48 = vpack.c.b16 %v1295_v30, %v1294_v62 }
  0xf4   : > { %v2325_v11 = vpop.f32.mrf.mxu0 }
  0xf5   : > { %v1671_v41 = vpop.f32.mrf.mxu3  ;;  %v1036_v23 = vpop.f32.mrf.mxu1 }
  0xf6   : > { %v1751_v31 = vadd.f32 %v1671_v41, %v1464_v61  ;;  %v1037_v16 = vadd.f32 %v1036_v23, %v5641_v38  ;;  %v2072_v38 = vshrl.u32 %v4750_v47, 16  ;;  %v2060_v61 = vsel %vm5306_vm3, %v2055_v21, %v2059_v60 }
  0xf7   : > { %4777 = vmatmul.msk.bf16.gmra.mxu0 %vm749_vm4, %v2257_v25  ;;  %v5150_v25 = vld [vmem:[%s5294_s10 + $0x80] sm:$0x1]  ;;  %v4584_v41 = vrot.slane %v1121_v54, 9  ;;  %v1236_v23 = vrot.slane %v1234_v52, 4  ;;  %v2235_v62 = vunpack.c.l.b16 %v2060_v61  ;;  %v2236_v60 = vunpack.c.l.b16 %v2070_v4 }
  0xf8   : > { %v1386_v33 = vpop.f32.mrf.mxu2  ;;  %4567 = vmatmul.msk.bf16.gmra.mxu1 %vm749_vm4, %v5073_v13  ;;  %v5759_v46 = vadd.f32 %v2325_v11, %v1751_v31  ;;  %v1237_v11 = vrot.slane %v5150_v25, 5  ;;  %v2074_v30 = vrot.slane %v2072_v38, 4  ;;  %v2077_v31 = vrot.slane %v2075_v57, 5  ;;  %v5074_v38 = vld [vmem:[%s5294_s10 + $0x78] sm:$0xff] }
  0xf9   : > { %v1465_v50 = vadd.f32 %v1386_v33, %v1034_v1  ;;  %v2083_v21 = vrot.slane %v2081_v8, 5  ;;  %v2258_v27 = vpack.c.b16 %v2236_v60, %v2235_v62  ;;  %v4754_v62 = vld [vmem:[%s5294_s10 + $0x94] sm:$0xf]  ;;  %v5151_v60 = vld [vmem:[%s5294_s10 + $0x88] sm:$0xf] }
  0xfa   : > { %v2078_v51 = vor.u32 %v2077_v31, %v2074_v30  ;;  %v1241_v30 = vrot.slane %v5151_v60, 5  ;;  %v1122_v31 = vld [vmem:[%s5294_s10 + $0x84] sm:$0xe] }
  0xfb   : > { %v2088_v57 = vor.u32 %v2087_v35, %v2083_v21 }
  0xfc   : > { %v2327_v20 = vpop.f32.mrf.mxu0  ;;  %v2079_v25 = vrot.slane %v2078_v51, 4 }
  0xfd   : > { %v1673_v1 = vpop.f32.mrf.mxu3  ;;  %4600 = vmatmul.msk.bf16.gmra.mxu2 %vm749_vm4, %v1317_v48  ;;  %v1038_v13 = vpop.f32.mrf.mxu1  ;;  %v4752_v48 = vld [vmem:[%s5294_s10 + $0x8c] sm:$0x1] }
  0xfe   : > { %v1752_v14 = vadd.f32 %v1673_v1, %v1465_v50  ;;  %v1039_v19 = vadd.f32 %v1038_v13, %v5659_v3  ;;  %v1235_v50 = vsel %vm5480_vm7, %v4584_v41, %v1234_v52  ;;  %v1238_v3 = vsel %vm5480_vm7, %v1236_v23, %v1237_v11 }
  0xff   : > { %v2091_v61 = vshll.u32 %v4752_v48, 16  ;;  %v1297_v8 = vunpack.c.l.b16 %v1238_v3  ;;  %v2089_v1 = vrot.slane %v2088_v57, 4  ;;  %v2109_v3 = vshrl.u32 %v4754_v62, 16  ;;  %v5090_v57 = vld [vmem:[%s5294_s10 + $0x84] sm:$0xff] }
 0x100   : > { %v1389_v33 = vpop.f32.mrf.mxu2  ;;  %v5772_v42 = vadd.f32 %v2327_v20, %v1752_v14  ;;  %v4753_v14 = vld [vmem:[%s5294_s10 + $0x90] sm:$0xf] }
 0x101   : > { %v1466_v47 = vadd.f32 %v1389_v33, %v1037_v16  ;;  %v1296_v16 = vunpack.c.l.b16 %v1235_v50  ;;  %v2093_v13 = vrot.slane %v2091_v61, 5  ;;  %v2096_v33 = vshrl.u32 %v4753_v14, 16 }
 0x102   : > { %4713 = vmatmul.msk.bf16.gmra.mxu3 %vm749_vm4, %v5089_v15  ;;  %v2099_v48 = vshll.u32 %v4753_v14, 16  ;;  %v2105_v50 = vshll.u32 %v4754_v62, 16  ;;  %v4585_v61 = vrot.slane %v1122_v31, 9 }
 0x103   : > { %v1318_v23 = vpack.c.b16 %v1297_v8, %v1296_v16  ;;  %v2098_v8 = vrot.slane %v2096_v33, 4 }
 0x104   : > { %v2330_v54 = vpop.f32.mrf.mxu0 }
 0x105   : > { %v1676_v4 = vpop.f32.mrf.mxu3  ;;  %v1041_v20 = vpop.f32.mrf.mxu1 }
 0x106   : > { %v1753_v9 = vadd.f32 %v1676_v4, %v1466_v47  ;;  %v1042_v52 = vadd.f32 %v1041_v20, %v5681_v44  ;;  %v2084_v44 = vsel %vm5306_vm3, %v2079_v25, %v2083_v21  ;;  %v2094_v47 = vsel %vm5306_vm3, %v2089_v1, %v2093_v13 }
 0x107   : > { %4778 = vmatmul.msk.bf16.gmra.mxu0 %vm749_vm4, %v2258_v27  ;;  %v5152_v27 = vld [vmem:[%s5294_s10 + $0x8c] sm:$0x1]  ;;  %v1243_v4 = vrot.slane %v1241_v30, 4  ;;  %v2237_v20 = vunpack.c.l.b16 %v2084_v44  ;;  %v2238_v16 = vunpack.c.l.b16 %v2094_v47  ;;  %v2101_v25 = vrot.slane %v2099_v48, 5  ;;  %v5075_v44 = vld [vmem:[%s5294_s10 + $0x84] sm:$0xff] }
 0x108   : > { %v1391_v11 = vpop.f32.mrf.mxu2  ;;  %4568 = vmatmul.msk.bf16.gmra.mxu1 %vm749_vm4, %v5074_v38  ;;  %v5785_v15 = vadd.f32 %v2330_v54, %v1753_v9  ;;  %v1244_v51 = vrot.slane %v5152_v27, 5  ;;  %v2111_v1 = vrot.slane %v2109_v3, 4 }
 0x109   : > { %v1467_v41 = vadd.f32 %v1391_v11, %v1039_v19  ;;  %v2107_v11 = vrot.slane %v2105_v50, 5  ;;  %v2259_v62 = vpack.c.b16 %v2238_v16, %v2237_v20  ;;  %v2102_v31 = vor.u32 %v2101_v25, %v2098_v8  ;;  %v4757_v20 = vld [vmem:[%s5294_s10 + $0xa0] sm:$0xf]  ;;  %v1123_v25 = vld [vmem:[%s5294_s10 + $0x90] sm:$0xe] }
 0x10b   : > { %v2112_v33 = vor.u32 %v2111_v1, %v2107_v11 }
 0x10c   : > { %v2332_v35 = vpop.f32.mrf.mxu0 }
 0x10d   : > { %v1678_v19 = vpop.f32.mrf.mxu3  ;;  %4601 = vmatmul.msk.bf16.gmra.mxu2 %vm749_vm4, %v1318_v23  ;;  %v1043_v54 = vpop.f32.mrf.mxu1  ;;  %v4755_v23 = vld [vmem:[%s5294_s10 + $0x98] sm:$0x1] }
 0x10e   : > { %v1754_v38 = vadd.f32 %v1678_v19, %v1467_v41  ;;  %v1044_v21 = vadd.f32 %v1043_v54, %v5699_v5  ;;  %v1242_v5 = vsel %vm5480_vm7, %v4585_v61, %v1241_v30  ;;  %v1245_v41 = vsel %vm5480_vm7, %v1243_v4, %v1244_v51  ;;  %v4756_v30 = vld [vmem:[%s5294_s10 + $0x9c] sm:$0xf] }
 0x10f   : > { %v2115_v47 = vshll.u32 %v4755_v23, 16  ;;  %v1299_v50 = vunpack.c.l.b16 %v1245_v41  ;;  %v2103_v19 = vrot.slane %v2102_v31, 4  ;;  %v2113_v54 = vrot.slane %v2112_v33, 4 }
 0x110   : > { %v1394_v9 = vpop.f32.mrf.mxu2  ;;  %v5798_v13 = vadd.f32 %v2332_v35, %v1754_v38  ;;  %v2120_v16 = vshrl.u32 %v4756_v30, 16  ;;  %v2123_v8 = vshll.u32 %v4756_v30, 16  ;;  %v2133_v41 = vshrl.u32 %v4757_v20, 16 }
 0x111   : > { %v1468_v14 = vadd.f32 %v1394_v9, %v1042_v52  ;;  %v1298_v52 = vunpack.c.l.b16 %v1242_v5  ;;  %v2117_v38 = vrot.slane %v2115_v47, 5  ;;  %v5153_v9 = vld [vmem:[%s5294_s10 + $0x94] sm:$0xf]  ;;  %v2129_v5 = vshll.u32 %v4757_v20, 16 }
 0x112   : > { %4714 = vmatmul.msk.bf16.gmra.mxu3 %vm749_vm4, %v5090_v57  ;;  %v2122_v31 = vrot.slane %v2120_v16, 4  ;;  %v2125_v33 = vrot.slane %v2123_v8, 5 }
 0x113   : > { %v1319_v4 = vpack.c.b16 %v1299_v50, %v1298_v52  ;;  %v2118_v23 = vsel %vm5306_vm3, %v2113_v54, %v2117_v38  ;;  %v4586_v52 = vrot.slane %v1123_v25, 9 }
 0x114   : > { %v2335_v60 = vpop.f32.mrf.mxu0  ;;  %v2126_v20 = vor.u32 %v2125_v33, %v2122_v31  ;;  %v4760_v31 = vld [vmem:[%s5294_s10 + $0xac] sm:$0xf] }
 0x115   : > { %v1681_v48 = vpop.f32.mrf.mxu3  ;;  %v1046_v35 = vpop.f32.mrf.mxu1 }
 0x116   : > { %v1755_v3 = vadd.f32 %v1681_v48, %v1468_v14  ;;  %v1047_v27 = vadd.f32 %v1046_v35, %v5722_v56  ;;  %v1248_v56 = vrot.slane %v5153_v9, 5  ;;  %v2108_v14 = vsel %vm5306_vm3, %v2103_v19, %v2107_v11  ;;  %v5091_v48 = vld [vmem:[%s5294_s10 + $0x90] sm:$0xff] }
 0x117   : > { %4779 = vmatmul.msk.bf16.gmra.mxu0 %vm749_vm4, %v2259_v62  ;;  %v5154_v62 = vld [vmem:[%s5294_s10 + $0x98] sm:$0x1]  ;;  %v2239_v50 = vunpack.c.l.b16 %v2108_v14  ;;  %v2135_v19 = vrot.slane %v2133_v41, 4  ;;  %v5076_v9 = vld [vmem:[%s5294_s10 + $0x90] sm:$0xff] }
 0x118   : > { %v1396_v51 = vpop.f32.mrf.mxu2  ;;  %4569 = vmatmul.msk.bf16.gmra.mxu1 %vm749_vm4, %v5075_v44  ;;  %v5811_v57 = vadd.f32 %v2335_v60, %v1755_v3  ;;  %v1251_v60 = vrot.slane %v5154_v62, 5  ;;  %v1250_v11 = vrot.slane %v1248_v56, 4  ;;  %v2240_v3 = vunpack.c.l.b16 %v2118_v23 }
 0x119   : > { %v1469_v61 = vadd.f32 %v1396_v51, %v1044_v21  ;;  %v2131_v51 = vrot.slane %v2129_v5, 5  ;;  %v2127_v62 = vrot.slane %v2126_v20, 4  ;;  %v5156_v20 = vld [vmem:[%s5294_s10 + $0xa4] sm:$0x1] }
 0x11a   : > { %v2260_v16 = vpack.c.b16 %v2240_v3, %v2239_v50  ;;  %v5155_v50 = vld [vmem:[%s5294_s10 + $0xa0] sm:$0xf] }
 0x11b   : > { %v2136_v25 = vor.u32 %v2135_v19, %v2131_v51  ;;  %v1255_v3 = vrot.slane %v5155_v50, 5  ;;  %v1124_v19 = vld [vmem:[%s5294_s10 + $0x9c] sm:$0xe] }
 0x11c   : > { %v2337_v1 = vpop.f32.mrf.mxu0 }
 0x11d   : > { %v1683_v21 = vpop.f32.mrf.mxu3  ;;  %4602 = vmatmul.msk.bf16.gmra.mxu2 %vm749_vm4, %v1319_v4  ;;  %v1048_v44 = vpop.f32.mrf.mxu1  ;;  %v4758_v4 = vld [vmem:[%s5294_s10 + $0xa4] sm:$0x1] }
 0x11e   : > { %v1756_v47 = vadd.f32 %v1683_v21, %v1469_v61  ;;  %v1049_v35 = vadd.f32 %v1048_v44, %v5740_v24  ;;  %v1249_v61 = vsel %vm5480_vm7, %v4586_v52, %v1248_v56  ;;  %v1252_v24 = vsel %vm5480_vm7, %v1250_v11, %v1251_v60  ;;  %v4759_v21 = vld [vmem:[%s5294_s10 + $0xa8] sm:$0xf] }
 0x11f   : > { %v2139_v14 = vshll.u32 %v4758_v4, 16  ;;  %v1301_v5 = vunpack.c.l.b16 %v1252_v24  ;;  %v2137_v60 = vrot.slane %v2136_v25, 4  ;;  %v2144_v52 = vshrl.u32 %v4759_v21, 16 }
 0x120   : > { %v1399_v30 = vpop.f32.mrf.mxu2  ;;  %v5824_v54 = vadd.f32 %v2337_v1, %v1756_v47  ;;  %v2132_v11 = vsel %vm5306_vm3, %v2127_v62, %v2131_v51  ;;  %v2157_v4 = vshrl.u32 %v4760_v31, 16 }
 0x121   : > { %v1470_v38 = vadd.f32 %v1399_v30, %v1047_v27  ;;  %v1300_v27 = vunpack.c.l.b16 %v1249_v61  ;;  %v2141_v44 = vrot.slane %v2139_v14, 5  ;;  %v2147_v30 = vshll.u32 %v4759_v21, 16  ;;  %v5092_v14 = vld [vmem:[%s5294_s10 + $0x9c] sm:$0xff] }
 0x122   : > { %4715 = vmatmul.msk.bf16.gmra.mxu3 %vm749_vm4, %v5091_v48  ;;  %v2146_v51 = vrot.slane %v2144_v52, 4 }
 0x123   : > { %v1320_v48 = vpack.c.b16 %v1301_v5, %v1300_v27  ;;  %v2142_v24 = vsel %vm5306_vm3, %v2137_v60, %v2141_v44  ;;  %v1257_v27 = vrot.slane %v1255_v3, 4  ;;  %v2149_v5 = vrot.slane %v2147_v30, 5  ;;  %v4761_v44 = vld [vmem:[%s5294_s10 + $0xb0] sm:$0x1] }
 0x124   : > { %v2340_v8 = vpop.f32.mrf.mxu0  ;;  %v2242_v62 = vunpack.c.l.b16 %v2142_v24 }
 0x125   : > { %v1686_v1 = vpop.f32.mrf.mxu3  ;;  %v1051_v23 = vpop.f32.mrf.mxu1  ;;  %v2150_v52 = vor.u32 %v2149_v5, %v2146_v51 }
 0x126   : > { %v1757_v41 = vadd.f32 %v1686_v1, %v1470_v38  ;;  %v2153_v38 = vshll.u32 %v4760_v31, 16  ;;  %v4587_v1 = vrot.slane %v1124_v19, 9  ;;  %v5077_v19 = vld [vmem:[%s5294_s10 + $0x9c] sm:$0xff] }
 0x127   : > { %4780 = vmatmul.msk.bf16.gmra.mxu0 %vm749_vm4, %v2260_v16  ;;  %v1258_v16 = vrot.slane %v5156_v20, 5 }
 0x128   : > { %v1401_v56 = vpop.f32.mrf.mxu2  ;;  %4570 = vmatmul.msk.bf16.gmra.mxu1 %vm749_vm4, %v5076_v9  ;;  %v5837_v33 = vadd.f32 %v2340_v8, %v1757_v41  ;;  %v2241_v8 = vunpack.c.l.b16 %v2132_v11  ;;  %v1052_v41 = vadd.f32 %v1051_v23, %v5575_v7  ;;  %v2155_v21 = vrot.slane %v2153_v38, 5 }
 0x129   : > { %v1471_v47 = vadd.f32 %v1401_v56, %v1049_v35  ;;  %v2159_v56 = vrot.slane %v2157_v4, 4  ;;  %v2163_v11 = vshll.u32 %v4761_v44, 16 }
 0x12a   : > { %v2261_v7 = vpack.c.b16 %v2242_v62, %v2241_v8  ;;  %v4762_v8 = vld [vmem:[%s5294_s10 + $0xb4] sm:$0xf] }
 0x12b   : > { %v2160_v23 = vor.u32 %v2159_v56, %v2155_v21  ;;  %v2165_v51 = vrot.slane %v2163_v11, 5  ;;  %v2171_v44 = vshll.u32 %v4762_v8, 16 }
 0x12c   : > { %v2342_v61 = vpop.f32.mrf.mxu0 }
 0x12d   : > { %v1688_v35 = vpop.f32.mrf.mxu3  ;;  %4603 = vmatmul.msk.bf16.gmra.mxu2 %vm749_vm4, %v1320_v48  ;;  %v1053_v9 = vpop.f32.mrf.mxu1  ;;  %v1259_v48 = vsel %vm5480_vm7, %v1257_v27, %v1258_v16  ;;  %v2161_v16 = vrot.slane %v2160_v23, 4 }
 0x12e   : > { %v1758_v25 = vadd.f32 %v1688_v35, %v1471_v47  ;;  %v1256_v47 = vsel %vm5480_vm7, %v4587_v1, %v1255_v3  ;;  %v1303_v24 = vunpack.c.l.b16 %v1259_v48  ;;  %v2151_v35 = vrot.slane %v2150_v52, 4  ;;  %v5158_v52 = vld [vmem:[%s5294_s10 + $0xb0] sm:$0x1] }
 0x12f   : > { %v1054_v3 = vadd.f32 %v1053_v9, %v5591_v34  ;;  %v2168_v34 = vshrl.u32 %v4762_v8, 16  ;;  %v2166_v9 = vsel %vm5306_vm3, %v2161_v16, %v2165_v51 }
 0x130   : > { %v1404_v60 = vpop.f32.mrf.mxu2  ;;  %v5850_v31 = vadd.f32 %v2342_v61, %v1758_v25  ;;  %v1302_v61 = vunpack.c.l.b16 %v1256_v47  ;;  %v2156_v56 = vsel %vm5306_vm3, %v2151_v35, %v2155_v21 }
 0x131   : > { %v1472_v50 = vadd.f32 %v1404_v60, %v1052_v41  ;;  %v5157_v41 = vld [vmem:[%s5294_s10 + $0xac] sm:$0xf]  ;;  %v1125_v60 = vld [vmem:[%s5294_s10 + $0xa8] sm:$0xe] }
 0x132   : > { %4716 = vmatmul.msk.bf16.gmra.mxu3 %vm749_vm4, %v5092_v14  ;;  %v4763_v14 = vld [vmem:[%s5294_s10 + $0xb8] sm:$0xf]  ;;  %v1321_v5 = vpack.c.b16 %v1303_v24, %v1302_v61  ;;  %v1262_v62 = vrot.slane %v5157_v41, 5  ;;  %v2243_v61 = vunpack.c.l.b16 %v2156_v56  ;;  %v2244_v24 = vunpack.c.l.b16 %v2166_v9  ;;  %v4764_v41 = vld [vmem:[%s5294_s10 + $0xbc] sm:$0x1] }
 0x133   : > { %v2181_v47 = vshrl.u32 %v4763_v14, 16 }
 0x134   : > { %v2345_v30 = vpop.f32.mrf.mxu0 }
 0x135   : > { %v1691_v38 = vpop.f32.mrf.mxu3  ;;  %v1056_v4 = vpop.f32.mrf.mxu1  ;;  %v2183_v51 = vrot.slane %v2181_v47, 4 }
 0x136   : > { %v1759_v20 = vadd.f32 %v1691_v38, %v1472_v50  ;;  %v2177_v50 = vshll.u32 %v4763_v14, 16  ;;  %v5093_v38 = vld [vmem:[%s5294_s10 + $0xa8] sm:$0xff]  ;;  %v1057_v35 = vadd.f32 %v1056_v4, %v5611_v58  ;;  %v2262_v58 = vpack.c.b16 %v2244_v24, %v2243_v61 }
 0x137   : > { %4781 = vmatmul.msk.bf16.gmra.mxu0 %vm749_vm4, %v2261_v7  ;;  %v1265_v7 = vrot.slane %v5158_v52, 5 }
 0x138   : > { %v1406_v25 = vpop.f32.mrf.mxu2  ;;  %4571 = vmatmul.msk.bf16.gmra.mxu1 %vm749_vm4, %v5077_v19  ;;  %v5863_v1 = vadd.f32 %v2345_v30, %v1759_v20  ;;  %v4588_v30 = vrot.slane %v1125_v60, 9  ;;  %v1264_v19 = vrot.slane %v1262_v62, 4  ;;  %v2170_v20 = vrot.slane %v2168_v34, 4  ;;  %v5078_v34 = vld [vmem:[%s5294_s10 + $0xa8] sm:$0xff] }
 0x139   : > { %v1473_v27 = vadd.f32 %v1406_v25, %v1054_v3  ;;  %v2173_v3 = vrot.slane %v2171_v44, 5  ;;  %v5875_v16 = vrot.slane %v2177_v50, 5  ;;  %v2187_v50 = vshll.u32 %v4764_v41, 16 }
 0x13b   : > { %v2174_v4 = vor.u32 %v2173_v3, %v2170_v20  ;;  %v2184_v56 = vor.u32 %v2183_v51, %v5875_v16  ;;  %v2189_v20 = vrot.slane %v2187_v50, 5 }
 0x13c   : > { %v2347_v48 = vpop.f32.mrf.mxu0 }
 0x13d   : > { %v1693_v23 = vpop.f32.mrf.mxu3  ;;  %4604 = vmatmul.msk.bf16.gmra.mxu2 %vm749_vm4, %v1321_v5  ;;  %v1058_v11 = vpop.f32.mrf.mxu1  ;;  %v1263_v5 = vsel %vm5480_vm7, %v4588_v30, %v1262_v62  ;;  %v4765_v62 = vld [vmem:[%s5294_s10 + $0xc0] sm:$0xf]  ;;  %v5159_v30 = vld [vmem:[%s5294_s10 + $0x10] sm:$0xf] }
 0x13e   : > { %v1760_v21 = vadd.f32 %v1693_v23, %v1473_v27  ;;  %v1266_v27 = vsel %vm5480_vm7, %v1264_v19, %v1265_v7  ;;  %v1304_v9 = vunpack.c.l.b16 %v1263_v5  ;;  %v4766_v23 = vld [vmem:[%s5294_s10 + $0xc4] sm:$0xf]  ;;  %v2503_v7 = vrot.slane %v5159_v30, 5 }
 0x13f   : > { %v1305_v44 = vunpack.c.l.b16 %v1266_v27  ;;  %v1059_v19 = vadd.f32 %v1058_v11, %v5628_v28  ;;  %v2195_v3 = vshll.u32 %v4765_v62, 16  ;;  %v5160_v27 = vld [vmem:[%s5294_s10 + $0xb8] sm:$0xf]  ;;  %v1126_v11 = vld [vmem:[%s5294_s10 + $0xb4] sm:$0xe] }
 0x140   : > { %v1409_v8 = vpop.f32.mrf.mxu2  ;;  %v5877_v25 = vadd.f32 %v2347_v48, %v1760_v21  ;;  %v2175_v21 = vrot.slane %v2174_v4, 4  ;;  %v1269_v41 = vrot.slane %v5160_v27, 5  ;;  %v2505_v4 = vrot.slane %v2503_v7, 4  ;;  %v5094_v27 = vld [vmem:[%s5294_s10 + $0xb4] sm:$0xff] }
 0x141   : > { %v1474_v14 = vadd.f32 %v1409_v8, %v1057_v35  ;;  %v1322_v24 = vpack.c.b16 %v1305_v44, %v1304_v9  ;;  %v2192_v35 = vshrl.u32 %v4765_v62, 16  ;;  %v2201_v8 = vshll.u32 %v4766_v23, 16 }
 0x142   : > { %4717 = vmatmul.msk.bf16.gmra.mxu3 %vm749_vm4, %v5093_v38  ;;  %v2185_v38 = vrot.slane %v2184_v56, 4  ;;  %v5162_v56 = vld [vmem:[%s5294_s10 + $0x14] sm:$0x1]  ;;  %v2180_v9 = vsel %vm5306_vm3, %v2175_v21, %v5875_v16 }
 0x143   : > { %v2194_v62 = vrot.slane %v2192_v35, 4  ;;  %v2245_v21 = vunpack.c.l.b16 %v2180_v9 }
 0x144   : > { %v2350_v60 = vpop.f32.mrf.mxu0  ;;  %v2190_v44 = vsel %vm5306_vm3, %v2185_v38, %v2189_v20 }
 0x145   : > { %v1696_v47 = vpop.f32.mrf.mxu3  ;;  %v1061_v48 = vpop.f32.mrf.mxu1  ;;  %v2246_v38 = vunpack.c.l.b16 %v2190_v44 }
 0x146   : > { %v1761_v52 = vadd.f32 %v1696_v47, %v1474_v14  ;;  %v2205_v14 = vshrl.u32 %v4766_v23, 16  ;;  %v2506_v47 = vrot.slane %v5162_v56, 5  ;;  %v5905_v23 = vrot.slane %v2201_v8, 5 }
 0x147   : > { %4782 = vmatmul.msk.bf16.gmra.mxu0 %vm749_vm4, %v2262_v58  ;;  %v5161_v58 = vld [vmem:[%s5294_s10 + $0xbc] sm:$0x1]  ;;  %v1271_v56 = vrot.slane %v1269_v41, 4  ;;  %v1062_v16 = vadd.f32 %v1061_v48, %v5648_v53 }
 0x148   : > { %v1411_v61 = vpop.f32.mrf.mxu2  ;;  %4572 = vmatmul.msk.bf16.gmra.mxu1 %vm749_vm4, %v5078_v34  ;;  %v5893_v5 = vadd.f32 %v2350_v60, %v1761_v52  ;;  %v1272_v28 = vrot.slane %v5161_v58, 5  ;;  %v2197_v52 = vrot.slane %v2195_v3, 5  ;;  %v2207_v30 = vrot.slane %v2205_v14, 4 }
 0x149   : > { %v1475_v51 = vadd.f32 %v1411_v61, %v1059_v19  ;;  %v4785_v19 = vld [vmem:[%s5294_s10 + $0xc] sm:$0xe]  ;;  %v4589_v58 = vrot.slane %v1126_v11, 9  ;;  %v2507_v3 = vsel %vm5480_vm7, %v2505_v4, %v2506_v47  ;;  %v4947_v4 = vld [vmem:[%s5294_s10 + $0x18] sm:$0xf] }
 0x14a   : > { %6809 = vst [vmem:[#allocation2_spill] sm:$0xff] %v5893_v5  ;;  %v4801_v5 = vrot.slane %v4785_v19, 9  ;;  %v2198_v8 = vor.u32 %v2197_v52, %v2194_v62  ;;  %v2616_v11 = vunpack.c.l.b16 %v2507_v3  ;;  %v1273_v48 = vsel %vm5480_vm7, %v1271_v56, %v1272_v28  ;;  %v5079_v62 = vld [vmem:[%s5294_s10 + $0xb4] sm:$0xff]  ;;  %v5928_v52 = vld [vmem:[%s5294_s10 + $0x1c] sm:$0xf] }
 0x14b   : > { %v1270_v53 = vsel %vm5480_vm7, %v4589_v58, %v1269_v41  ;;  %v2208_v9 = vor.u32 %v2207_v30, %v5905_v23  ;;  %v1307_v41 = vunpack.c.l.b16 %v1273_v48  ;;  %v3171_v56 = vshrl.u32 %v4947_v4, 16 }
 0x14c   : > { %v2352_v34 = vpop.f32.mrf.mxu0  ;;  %v2504_v35 = vsel %vm5480_vm7, %v4801_v5, %v2503_v7  ;;  %v2263_v7 = vpack.c.b16 %v2246_v38, %v2245_v21  ;;  %v2199_v58 = vrot.slane %v2198_v8, 4  ;;  %v3174_v30 = vshll.u32 %v4947_v4, 16 }
 0x14d   : > { %v1698_v60 = vpop.f32.mrf.mxu3  ;;  %4605 = vmatmul.msk.bf16.gmra.mxu2 %vm749_vm4, %v1322_v24  ;;  %v1063_v50 = vpop.f32.mrf.mxu1  ;;  %v4767_v24 = vld [vmem:[%s5294_s10 + $0xc8] sm:$0x1]  ;;  %v2615_v14 = vunpack.c.l.b16 %v2504_v35  ;;  %v2209_v28 = vrot.slane %v2208_v9, 4  ;;  %v3184_v38 = vshrl.u32 %v5928_v52, 16  ;;  %v3173_v8 = vrot.slane %v3171_v56, 4 }
 0x14e   : > { %v1762_v61 = vadd.f32 %v1698_v60, %v1475_v51  ;;  %v2211_v5 = vshll.u32 %v4767_v24, 16  ;;  %v1064_v21 = vadd.f32 %v1063_v50, %v5668_v17  ;;  %v2204_v17 = vsel %vm5306_vm3, %v2199_v58, %v5905_v23  ;;  %v4949_v9 = vld [vmem:[%s5294_s10 + $0x20] sm:$0x1]  ;;  %v4950_v56 = vld [vmem:[%s5294_s10 + $0x24] sm:$0xf] }
 0x14f   : > { %v5921_v44 = vpack.c.b16 %v2616_v11, %v2615_v14  ;;  %v3176_v14 = vrot.slane %v3174_v30, 5  ;;  %v3190_v58 = vshll.u32 %v4949_v9, 16  ;;  %v5948_v30 = vld [vmem:[%s5294_s10 + $0x28] sm:$0xf] }
 0x150   : > { %v1414_v20 = vpop.f32.mrf.mxu2  ;;  %v5924_v47 = vadd.f32 %v2352_v34, %v1762_v61  ;;  %v2213_v34 = vrot.slane %v2211_v5, 5  ;;  %v3180_v61 = vshll.u32 %v5928_v52, 16 }
 0x151   : > { %v1476_v51 = vadd.f32 %v1414_v20, %v1062_v16  ;;  %v1306_v16 = vunpack.c.l.b16 %v1270_v53  ;;  %v3186_v53 = vrot.slane %v3184_v38, 4  ;;  %v3192_v38 = vrot.slane %v3190_v58, 5 }
 0x152   : > { %4718 = vmatmul.msk.bf16.gmra.mxu3 %vm749_vm4, %v5094_v27  ;;  %v2214_v50 = vsel %vm5306_vm3, %v2209_v28, %v2213_v34  ;;  %v3182_v11 = vrot.slane %v3180_v61, 5 }
 0x153   : > { %v1323_v3 = vpack.c.b16 %v1307_v41, %v1306_v16  ;;  %v3177_v16 = vor.u32 %v3176_v14, %v3173_v8  ;;  %v3198_v8 = vshll.u32 %v4950_v56, 16  ;;  %v3204_v14 = vshll.u32 %v5948_v30, 16 }
 0x154   : > { %v2355_v60 = vpop.f32.mrf.mxu0  ;;  %v3187_v41 = vor.u32 %v3186_v53, %v3182_v11 }
 0x155   : > { %v1701_v19 = vpop.f32.mrf.mxu3  ;;  %v1066_v27 = vpop.f32.mrf.mxu1  ;;  %v3178_v34 = vrot.slane %v3177_v16, 4 }
 0x156   : > { %v1763_v20 = vadd.f32 %v1701_v19, %v1476_v51  ;;  %v2248_v19 = vunpack.c.l.b16 %v2214_v50  ;;  %v1067_v23 = vadd.f32 %v1066_v27, %v5691_v2  ;;  %v3188_v61 = vrot.slane %v3187_v41, 4 }
 0x157   : > { %4783 = vmatmul.msk.bf16.gmra.mxu0 %vm749_vm4, %v2263_v7 }
 0x158   : > { %v1416_v24 = vpop.f32.mrf.mxu2  ;;  %4573 = vmatmul.msk.bf16.gmra.mxu1 %vm749_vm4, %v5079_v62  ;;  %v5935_v51 = vadd.f32 %v2355_v60, %v1763_v20  ;;  %v5095_v60 = vld [vmem:[%s5294_s10 + $0xc0] sm:$0xff]  ;;  %v2247_v62 = vunpack.c.l.b16 %v2204_v17  ;;  %v3208_v17 = vshrl.u32 %v5948_v30, 16  ;;  %v3193_v41 = vsel %vm5306_vm3, %v3188_v61, %v3192_v38  ;;  %v5974_v38 = vld [vmem:[%s5294_s10 + $0x2c] sm:$0x1] }
 0x159   : > { %v1477_v35 = vadd.f32 %v1416_v24, %v1064_v21  ;;  %v5012_v24 = vld [vmem:[%s5294_s10 + $0x18] sm:$0xe]  ;;  %v3557_v61 = vunpack.c.l.b16 %v3193_v41 }
 0x15a   : > { %v2264_v21 = vpack.c.b16 %v2248_v19, %v2247_v62  ;;  %v5164_v62 = vld [vmem:[%s5294_s10 + $0x20] sm:$0x1] }
 0x15b   : > { %v2513_v19 = vrot.slane %v5164_v62, 5 }
 0x15c   : > { %v2357_v48 = vpop.f32.mrf.mxu0 }
 0x15d   : > { %v1703_v7 = vpop.f32.mrf.mxu3  ;;  %4606 = vmatmul.msk.bf16.gmra.mxu2 %vm749_vm4, %v1323_v3  ;;  %v1068_v5 = vpop.f32.mrf.mxu1  ;;  %v3195_v3 = vshrl.u32 %v4950_v56, 16 }
 0x15e   : > { %v1764_v4 = vadd.f32 %v1703_v7, %v1477_v35  ;;  %v3842_v35 = vrot.slane %v5928_v52, 5  ;;  %v5163_v7 = vld [vmem:[%s5294_s10 + $0x1c] sm:$0xf]  ;;  %v3183_v52 = vsel %vm5306_vm3, %v3178_v34, %v3182_v11  ;;  %v3210_v11 = vrot.slane %v3208_v17, 4 }
 0x160   : > { %v1419_v20 = vpop.f32.mrf.mxu2  ;;  %v5953_v2 = vadd.f32 %v2357_v48, %v1764_v4  ;;  %v5028_v48 = vrot.slane %v5012_v24, 9  ;;  %v4786_v4 = vld [vmem:[%s5294_s10 + $0x18] sm:$0xe]  ;;  %v3844_v58 = vrot.slane %v3842_v35, 4 }
 0x161   : > { %v1478_v28 = vadd.f32 %v1419_v20, %v1067_v23  ;;  %v1069_v23 = vadd.f32 %v1068_v5, %v5711_v29  ;;  %v3845_v20 = vrot.slane %v4949_v9, 5  ;;  %v5096_v24 = vld [vmem:[%s5294_s10 + $0x18] sm:$0xff]  ;;  %v3556_v5 = vunpack.c.l.b16 %v3183_v52 }
 0x162   : > { %4719 = vmatmul.msk.bf16.gmra.mxu3 %vm749_vm4, %v5095_v60  ;;  %6810 = vst [vmem:[#allocation3_spill] sm:$0xff] %v5953_v2  ;;  %v2510_v60 = vrot.slane %v5163_v7, 5  ;;  %v5968_v7 = vrot.slane %v3204_v14, 5  ;;  %v3843_v2 = vsel %vm5480_vm7, %v5028_v48, %v3842_v35  ;;  %v3214_v35 = vshll.u32 %v5974_v38, 16 }
 0x163   : > { %v3588_v48 = vpack.c.b16 %v3557_v61, %v3556_v5  ;;  %v5165_v5 = vld [vmem:[%s5294_s10 + $0x28] sm:$0xf] }
 0x164   : > { %v2360_v27 = vpop.f32.mrf.mxu0  ;;  %v2512_v62 = vrot.slane %v2510_v60, 4  ;;  %v2517_v61 = vrot.slane %v5165_v5, 5 }
 0x165   : > { %v1706_v50 = vpop.f32.mrf.mxu3  ;;  %v1071_v53 = vpop.f32.mrf.mxu1 }
 0x166   : > { %v1765_v16 = vadd.f32 %v1706_v50, %v1478_v28  ;;  %v3197_v28 = vrot.slane %v3195_v3, 4  ;;  %v3200_v50 = vrot.slane %v3198_v8, 5  ;;  %v2514_v17 = vsel %vm5480_vm7, %v2512_v62, %v2513_v19  ;;  %v5993_v62 = vld [vmem:[%s5294_s10 + $0x34] sm:$0xf] }
 0x167   : > { %4784 = vmatmul.msk.bf16.gmra.mxu0 %vm749_vm4, %v2264_v21  ;;  %v4802_v21 = vrot.slane %v4786_v4, 9  ;;  %v1072_v4 = vadd.f32 %v1071_v53, %v5593_v37 }
 0x168   : > { %v1421_v56 = vpop.f32.mrf.mxu2  ;;  %4818 = vmatmul.msk.bf16.vlgmr.msra.gmra.mxu1 %vm749_vm4, %v5921_v44  ;;  %v5971_v29 = vadd.f32 %v2360_v27, %v1765_v16  ;;  %v3846_v44 = vsel %vm5480_vm7, %v3844_v58, %v3845_v20  ;;  %v3201_v3 = vor.u32 %v3200_v50, %v3197_v28  ;;  %v3211_v16 = vor.u32 %v3210_v11, %v5968_v7  ;;  %v5013_v11 = vld [vmem:[%s5294_s10 + $0x24] sm:$0xe] }
 0x169   : > { %v1479_v34 = vadd.f32 %v1421_v56, %v1069_v23  ;;  %v2511_v27 = vsel %vm5480_vm7, %v4802_v21, %v2510_v60  ;;  %v3954_v23 = vunpack.c.l.b16 %v3843_v2  ;;  %v3955_v41 = vunpack.c.l.b16 %v3846_v44 }
 0x16a   : > { %v2617_v20 = vunpack.c.l.b16 %v2511_v27  ;;  %v2618_v60 = vunpack.c.l.b16 %v2514_v17  ;;  %v3202_v28 = vrot.slane %v3201_v3, 4  ;;  %v3212_v19 = vrot.slane %v3211_v16, 4 }
 0x16b   : > { %v3216_v50 = vrot.slane %v3214_v35, 5  ;;  %v3849_v21 = vrot.slane %v5948_v30, 5  ;;  %v5029_v17 = vrot.slane %v5013_v11, 9  ;;  %v4787_v30 = vld [vmem:[%s5294_s10 + $0x24] sm:$0xe] }
 0x16c   : > { %v2362_v9 = vpop.f32.mrf.mxu0  ;;  %v2648_v53 = vpack.c.b16 %v2618_v60, %v2617_v20 }
 0x16d   : > { %v1708_v8 = vpop.f32.mrf.mxu3  ;;  %4931 = vmatmul.msk.bf16.vlgmr.msra.gmra.mxu2 %vm749_vm4, %v5096_v24  ;;  %v1073_v14 = vpop.f32.mrf.mxu1  ;;  %v4953_v24 = vld [vmem:[%s5294_s10 + $0x30] sm:$0xf]  ;;  %v3217_v27 = vsel %vm5306_vm3, %v3212_v19, %v3216_v50  ;;  %v5097_v50 = vld [vmem:[%s5294_s10 + $0x24] sm:$0xff] }
 0x16e   : > { %v1766_v52 = vadd.f32 %v1708_v8, %v1479_v34  ;;  %v3986_v34 = vpack.c.b16 %v3955_v41, %v3954_v23  ;;  %v3207_v8 = vsel %vm5306_vm3, %v3202_v28, %v5968_v7  ;;  %v3219_v16 = vshrl.u32 %v4953_v24, 16  ;;  %v5166_v41 = vld [vmem:[%s5294_s10 + $0x2c] sm:$0x1] }
 0x16f   : > { %v3851_v23 = vrot.slane %v3849_v21, 4  ;;  %v3852_v7 = vrot.slane %v5974_v38, 5  ;;  %v3558_v60 = vunpack.c.l.b16 %v3207_v8  ;;  %v2519_v28 = vrot.slane %v2517_v61, 4 }
 0x170   : > { %v1424_v58 = vpop.f32.mrf.mxu2  ;;  %v5995_v37 = vadd.f32 %v2362_v9, %v1766_v52  ;;  %v3222_v9 = vshll.u32 %v4953_v24, 16  ;;  %v3228_v52 = vshll.u32 %v5993_v62, 16  ;;  %v3559_v11 = vunpack.c.l.b16 %v3217_v27 }
 0x171   : > { %v1480_v56 = vadd.f32 %v1424_v58, %v1072_v4  ;;  %v1074_v4 = vadd.f32 %v1073_v14, %v5614_v63  ;;  %v2520_v58 = vrot.slane %v5166_v41, 5  ;;  %v3850_v24 = vsel %vm5480_vm7, %v5029_v17, %v3849_v21 }
 0x172   : > { %4996 = vmatmul.msk.bf16.vlgmr.msra.gmra.mxu3 %vm749_vm4, %v3588_v48  ;;  %v3232_v48 = vshrl.u32 %v5993_v62, 16  ;;  %v3221_v63 = vrot.slane %v3219_v16, 4  ;;  %v3224_v14 = vrot.slane %v3222_v9, 5  ;;  %v6016_v38 = vrot.slane %v3228_v52, 5 }
 0x173   : > { %v2521_v27 = vsel %vm5480_vm7, %v2519_v28, %v2520_v58  ;;  %v3956_v17 = vunpack.c.l.b16 %v3850_v24  ;;  %v5014_v24 = vld [vmem:[%s5294_s10 + $0x30] sm:$0xe] }
 0x174   : > { %v2365_v2 = vpop.f32.mrf.mxu0  ;;  %v3234_v5 = vrot.slane %v3232_v48, 4  ;;  %v3225_v52 = vor.u32 %v3224_v14, %v3221_v63 }
 0x175   : > { %v1711_v44 = vpop.f32.mrf.mxu3  ;;  %v1076_v3 = vpop.f32.mrf.mxu1 }
 0x176   : > { %v1767_v35 = vadd.f32 %v1711_v44, %v1480_v56  ;;  %v4803_v56 = vrot.slane %v4787_v30, 9  ;;  %v6025_v30 = vld [vmem:[%s5294_s10 + $0x38] sm:$0x1]  ;;  %v3235_v48 = vor.u32 %v3234_v5, %v6016_v38  ;;  %v3226_v28 = vrot.slane %v3225_v52, 4 }
 0x177   : > { %5045 = vmatmul.msk.bf16.vlgmr.msra.gmra.mxu0 %vm749_vm4, %v3986_v34 }
 0x178   : > { %v1426_v20 = vpop.f32.mrf.mxu2  ;;  %4819 = vmatmul.msk.bf16.gmra.mxu1 %vm749_vm4, %v2648_v53  ;;  %v6014_v34 = vadd.f32 %v2365_v2, %v1767_v35  ;;  %v3853_v53 = vsel %vm5480_vm7, %v3851_v23, %v3852_v7  ;;  %v2518_v8 = vsel %vm5480_vm7, %v4803_v56, %v2517_v61  ;;  %v3589_v2 = vpack.c.b16 %v3559_v11, %v3558_v60  ;;  %v6033_v56 = vld [vmem:[%s5294_s10 + $0x40] sm:$0xf] }
 0x179   : > { %v1481_v19 = vadd.f32 %v1426_v20, %v1074_v4  ;;  %v3957_v9 = vunpack.c.l.b16 %v3853_v53  ;;  %v1077_v61 = vadd.f32 %v1076_v3, %v5631_v22  ;;  %v2619_v4 = vunpack.c.l.b16 %v2518_v8  ;;  %v4956_v20 = vld [vmem:[%s5294_s10 + $0x3c] sm:$0xf] }
 0x17a   : > { %v2620_v23 = vunpack.c.l.b16 %v2521_v27  ;;  %v3238_v7 = vshll.u32 %v6025_v30, 16  ;;  %v3856_v22 = vrot.slane %v5993_v62, 5  ;;  %v3243_v14 = vshrl.u32 %v4956_v20, 16 }
 0x17b   : > { %v3987_v60 = vpack.c.b16 %v3957_v9, %v3956_v17  ;;  %v3246_v5 = vshll.u32 %v4956_v20, 16  ;;  %v3252_v53 = vshll.u32 %v6033_v56, 16  ;;  %v3256_v8 = vshrl.u32 %v6033_v56, 16  ;;  %v5168_v9 = vld [vmem:[%s5294_s10 + $0x38] sm:$0x1] }
 0x17c   : > { %v2367_v44 = vpop.f32.mrf.mxu0  ;;  %v3240_v11 = vrot.slane %v3238_v7, 5  ;;  %v2527_v52 = vrot.slane %v5168_v9, 5  ;;  %v3859_v62 = vrot.slane %v6025_v30, 5  ;;  %v3858_v7 = vrot.slane %v3856_v22, 4  ;;  %v6060_v9 = vld [vmem:[%s5294_s10 + $0x44] sm:$0x1] }
 0x17d   : > { %v1713_v21 = vpop.f32.mrf.mxu3  ;;  %4932 = vmatmul.msk.bf16.gmra.mxu2 %vm749_vm4, %v5097_v50  ;;  %v1078_v16 = vpop.f32.mrf.mxu1  ;;  %v2649_v50 = vpack.c.b16 %v2620_v23, %v2619_v4  ;;  %v3231_v4 = vsel %vm5306_vm3, %v3226_v28, %v6016_v38  ;;  %v3248_v20 = vrot.slane %v3246_v5, 5  ;;  %v6054_v30 = vrot.slane %v3252_v53, 5 }
 0x17e   : > { %v1768_v35 = vadd.f32 %v1713_v21, %v1481_v19  ;;  %v3236_v19 = vrot.slane %v3235_v48, 4  ;;  %v3560_v38 = vunpack.c.l.b16 %v3231_v4 }
 0x180   : > { %v1429_v41 = vpop.f32.mrf.mxu2  ;;  %v6038_v3 = vadd.f32 %v2367_v44, %v1768_v35  ;;  %v4788_v44 = vld [vmem:[%s5294_s10 + $0x30] sm:$0xe]  ;;  %v1079_v35 = vadd.f32 %v1078_v16, %v5652_v55  ;;  %v3241_v23 = vsel %vm5306_vm3, %v3236_v19, %v3240_v11 }
 0x181   : > { %v1482_v58 = vadd.f32 %v1429_v41, %v1077_v61  ;;  %v5030_v61 = vrot.slane %v5014_v24, 9  ;;  %v3258_v24 = vrot.slane %v3256_v8, 4  ;;  %v4804_v55 = vrot.slane %v4788_v44, 9 }
 0x182   : > { %4997 = vmatmul.msk.bf16.gmra.mxu3 %vm749_vm4, %v3589_v2  ;;  %v5167_v2 = vld [vmem:[%s5294_s10 + $0x34] sm:$0xf]  ;;  %v3561_v28 = vunpack.c.l.b16 %v3241_v23 }
 0x183   : > { %v2524_v17 = vrot.slane %v5167_v2, 5  ;;  %v3857_v11 = vsel %vm5480_vm7, %v5030_v61, %v3856_v22  ;;  %v3262_v22 = vshll.u32 %v6060_v9, 16 }
 0x184   : > { %v2370_v63 = vpop.f32.mrf.mxu0  ;;  %v3590_v44 = vpack.c.b16 %v3561_v28, %v3560_v38  ;;  %v5169_v28 = vld [vmem:[%s5294_s10 + $0x40] sm:$0xf] }
 0x185   : > { %v1716_v27 = vpop.f32.mrf.mxu3  ;;  %v1081_v21 = vpop.f32.mrf.mxu1  ;;  %v2526_v16 = vrot.slane %v2524_v17, 4 }
 0x186   : > { %v1769_v48 = vadd.f32 %v1716_v27, %v1482_v58  ;;  %v3245_v58 = vrot.slane %v3243_v14, 4  ;;  %v5098_v27 = vld [vmem:[%s5294_s10 + $0x30] sm:$0xff] }
 0x187   : > { %5046 = vmatmul.msk.bf16.gmra.mxu0 %vm749_vm4, %v3987_v60  ;;  %v2528_v8 = vsel %vm5480_vm7, %v2526_v16, %v2527_v52  ;;  %v6079_v16 = vld [vmem:[%s5294_s10 + $0x4c] sm:$0xf] }
 0x188   : > { %v1431_v41 = vpop.f32.mrf.mxu2  ;;  %4820 = vmatmul.msk.bf16.gmra.mxu1 %vm749_vm4, %v2649_v50  ;;  %v6057_v2 = vadd.f32 %v2370_v63, %v1769_v48  ;;  %v3860_v50 = vsel %vm5480_vm7, %v3858_v7, %v3859_v62  ;;  %v3249_v14 = vor.u32 %v3248_v20, %v3245_v58  ;;  %v2525_v63 = vsel %vm5480_vm7, %v4804_v55, %v2524_v17 }
 0x189   : > { %v1483_v60 = vadd.f32 %v1431_v41, %v1079_v35  ;;  %v3259_v48 = vor.u32 %v3258_v24, %v6054_v30  ;;  %v1082_v62 = vadd.f32 %v1081_v21, %v5675_v26  ;;  %v3958_v35 = vunpack.c.l.b16 %v3857_v11  ;;  %v5015_v24 = vld [vmem:[%s5294_s10 + $0x3c] sm:$0xe] }
 0x18a   : > { %v3959_v4 = vunpack.c.l.b16 %v3860_v50  ;;  %v2621_v7 = vunpack.c.l.b16 %v2525_v63  ;;  %v2622_v17 = vunpack.c.l.b16 %v2528_v8  ;;  %v3250_v58 = vrot.slane %v3249_v14, 4 }
 0x18b   : > { %v3260_v52 = vrot.slane %v3259_v48, 4  ;;  %v3264_v20 = vrot.slane %v3262_v22, 5  ;;  %v3863_v55 = vrot.slane %v6033_v56, 5  ;;  %v2531_v11 = vrot.slane %v5169_v28, 5  ;;  %v4789_v56 = vld [vmem:[%s5294_s10 + $0x3c] sm:$0xe] }
 0x18c   : > { %v2372_v19 = vpop.f32.mrf.mxu0  ;;  %v2650_v38 = vpack.c.b16 %v2622_v17, %v2621_v7  ;;  %v5031_v8 = vrot.slane %v5015_v24, 9 }
 0x18d   : > { %v1718_v5 = vpop.f32.mrf.mxu3  ;;  %4933 = vmatmul.msk.bf16.gmra.mxu2 %vm749_vm4, %v5098_v27  ;;  %v1083_v53 = vpop.f32.mrf.mxu1  ;;  %v4959_v27 = vld [vmem:[%s5294_s10 + $0x48] sm:$0xf]  ;;  %v3265_v63 = vsel %vm5306_vm3, %v3260_v52, %v3264_v20  ;;  %v5099_v20 = vld [vmem:[%s5294_s10 + $0x3c] sm:$0xff] }
 0x18e   : > { %v1770_v61 = vadd.f32 %v1718_v5, %v1483_v60  ;;  %v3988_v60 = vpack.c.b16 %v3959_v4, %v3958_v35  ;;  %v3255_v5 = vsel %vm5306_vm3, %v3250_v58, %v6054_v30  ;;  %v3267_v48 = vshrl.u32 %v4959_v27, 16  ;;  %v5170_v4 = vld [vmem:[%s5294_s10 + $0x44] sm:$0x1] }
 0x18f   : > { %v3865_v35 = vrot.slane %v3863_v55, 4  ;;  %v3866_v30 = vrot.slane %v6060_v9, 5  ;;  %v3562_v17 = vunpack.c.l.b16 %v3255_v5  ;;  %v2533_v58 = vrot.slane %v2531_v11, 4 }
 0x190   : > { %v1434_v23 = vpop.f32.mrf.mxu2  ;;  %v6081_v26 = vadd.f32 %v2372_v19, %v1770_v61  ;;  %v3270_v19 = vshll.u32 %v4959_v27, 16  ;;  %v3276_v61 = vshll.u32 %v6079_v16, 16  ;;  %v3563_v24 = vunpack.c.l.b16 %v3265_v63 }
 0x191   : > { %v1484_v41 = vadd.f32 %v1434_v23, %v1082_v62  ;;  %v1084_v62 = vadd.f32 %v1083_v53, %v5693_v43  ;;  %v2534_v23 = vrot.slane %v5170_v4, 5  ;;  %v3864_v27 = vsel %vm5480_vm7, %v5031_v8, %v3863_v55 }
 0x192   : > { %4998 = vmatmul.msk.bf16.gmra.mxu3 %vm749_vm4, %v3590_v44  ;;  %v3280_v44 = vshrl.u32 %v6079_v16, 16  ;;  %v3269_v43 = vrot.slane %v3267_v48, 4  ;;  %v3272_v53 = vrot.slane %v3270_v19, 5  ;;  %v6102_v9 = vrot.slane %v3276_v61, 5 }
 0x193   : > { %v2535_v63 = vsel %vm5480_vm7, %v2533_v58, %v2534_v23  ;;  %v3960_v8 = vunpack.c.l.b16 %v3864_v27  ;;  %v5016_v27 = vld [vmem:[%s5294_s10 + $0x48] sm:$0xe] }
 0x194   : > { %v2375_v21 = vpop.f32.mrf.mxu0  ;;  %v3282_v28 = vrot.slane %v3280_v44, 4  ;;  %v3273_v61 = vor.u32 %v3272_v53, %v3269_v43 }
 0x195   : > { %v1721_v50 = vpop.f32.mrf.mxu3  ;;  %v1086_v14 = vpop.f32.mrf.mxu1 }
 0x196   : > { %v1771_v22 = vadd.f32 %v1721_v50, %v1484_v41  ;;  %v4805_v41 = vrot.slane %v4789_v56, 9  ;;  %v6111_v56 = vld [vmem:[%s5294_s10 + $0x50] sm:$0x1]  ;;  %v3283_v44 = vor.u32 %v3282_v28, %v6102_v9  ;;  %v3274_v58 = vrot.slane %v3273_v61, 4 }
 0x197   : > { %5047 = vmatmul.msk.bf16.gmra.mxu0 %vm749_vm4, %v3988_v60 }
 0x198   : > { %v1436_v7 = vpop.f32.mrf.mxu2  ;;  %4821 = vmatmul.msk.bf16.gmra.mxu1 %vm749_vm4, %v2650_v38  ;;  %v6100_v60 = vadd.f32 %v2375_v21, %v1771_v22  ;;  %v3867_v38 = vsel %vm5480_vm7, %v3865_v35, %v3866_v30  ;;  %v2532_v5 = vsel %vm5480_vm7, %v4805_v41, %v2531_v11  ;;  %v3591_v21 = vpack.c.b16 %v3563_v24, %v3562_v17  ;;  %v6119_v41 = vld [vmem:[%s5294_s10 + $0x58] sm:$0xf] }
 0x199   : > { %v1485_v52 = vadd.f32 %v1436_v7, %v1084_v62  ;;  %v3961_v19 = vunpack.c.l.b16 %v3867_v38  ;;  %v1087_v11 = vadd.f32 %v1086_v14, %v5714_v40  ;;  %v2623_v62 = vunpack.c.l.b16 %v2532_v5  ;;  %v4962_v7 = vld [vmem:[%s5294_s10 + $0x54] sm:$0xf] }
 0x19a   : > { %v2624_v35 = vunpack.c.l.b16 %v2535_v63  ;;  %v3286_v30 = vshll.u32 %v6111_v56, 16  ;;  %v3870_v40 = vrot.slane %v6079_v16, 5  ;;  %v3291_v53 = vshrl.u32 %v4962_v7, 16 }
 0x19b   : > { %v3989_v17 = vpack.c.b16 %v3961_v19, %v3960_v8  ;;  %v3294_v28 = vshll.u32 %v4962_v7, 16  ;;  %v3300_v38 = vshll.u32 %v6119_v41, 16  ;;  %v3304_v5 = vshrl.u32 %v6119_v41, 16  ;;  %v5172_v19 = vld [vmem:[%s5294_s10 + $0x50] sm:$0x1] }
 0x19c   : > { %v2377_v50 = vpop.f32.mrf.mxu0  ;;  %v3288_v24 = vrot.slane %v3286_v30, 5  ;;  %v2541_v61 = vrot.slane %v5172_v19, 5  ;;  %v3873_v16 = vrot.slane %v6111_v56, 5  ;;  %v3872_v30 = vrot.slane %v3870_v40, 4  ;;  %v6146_v19 = vld [vmem:[%s5294_s10 + $0x5c] sm:$0x1] }
 0x19d   : > { %v1723_v55 = vpop.f32.mrf.mxu3  ;;  %4934 = vmatmul.msk.bf16.gmra.mxu2 %vm749_vm4, %v5099_v20  ;;  %v1088_v48 = vpop.f32.mrf.mxu1  ;;  %v2651_v20 = vpack.c.b16 %v2624_v35, %v2623_v62  ;;  %v3279_v62 = vsel %vm5306_vm3, %v3274_v58, %v6102_v9  ;;  %v3296_v7 = vrot.slane %v3294_v28, 5  ;;  %v6140_v56 = vrot.slane %v3300_v38, 5 }
 0x19e   : > { %v1772_v22 = vadd.f32 %v1723_v55, %v1485_v52  ;;  %v3284_v52 = vrot.slane %v3283_v44, 4  ;;  %v3564_v9 = vunpack.c.l.b16 %v3279_v62 }
 0x1a0   : > { %v1439_v4 = vpop.f32.mrf.mxu2  ;;  %v6124_v14 = vadd.f32 %v2377_v50, %v1772_v22  ;;  %v4790_v50 = vld [vmem:[%s5294_s10 + $0x48] sm:$0xe]  ;;  %v1089_v22 = vadd.f32 %v1088_v48, %v5729_v10  ;;  %v3289_v35 = vsel %vm5306_vm3, %v3284_v52, %v3288_v24 }
 0x1a1   : > { %v1486_v23 = vadd.f32 %v1439_v4, %v1087_v11  ;;  %v5032_v11 = vrot.slane %v5016_v27, 9  ;;  %v3306_v27 = vrot.slane %v3304_v5, 4  ;;  %v4806_v10 = vrot.slane %v4790_v50, 9 }
 0x1a2   : > { %4999 = vmatmul.msk.bf16.gmra.mxu3 %vm749_vm4, %v3591_v21  ;;  %v5171_v21 = vld [vmem:[%s5294_s10 + $0x4c] sm:$0xf]  ;;  %v3565_v58 = vunpack.c.l.b16 %v3289_v35 }
 0x1a3   : > { %v2538_v8 = vrot.slane %v5171_v21, 5  ;;  %v3871_v24 = vsel %vm5480_vm7, %v5032_v11, %v3870_v40  ;;  %v3310_v40 = vshll.u32 %v6146_v19, 16 }
 0x1a4   : > { %v2380_v43 = vpop.f32.mrf.mxu0  ;;  %v3592_v50 = vpack.c.b16 %v3565_v58, %v3564_v9  ;;  %v5173_v58 = vld [vmem:[%s5294_s10 + $0x58] sm:$0xf] }
 0x1a5   : > { %v1726_v63 = vpop.f32.mrf.mxu3  ;;  %v1091_v55 = vpop.f32.mrf.mxu1  ;;  %v2540_v48 = vrot.slane %v2538_v8, 4 }
 0x1a6   : > { %v1773_v44 = vadd.f32 %v1726_v63, %v1486_v23  ;;  %v3293_v23 = vrot.slane %v3291_v53, 4  ;;  %v5100_v63 = vld [vmem:[%s5294_s10 + $0x48] sm:$0xff] }
 0x1a7   : > { %5048 = vmatmul.msk.bf16.gmra.mxu0 %vm749_vm4, %v3989_v17  ;;  %v2542_v5 = vsel %vm5480_vm7, %v2540_v48, %v2541_v61  ;;  %v6165_v48 = vld [vmem:[%s5294_s10 + $0x64] sm:$0xf] }
 0x1a8   : > { %v1441_v4 = vpop.f32.mrf.mxu2  ;;  %4822 = vmatmul.msk.bf16.gmra.mxu1 %vm749_vm4, %v2651_v20  ;;  %v6143_v21 = vadd.f32 %v2380_v43, %v1773_v44  ;;  %v3874_v20 = vsel %vm5480_vm7, %v3872_v30, %v3873_v16  ;;  %v3297_v53 = vor.u32 %v3296_v7, %v3293_v23  ;;  %v2539_v43 = vsel %vm5480_vm7, %v4806_v10, %v2538_v8 }
 0x1a9   : > { %v1487_v17 = vadd.f32 %v1441_v4, %v1089_v22  ;;  %v3307_v44 = vor.u32 %v3306_v27, %v6140_v56  ;;  %v1092_v16 = vadd.f32 %v1091_v55, %v5605_v49  ;;  %v3962_v22 = vunpack.c.l.b16 %v3871_v24  ;;  %v5017_v27 = vld [vmem:[%s5294_s10 + $0x54] sm:$0xe] }
 0x1aa   : > { %v3963_v62 = vunpack.c.l.b16 %v3874_v20  ;;  %v2625_v30 = vunpack.c.l.b16 %v2539_v43  ;;  %v2626_v8 = vunpack.c.l.b16 %v2542_v5  ;;  %v3298_v23 = vrot.slane %v3297_v53, 4 }
 0x1ab   : > { %v3308_v61 = vrot.slane %v3307_v44, 4  ;;  %v3312_v7 = vrot.slane %v3310_v40, 5  ;;  %v3877_v10 = vrot.slane %v6119_v41, 5  ;;  %v2545_v24 = vrot.slane %v5173_v58, 5  ;;  %v4791_v41 = vld [vmem:[%s5294_s10 + $0x54] sm:$0xe] }
 0x1ac   : > { %v2382_v52 = vpop.f32.mrf.mxu0  ;;  %v2652_v9 = vpack.c.b16 %v2626_v8, %v2625_v30  ;;  %v5033_v5 = vrot.slane %v5017_v27, 9 }
 0x1ad   : > { %v1728_v28 = vpop.f32.mrf.mxu3  ;;  %4935 = vmatmul.msk.bf16.gmra.mxu2 %vm749_vm4, %v5100_v63  ;;  %v1093_v38 = vpop.f32.mrf.mxu1  ;;  %v4965_v63 = vld [vmem:[%s5294_s10 + $0x60] sm:$0xf]  ;;  %v3313_v43 = vsel %vm5306_vm3, %v3308_v61, %v3312_v7  ;;  %v5101_v7 = vld [vmem:[%s5294_s10 + $0x54] sm:$0xff] }
 0x1ae   : > { %v1774_v11 = vadd.f32 %v1728_v28, %v1487_v17  ;;  %v3990_v17 = vpack.c.b16 %v3963_v62, %v3962_v22  ;;  %v3303_v28 = vsel %vm5306_vm3, %v3298_v23, %v6140_v56  ;;  %v3315_v44 = vshrl.u32 %v4965_v63, 16  ;;  %v5174_v62 = vld [vmem:[%s5294_s10 + $0x5c] sm:$0x1] }
 0x1af   : > { %v3879_v22 = vrot.slane %v3877_v10, 4  ;;  %v3880_v56 = vrot.slane %v6146_v19, 5  ;;  %v3566_v8 = vunpack.c.l.b16 %v3303_v28  ;;  %v2547_v23 = vrot.slane %v2545_v24, 4 }
 0x1b0   : > { %v1444_v35 = vpop.f32.mrf.mxu2  ;;  %v6167_v49 = vadd.f32 %v2382_v52, %v1774_v11  ;;  %v3318_v52 = vshll.u32 %v4965_v63, 16  ;;  %v3324_v11 = vshll.u32 %v6165_v48, 16  ;;  %v3567_v27 = vunpack.c.l.b16 %v3313_v43 }
 0x1b1   : > { %v1488_v4 = vadd.f32 %v1444_v35, %v1092_v16  ;;  %v1094_v16 = vadd.f32 %v1093_v38, %v5624_v0  ;;  %v2548_v35 = vrot.slane %v5174_v62, 5  ;;  %v3878_v63 = vsel %vm5480_vm7, %v5033_v5, %v3877_v10 }
 0x1b2   : > { %5000 = vmatmul.msk.bf16.gmra.mxu3 %vm749_vm4, %v3592_v50  ;;  %v3328_v50 = vshrl.u32 %v6165_v48, 16  ;;  %v3317_v0 = vrot.slane %v3315_v44, 4  ;;  %v3320_v38 = vrot.slane %v3318_v52, 5  ;;  %v6188_v19 = vrot.slane %v3324_v11, 5 }
 0x1b3   : > { %v2549_v43 = vsel %vm5480_vm7, %v2547_v23, %v2548_v35  ;;  %v3964_v5 = vunpack.c.l.b16 %v3878_v63  ;;  %v5018_v63 = vld [vmem:[%s5294_s10 + $0x60] sm:$0xe] }
 0x1b4   : > { %v2385_v55 = vpop.f32.mrf.mxu0  ;;  %v3330_v58 = vrot.slane %v3328_v50, 4  ;;  %v3321_v11 = vor.u32 %v3320_v38, %v3317_v0 }
 0x1b5   : > { %v1731_v20 = vpop.f32.mrf.mxu3  ;;  %v1096_v53 = vpop.f32.mrf.mxu1 }
 0x1b6   : > { %v1775_v40 = vadd.f32 %v1731_v20, %v1488_v4  ;;  %v4807_v4 = vrot.slane %v4791_v41, 9  ;;  %v6197_v41 = vld [vmem:[%s5294_s10 + $0x68] sm:$0x1]  ;;  %v3331_v50 = vor.u32 %v3330_v58, %v6188_v19  ;;  %v3322_v23 = vrot.slane %v3321_v11, 4 }
 0x1b7   : > { %5049 = vmatmul.msk.bf16.gmra.mxu0 %vm749_vm4, %v3990_v17 }
 0x1b8   : > { %v1446_v30 = vpop.f32.mrf.mxu2  ;;  %4823 = vmatmul.msk.bf16.gmra.mxu1 %vm749_vm4, %v2652_v9  ;;  %v6186_v17 = vadd.f32 %v2385_v55, %v1775_v40  ;;  %v3881_v9 = vsel %vm5480_vm7, %v3879_v22, %v3880_v56  ;;  %v2546_v28 = vsel %vm5480_vm7, %v4807_v4, %v2545_v24  ;;  %v3593_v55 = vpack.c.b16 %v3567_v27, %v3566_v8  ;;  %v6205_v4 = vld [vmem:[%s5294_s10 + $0x70] sm:$0xf] }
 0x1b9   : > { %v1489_v61 = vadd.f32 %v1446_v30, %v1094_v16  ;;  %v3965_v52 = vunpack.c.l.b16 %v3881_v9  ;;  %v1097_v24 = vadd.f32 %v1096_v53, %v5645_v39  ;;  %v2627_v16 = vunpack.c.l.b16 %v2546_v28  ;;  %v4968_v30 = vld [vmem:[%s5294_s10 + $0x6c] sm:$0xf] }
 0x1ba   : > { %v2628_v22 = vunpack.c.l.b16 %v2549_v43  ;;  %v3334_v56 = vshll.u32 %v6197_v41, 16  ;;  %v3884_v39 = vrot.slane %v6165_v48, 5  ;;  %v3339_v38 = vshrl.u32 %v4968_v30, 16 }
 0x1bb   : > { %v3991_v8 = vpack.c.b16 %v3965_v52, %v3964_v5  ;;  %v3342_v58 = vshll.u32 %v4968_v30, 16  ;;  %v3348_v9 = vshll.u32 %v6205_v4, 16  ;;  %v3352_v28 = vshrl.u32 %v6205_v4, 16  ;;  %v5176_v52 = vld [vmem:[%s5294_s10 + $0x68] sm:$0x1] }
 0x1bc   : > { %v2387_v20 = vpop.f32.mrf.mxu0  ;;  %v3336_v27 = vrot.slane %v3334_v56, 5  ;;  %v2555_v11 = vrot.slane %v5176_v52, 5  ;;  %v3887_v48 = vrot.slane %v6197_v41, 5  ;;  %v3886_v56 = vrot.slane %v3884_v39, 4 }
 0x1bd   : > { %v1733_v10 = vpop.f32.mrf.mxu3  ;;  %4936 = vmatmul.msk.bf16.gmra.mxu2 %vm749_vm4, %v5101_v7  ;;  %v1098_v44 = vpop.f32.mrf.mxu1  ;;  %v2653_v7 = vpack.c.b16 %v2628_v22, %v2627_v16  ;;  %v3327_v16 = vsel %vm5306_vm3, %v3322_v23, %v6188_v19  ;;  %v3344_v30 = vrot.slane %v3342_v58, 5  ;;  %v3350_v41 = vrot.slane %v3348_v9, 5  ;;  %v6230_v23 = vld [vmem:[%s5294_s10 + $0x74] sm:$0x1] }
 0x1be   : > { %v1776_v40 = vadd.f32 %v1733_v10, %v1489_v61  ;;  %v3332_v61 = vrot.slane %v3331_v50, 4  ;;  %v3568_v52 = vunpack.c.l.b16 %v3327_v16 }
 0x1c0   : > { %v1449_v62 = vpop.f32.mrf.mxu2  ;;  %v6210_v53 = vadd.f32 %v2387_v20, %v1776_v40  ;;  %v4792_v20 = vld [vmem:[%s5294_s10 + $0x60] sm:$0xe]  ;;  %v1099_v40 = vadd.f32 %v1098_v44, %v5664_v6  ;;  %v3337_v22 = vsel %vm5306_vm3, %v3332_v61, %v3336_v27 }
 0x1c1   : > { %v1490_v35 = vadd.f32 %v1449_v62, %v1097_v24  ;;  %v5034_v24 = vrot.slane %v5018_v63, 9  ;;  %v3354_v63 = vrot.slane %v3352_v28, 4  ;;  %v3569_v19 = vunpack.c.l.b16 %v3337_v22 }
 0x1c2   : > { %5001 = vmatmul.msk.bf16.gmra.mxu3 %vm749_vm4, %v3593_v55  ;;  %6811 = vst [vmem:[#allocation4_spill] sm:$0xff] %v6210_v53  ;;  %v5175_v55 = vld [vmem:[%s5294_s10 + $0x64] sm:$0xf] }
 0x1c3   : > { %v2552_v5 = vrot.slane %v5175_v55, 5  ;;  %v4808_v55 = vrot.slane %v4792_v20, 9  ;;  %v3885_v61 = vsel %vm5480_vm7, %v5034_v24, %v3884_v39  ;;  %v3355_v28 = vor.u32 %v3354_v63, %v3350_v41 }
 0x1c4   : > { %v2390_v0 = vpop.f32.mrf.mxu0  ;;  %v3594_v24 = vpack.c.b16 %v3569_v19, %v3568_v52  ;;  %v3966_v20 = vunpack.c.l.b16 %v3885_v61 }
 0x1c5   : > { %v1736_v43 = vpop.f32.mrf.mxu3  ;;  %v1101_v10 = vpop.f32.mrf.mxu1  ;;  %v2554_v6 = vrot.slane %v2552_v5, 4 }
 0x1c6   : > { %v1777_v50 = vadd.f32 %v1736_v43, %v1490_v35  ;;  %v3341_v35 = vrot.slane %v3339_v38, 4 }
 0x1c7   : > { %5050 = vmatmul.msk.bf16.gmra.mxu0 %vm749_vm4, %v3991_v8  ;;  %v5102_v8 = vld [vmem:[%s5294_s10 + $0x60] sm:$0xff]  ;;  %v2556_v9 = vsel %vm5480_vm7, %v2554_v6, %v2555_v11  ;;  %v3891_v6 = vrot.slane %v6205_v4, 5 }
 0x1c8   : > { %v1451_v62 = vpop.f32.mrf.mxu2  ;;  %4824 = vmatmul.msk.bf16.gmra.mxu1 %vm749_vm4, %v2653_v7  ;;  %v6227_v44 = vadd.f32 %v2390_v0, %v1777_v50  ;;  %v3888_v7 = vsel %vm5480_vm7, %v3886_v56, %v3887_v48  ;;  %v3345_v27 = vor.u32 %v3344_v30, %v3341_v35  ;;  %v2553_v0 = vsel %vm5480_vm7, %v4808_v55, %v2552_v5  ;;  %v4971_v30 = vld [vmem:[%s5294_s10 + $0x78] sm:$0xf]  ;;  %v5019_v55 = vld [vmem:[%s5294_s10 + $0x6c] sm:$0xe] }
 0x1c9   : > { %v1491_v43 = vadd.f32 %v1451_v62, %v1099_v40  ;;  %v3358_v50 = vshll.u32 %v6230_v23, 16  ;;  %v1102_v48 = vadd.f32 %v1101_v10, %v5683_v45  ;;  %v3967_v40 = vunpack.c.l.b16 %v3888_v7 }
 0x1ca   : > { %v2629_v22 = vunpack.c.l.b16 %v2553_v0  ;;  %v2630_v56 = vunpack.c.l.b16 %v2556_v9  ;;  %v3346_v5 = vrot.slane %v3345_v27, 4  ;;  %v3356_v35 = vrot.slane %v3355_v28, 4  ;;  %v4793_v27 = vld [vmem:[%s5294_s10 + $0x6c] sm:$0xe] }
 0x1cb   : > { %v3360_v11 = vrot.slane %v3358_v50, 5  ;;  %v3992_v63 = vpack.c.b16 %v3967_v40, %v3966_v20  ;;  %v3363_v9 = vshrl.u32 %v4971_v30, 16  ;;  %v3366_v28 = vshll.u32 %v4971_v30, 16 }
 0x1cc   : > { %v2392_v53 = vpop.f32.mrf.mxu0  ;;  %v2654_v10 = vpack.c.b16 %v2630_v56, %v2629_v22  ;;  %v3351_v61 = vsel %vm5306_vm3, %v3346_v5, %v3350_v41  ;;  %v5035_v41 = vrot.slane %v5019_v55, 9  ;;  %v4809_v22 = vrot.slane %v4793_v27, 9  ;;  %v6271_v55 = vld [vmem:[%s5294_s10 + $0x80] sm:$0x1] }
 0x1cd   : > { %v1738_v38 = vpop.f32.mrf.mxu3  ;;  %4937 = vmatmul.msk.bf16.gmra.mxu2 %vm749_vm4, %v5102_v8  ;;  %v1103_v58 = vpop.f32.mrf.mxu1  ;;  %v3361_v7 = vsel %vm5306_vm3, %v3356_v35, %v3360_v11  ;;  %v3570_v20 = vunpack.c.l.b16 %v3351_v61  ;;  %v5178_v35 = vld [vmem:[%s5294_s10 + $0x74] sm:$0x1] }
 0x1ce   : > { %v1778_v39 = vadd.f32 %v1738_v38, %v1491_v43  ;;  %v6246_v43 = vld [vmem:[%s5294_s10 + $0x7c] sm:$0xf]  ;;  %v5177_v38 = vld [vmem:[%s5294_s10 + $0x70] sm:$0xf]  ;;  %v3571_v40 = vunpack.c.l.b16 %v3361_v7  ;;  %v2562_v11 = vrot.slane %v5178_v35, 5 }
 0x1cf   : > { %v2559_v0 = vrot.slane %v5177_v38, 5  ;;  %v3372_v50 = vshll.u32 %v6246_v43, 16  ;;  %v3376_v4 = vshrl.u32 %v6246_v43, 16 }
 0x1d0   : > { %v1454_v16 = vpop.f32.mrf.mxu2  ;;  %v6248_v8 = vadd.f32 %v2392_v53, %v1778_v39  ;;  %v1104_v39 = vadd.f32 %v1103_v58, %v5706_v12  ;;  %v3368_v12 = vrot.slane %v3366_v28, 5 }
 0x1d1   : > { %v1492_v62 = vadd.f32 %v1454_v16, %v1102_v48  ;;  %v3893_v16 = vrot.slane %v3891_v6, 4  ;;  %v2561_v5 = vrot.slane %v2559_v0, 4  ;;  %v6268_v58 = vrot.slane %v3372_v50, 5 }
 0x1d2   : > { %5002 = vmatmul.msk.bf16.gmra.mxu3 %vm749_vm4, %v3594_v24  ;;  %v3894_v24 = vrot.slane %v6230_v23, 5  ;;  %v3378_v23 = vrot.slane %v3376_v4, 4  ;;  %v2560_v38 = vsel %vm5480_vm7, %v4809_v22, %v2559_v0  ;;  %v3382_v50 = vshll.u32 %v6271_v55, 16 }
 0x1d4   : > { %v2395_v45 = vpop.f32.mrf.mxu0  ;;  %v3895_v61 = vsel %vm5480_vm7, %v3893_v16, %v3894_v24  ;;  %v4974_v24 = vld [vmem:[%s5294_s10 + $0x84] sm:$0xf]  ;;  %v6287_v16 = vld [vmem:[%s5294_s10 + $0x88] sm:$0xf] }
 0x1d5   : > { %v1741_v52 = vpop.f32.mrf.mxu3  ;;  %v1106_v19 = vpop.f32.mrf.mxu1  ;;  %v3387_v35 = vshrl.u32 %v4974_v24, 16 }
 0x1d6   : > { %v1779_v53 = vadd.f32 %v1741_v52, %v1492_v62  ;;  %v5103_v62 = vld [vmem:[%s5294_s10 + $0x6c] sm:$0xff]  ;;  %v1107_v4 = vadd.f32 %v1106_v19, %v5725_v59  ;;  %v3390_v59 = vshll.u32 %v4974_v24, 16  ;;  %v3396_v19 = vshll.u32 %v6287_v16, 16 }
 0x1d7   : > { %5051 = vmatmul.msk.bf16.gmra.mxu0 %vm749_vm4, %v3992_v63  ;;  %v3365_v63 = vrot.slane %v3363_v9, 4  ;;  %v2563_v9 = vsel %vm5480_vm7, %v2561_v5, %v2562_v11  ;;  %v5020_v5 = vld [vmem:[%s5294_s10 + $0x78] sm:$0xe] }
 0x1d8   : > { %v1456_v48 = vpop.f32.mrf.mxu2  ;;  %4825 = vmatmul.msk.bf16.gmra.mxu1 %vm749_vm4, %v2654_v10  ;;  %v6266_v30 = vadd.f32 %v2395_v45, %v1779_v53  ;;  %v3892_v10 = vsel %vm5480_vm7, %v5035_v41, %v3891_v6  ;;  %v3595_v45 = vpack.c.b16 %v3571_v40, %v3570_v20  ;;  %v3379_v6 = vor.u32 %v3378_v23, %v6268_v58 }
 0x1d9   : > { %v1493_v56 = vadd.f32 %v1456_v48, %v1104_v39  ;;  %v3369_v28 = vor.u32 %v3368_v12, %v3365_v63  ;;  %v3968_v39 = vunpack.c.l.b16 %v3892_v10  ;;  %v3969_v41 = vunpack.c.l.b16 %v3895_v61 }
 0x1da   : > { %v2631_v20 = vunpack.c.l.b16 %v2560_v38  ;;  %v2632_v40 = vunpack.c.l.b16 %v2563_v9  ;;  %v3400_v63 = vshrl.u32 %v6287_v16, 16  ;;  %v3898_v10 = vrot.slane %v6246_v43, 5  ;;  %v4794_v9 = vld [vmem:[%s5294_s10 + $0x78] sm:$0xe] }
 0x1db   : > { %v3370_v22 = vrot.slane %v3369_v28, 4  ;;  %v3993_v11 = vpack.c.b16 %v3969_v41, %v3968_v39  ;;  %v5036_v38 = vrot.slane %v5020_v5, 9  ;;  %v5179_v28 = vld [vmem:[%s5294_s10 + $0x7c] sm:$0xf]  ;;  %v3389_v43 = vrot.slane %v3387_v35, 4 }
 0x1dc   : > { %v2397_v52 = vpop.f32.mrf.mxu0  ;;  %v2655_v23 = vpack.c.b16 %v2632_v40, %v2631_v20  ;;  %v6305_v41 = vrot.slane %v3396_v19, 5  ;;  %v3402_v24 = vrot.slane %v3400_v63, 4  ;;  %v3900_v20 = vrot.slane %v3898_v10, 4  ;;  %v5180_v5 = vld [vmem:[%s5294_s10 + $0x80] sm:$0x1] }
 0x1dd   : > { %v1743_v7 = vpop.f32.mrf.mxu3  ;;  %4938 = vmatmul.msk.bf16.gmra.mxu2 %vm749_vm4, %v5103_v62  ;;  %v1108_v27 = vpop.f32.mrf.mxu1  ;;  %v3384_v62 = vrot.slane %v3382_v50, 5  ;;  %v3901_v40 = vrot.slane %v6271_v55, 5  ;;  %v2569_v35 = vrot.slane %v5180_v5, 5 }
 0x1de   : > { %v1780_v53 = vadd.f32 %v1743_v7, %v1493_v56  ;;  %v3380_v56 = vrot.slane %v3379_v6, 4  ;;  %v2566_v6 = vrot.slane %v5179_v28, 5  ;;  %v3403_v63 = vor.u32 %v3402_v24, %v6305_v41 }
 0x1e0   : > { %v1459_v48 = vpop.f32.mrf.mxu2  ;;  %v6294_v61 = vadd.f32 %v2397_v52, %v1780_v53  ;;  %v3385_v39 = vsel %vm5306_vm3, %v3380_v56, %v3384_v62  ;;  %v1109_v52 = vadd.f32 %v1108_v27, %v5742_v32  ;;  %v3392_v53 = vrot.slane %v3390_v59, 5  ;;  %v5104_v56 = vld [vmem:[%s5294_s10 + $0x78] sm:$0xff] }
 0x1e1   : > { %v1494_v0 = vadd.f32 %v1459_v48, %v1107_v4  ;;  %v3375_v4 = vsel %vm5306_vm3, %v3370_v22, %v6268_v58  ;;  %v4810_v58 = vrot.slane %v4794_v9, 9  ;;  %v2568_v62 = vrot.slane %v2566_v6, 4 }
 0x1e2   : > { %5003 = vmatmul.msk.bf16.gmra.mxu3 %vm749_vm4, %v3595_v45  ;;  %v3572_v32 = vunpack.c.l.b16 %v3375_v4  ;;  %v3573_v27 = vunpack.c.l.b16 %v3385_v39  ;;  %v3899_v59 = vsel %vm5480_vm7, %v5036_v38, %v3898_v10  ;;  %v3393_v19 = vor.u32 %v3392_v53, %v3389_v43 }
 0x1e3   : > { %v2567_v28 = vsel %vm5480_vm7, %v4810_v58, %v2566_v6  ;;  %v2570_v10 = vsel %vm5480_vm7, %v2568_v62, %v2569_v35  ;;  %v3970_v4 = vunpack.c.l.b16 %v3899_v59  ;;  %v3905_v6 = vrot.slane %v6287_v16, 5 }
 0x1e4   : > { %v2400_v12 = vpop.f32.mrf.mxu0  ;;  %v3394_v43 = vrot.slane %v3393_v19, 4 }
 0x1e5   : > { %v1746_v7 = vpop.f32.mrf.mxu3  ;;  %v2723_v45 = vpop.f32.mrf.mxu1  ;;  %v3907_v59 = vrot.slane %v3905_v6, 4 }
 0x1e6   : > { %v1781_v50 = vadd.f32 %v1746_v7, %v1494_v0  ;;  %v6310_v0 = vld [vmem:[%s5294_s10 + $0x8c] sm:$0x1]  ;;  %v3902_v7 = vsel %vm5480_vm7, %v3900_v20, %v3901_v40  ;;  %v2803_v24 = vadd.f32 %v2723_v45, %v5759_v46  ;;  %v2633_v20 = vunpack.c.l.b16 %v2567_v28 }
 0x1e7   : > { %5052 = vmatmul.msk.bf16.gmra.mxu0 %vm749_vm4, %v3993_v11  ;;  %v3406_v55 = vshll.u32 %v6310_v0, 16  ;;  %v3971_v39 = vunpack.c.l.b16 %v3902_v7  ;;  %v2634_v40 = vunpack.c.l.b16 %v2570_v10  ;;  %v3399_v5 = vsel %vm5306_vm3, %v3394_v43, %v6305_v41  ;;  %v4795_v7 = vld [vmem:[%s5294_s10 + $0x84] sm:$0xe] }
 0x1e8   : > { %v1461_v48 = vpop.f32.mrf.mxu2  ;;  %4826 = vmatmul.msk.bf16.gmra.mxu1 %vm749_vm4, %v2655_v23  ;;  %v6314_v11 = vadd.f32 %v2400_v12, %v1781_v50  ;;  %v3596_v50 = vpack.c.b16 %v3573_v27, %v3572_v32  ;;  %v6336_v32 = vld [vmem:[%s5294_s10 + $0x94] sm:$0xf]  ;;  %v3908_v19 = vrot.slane %v6310_v0, 5  ;;  %v3574_v0 = vunpack.c.l.b16 %v3399_v5 }
 0x1e9   : > { %v1495_v22 = vadd.f32 %v1461_v48, %v1109_v52  ;;  %v3404_v52 = vrot.slane %v3403_v63, 4  ;;  %v3408_v53 = vrot.slane %v3406_v55, 5  ;;  %v3994_v62 = vpack.c.b16 %v3971_v39, %v3970_v4 }
 0x1ea   : > { %v2656_v27 = vpack.c.b16 %v2634_v40, %v2633_v20  ;;  %v3424_v4 = vshrl.u32 %v6336_v32, 16  ;;  %v3909_v20 = vsel %vm5480_vm7, %v3907_v59, %v3908_v19  ;;  %v4811_v40 = vrot.slane %v4795_v7, 9  ;;  %v6379_v7 = vld [vmem:[%s5294_s10 + $0x98] sm:$0x1] }
 0x1eb   : > { %v3409_v16 = vsel %vm5306_vm3, %v3404_v52, %v3408_v53  ;;  %v6358_v53 = vld [vmem:[%s6802_s3] ss:$0 sm:$0xff] }
 0x1ec   : > { %v2402_v23 = vpop.f32.mrf.mxu0  ;;  %v3575_v39 = vunpack.c.l.b16 %v3409_v16 }
 0x1ed   : > { %v1748_v9 = vpop.f32.mrf.mxu3  ;;  %4939 = vmatmul.msk.bf16.gmra.mxu2 %vm749_vm4, %v5104_v56  ;;  %v2725_v12 = vpop.f32.mrf.mxu1  ;;  %v5021_v56 = vld [vmem:[%s5294_s10 + $0x84] sm:$0xe] }
 0x1ee   : > { %v1782_v38 = vadd.f32 %v1748_v9, %v1495_v22  ;;  %v4977_v22 = vld [vmem:[%s5294_s10 + $0x90] sm:$0xf]  ;;  %v5037_v35 = vrot.slane %v5021_v56, 9  ;;  %v5181_v9 = vld [vmem:[%s5294_s10 + $0x88] sm:$0xf] }
 0x1ef   : > { %v2573_v28 = vrot.slane %v5181_v9, 5  ;;  %v3411_v10 = vshrl.u32 %v4977_v22, 16  ;;  %v3414_v41 = vshll.u32 %v4977_v22, 16  ;;  %v5105_v56 = vld [vmem:[%s5294_s10 + $0x84] sm:$0xff] }
 0x1f0   : > { %v3010_v48 = vpop.f32.mrf.mxu2  ;;  %v6338_v46 = vadd.f32 %v2402_v23, %v1782_v38  ;;  %v6348_v23 = vld [vmem:[%s6801_s2] ss:$0 sm:$0xff]  ;;  %v3420_v38 = vshll.u32 %v6336_v32, 16  ;;  %v3906_v43 = vsel %vm5480_vm7, %v5037_v35, %v3905_v6  ;;  %v5182_v6 = vld [vmem:[%s5294_s10 + $0x8c] sm:$0x1] }
 0x1f1   : > { %v3090_v58 = vadd.f32 %v3010_v48, %v2803_v24  ;;  %v2804_v24 = vadd.f32 %v2725_v12, %v5772_v42  ;;  %v2576_v22 = vrot.slane %v5182_v6, 5  ;;  %v3416_v5 = vrot.slane %v3414_v41, 5  ;;  %v6370_v42 = vld [vmem:[%s6803_s4] ss:$0 sm:$0xff] }
 0x1f2   : > { %5004 = vmatmul.msk.bf16.gmra.mxu3 %vm749_vm4, %v3596_v50  ;;  %6812 = vst [vmem:[#allocation5_spill] sm:$0xff] %v6338_v46  ;;  %v3972_v19 = vunpack.c.l.b16 %v3906_v43  ;;  %v3973_v41 = vunpack.c.l.b16 %v3909_v20 }
 0x1f4   : > { %v4062_v45 = vpop.f32.mrf.mxu0  ;;  %v3995_v6 = vpack.c.b16 %v3973_v41, %v3972_v19 }
 0x1f5   : > { %v3664_v63 = vpop.f32.mrf.mxu3  ;;  %v2728_v55 = vpop.f32.mrf.mxu1 }
 0x1f6   : > { %v3744_v50 = vadd.f32 %v3664_v63, %v3090_v58  ;;  %v2575_v58 = vrot.slane %v2573_v28, 4  ;;  %v2574_v63 = vsel %vm5480_vm7, %v4811_v40, %v2573_v28  ;;  %v2805_v20 = vadd.f32 %v2728_v55, %v5785_v15 }
 0x1f7   : > { %5053 = vmatmul.msk.bf16.gmra.mxu0 %vm749_vm4, %v3994_v62  ;;  %v3413_v62 = vrot.slane %v3411_v10, 4  ;;  %v3597_v10 = vpack.c.b16 %v3575_v39, %v3574_v0  ;;  %v2635_v39 = vunpack.c.l.b16 %v2574_v63  ;;  %v3912_v15 = vrot.slane %v6336_v32, 5 }
 0x1f8   : > { %v4142_v52 = vadd.f32 %v4062_v45, %v3744_v50  ;;  %v3012_v48 = vpop.f32.mrf.mxu2  ;;  %4827 = vmatmul.msk.bf16.gmra.mxu1 %vm749_vm4, %v2656_v27  ;;  %v6372_v45 = vrot.slane %v3420_v38, 5  ;;  %v3426_v27 = vrot.slane %v3424_v4, 4  ;;  %v2577_v38 = vsel %vm5480_vm7, %v2575_v58, %v2576_v22  ;;  %v4980_v58 = vld [vmem:[%s5294_s10 + $0x9c] sm:$0xf]  ;;  %v5022_v22 = vld [vmem:[%s5294_s10 + $0x90] sm:$0xe] }
 0x1f9   : > { %v3091_v12 = vadd.f32 %v3012_v48, %v2804_v24  ;;  %v3417_v4 = vor.u32 %v3416_v5, %v3413_v62  ;;  %v3435_v55 = vshrl.u32 %v4980_v58, 16  ;;  %v5038_v41 = vrot.slane %v5022_v22, 9 }
 0x1fa   : > { %v4178_v35 = vmul.f32 %v6348_v23, %v4142_v52  ;;  %v3427_v0 = vor.u32 %v3426_v27, %v6372_v45  ;;  %v3430_v52 = vshll.u32 %v6379_v7, 16  ;;  %v6400_v27 = vld [vmem:[%s5294_s10 + $0xa0] sm:$0xf] }
 0x1fc   : > { %v4214_v16 = vadd.f32 %v6358_v53, %v4178_v35  ;;  %v4064_v59 = vpop.f32.mrf.mxu0  ;;  %v3418_v35 = vrot.slane %v3417_v4, 4 }
 0x1fd   : > { %v3666_v9 = vpop.f32.mrf.mxu3  ;;  %4940 = vmatmul.msk.bf16.gmra.mxu2 %vm749_vm4, %v5105_v56  ;;  %v2730_v50 = vpop.f32.mrf.mxu1  ;;  %v2636_v56 = vunpack.c.l.b16 %v2577_v38 }
 0x1fe   : > { %vm4246_vm9 = vcmp.ge.f32.partialorder %v4214_v16, 0.0  ;;  %v4282_v28 = vmul.f32 %v6370_v42, %v4214_v16  ;;  %v3745_v43 = vadd.f32 %v3666_v9, %v3091_v12  ;;  %v3428_v12 = vrot.slane %v3427_v0, 4 }
 0x1ff   : > { %v2657_v9 = vpack.c.b16 %v2636_v56, %v2635_v39  ;;  %v3444_v0 = vshll.u32 %v6400_v27, 16  ;;  %v3423_v39 = vsel %vm5306_vm3, %v3418_v35, %v6372_v45  ;;  %v5106_v45 = vld [vmem:[%s5294_s10 + $0x90] sm:$0xff] }
 0x200   : > { %v4314_v24 = vsel %vm4246_vm9, %v4214_v16, %v4282_v28  ;;  %v4143_v48 = vadd.f32 %v4064_v59, %v3745_v43  ;;  %v3015_v40 = vpop.f32.mrf.mxu2  ;;  %v3432_v16 = vrot.slane %v3430_v52, 5  ;;  %v3438_v59 = vshll.u32 %v4980_v58, 16  ;;  %v4796_v43 = vld [vmem:[%s5294_s10 + $0x90] sm:$0xe] }
 0x201   : > { %4347 = vst.msk [vmem:[%s6387_s6] sm:$0xff] %vm4346_vm8, %v4314_v24  ;;  %v3092_v5 = vadd.f32 %v3015_v40, %v2805_v20  ;;  %v5183_v24 = vld [vmem:[%s5294_s10 + $0x94] sm:$0xf]  ;;  %v3448_v52 = vshrl.u32 %v6400_v27, 16  ;;  %v3914_v20 = vrot.slane %v3912_v15, 4  ;;  %v3437_v40 = vrot.slane %v3435_v55, 4 }
 0x202   : > { %v4179_v62 = vmul.f32 %v6348_v23, %v4143_v48  ;;  %5005 = vmatmul.msk.bf16.gmra.mxu3 %vm749_vm4, %v3597_v10  ;;  %v3915_v10 = vrot.slane %v6379_v7, 5  ;;  %v2580_v4 = vrot.slane %v5183_v24, 5  ;;  %v3433_v7 = vsel %vm5306_vm3, %v3428_v12, %v3432_v16 }
 0x203   : > { %v3440_v56 = vrot.slane %v3438_v59, 5  ;;  %v6422_v46 = vrot.slane %v3444_v0, 5  ;;  %v3450_v12 = vrot.slane %v3448_v52, 4  ;;  %v3576_v59 = vunpack.c.l.b16 %v3423_v39 }
 0x204   : > { %v4215_v63 = vadd.f32 %v6358_v53, %v4179_v62  ;;  %v4067_v19 = vpop.f32.mrf.mxu0  ;;  %v2806_v62 = vadd.f32 %v2730_v50, %v5798_v13  ;;  %v2582_v35 = vrot.slane %v2580_v4, 4 }
 0x205   : > { %v3669_v38 = vpop.f32.mrf.mxu3  ;;  %v2733_v28 = vpop.f32.mrf.mxu1  ;;  %v3441_v13 = vor.u32 %v3440_v56, %v3437_v40 }
 0x206   : > { %vm4247_vm10 = vcmp.ge.f32.partialorder %v4215_v63, 0.0  ;;  %v4283_v32 = vmul.f32 %v6370_v42, %v4215_v63  ;;  %v3746_v48 = vadd.f32 %v3669_v38, %v3092_v5  ;;  %v4812_v5 = vrot.slane %v4796_v43, 9 }
 0x207   : > { %5054 = vmatmul.msk.bf16.gmra.mxu0 %vm749_vm4, %v3995_v6  ;;  %v5184_v6 = vld [vmem:[%s5294_s10 + $0x98] sm:$0x1]  ;;  %v3913_v43 = vsel %vm5480_vm7, %v5038_v41, %v3912_v15 }
 0x208   : > { %v4315_v58 = vsel %vm4247_vm10, %v4215_v63, %v4283_v32  ;;  %v4144_v22 = vadd.f32 %v4067_v19, %v3746_v48  ;;  %v3017_v24 = vpop.f32.mrf.mxu2  ;;  %4828 = vmatmul.msk.bf16.gmra.mxu1 %vm749_vm4, %v2657_v9  ;;  %v2583_v38 = vrot.slane %v5184_v6, 5  ;;  %v3577_v63 = vunpack.c.l.b16 %v3433_v7  ;;  %v6426_v19 = vld [vmem:[%s5294_s10 + $0xa4] sm:$0x1] }
 0x209   : > { %4348 = vst.msk [vmem:[%s6387_s6 + $0x8] sm:$0xff] %vm4346_vm8, %v4315_v58  ;;  %v3093_v55 = vadd.f32 %v3017_v24, %v2806_v62  ;;  %v3916_v32 = vsel %vm5480_vm7, %v3914_v20, %v3915_v10  ;;  %v2581_v0 = vsel %vm5480_vm7, %v4812_v5, %v2580_v4  ;;  %v3451_v7 = vor.u32 %v3450_v12, %v6422_v46 }
 0x20a   : > { %v4180_v16 = vmul.f32 %v6348_v23, %v4144_v22  ;;  %v2584_v39 = vsel %vm5480_vm7, %v2582_v35, %v2583_v38  ;;  %v3454_v40 = vshll.u32 %v6426_v19, 16  ;;  %v3598_v10 = vpack.c.b16 %v3577_v63, %v3576_v59  ;;  %v4983_v35 = vld [vmem:[%s5294_s10 + $0xa8] sm:$0xf]  ;;  %v5023_v63 = vld [vmem:[%s5294_s10 + $0x9c] sm:$0xe] }
 0x20b   : > { %v3974_v20 = vunpack.c.l.b16 %v3913_v43  ;;  %v3975_v4 = vunpack.c.l.b16 %v3916_v32  ;;  %v2637_v56 = vunpack.c.l.b16 %v2581_v0  ;;  %v3442_v58 = vrot.slane %v3441_v13, 4 }
 0x20c   : > { %v4216_v50 = vadd.f32 %v6358_v53, %v4180_v16  ;;  %v4069_v9 = vpop.f32.mrf.mxu0  ;;  %v2807_v24 = vadd.f32 %v2733_v28, %v5811_v57  ;;  %v3452_v6 = vrot.slane %v3451_v7, 4  ;;  %v3456_v38 = vrot.slane %v3454_v40, 5  ;;  %v4797_v7 = vld [vmem:[%s5294_s10 + $0x9c] sm:$0xe]  ;;  %v5185_v40 = vld [vmem:[%s5294_s10 + $0xa0] sm:$0xf] }
 0x20d   : > { %v3671_v52 = vpop.f32.mrf.mxu3  ;;  %4941 = vmatmul.msk.bf16.gmra.mxu2 %vm749_vm4, %v5106_v45  ;;  %v2735_v48 = vpop.f32.mrf.mxu1  ;;  %v2638_v45 = vunpack.c.l.b16 %v2584_v39  ;;  %v3996_v59 = vpack.c.b16 %v3975_v4, %v3974_v20  ;;  %v3919_v57 = vrot.slane %v6400_v27, 5  ;;  %v3459_v28 = vshrl.u32 %v4983_v35, 16 }
 0x20e   : > { %vm4248_vm11 = vcmp.ge.f32.partialorder %v4216_v50, 0.0  ;;  %v4284_v15 = vmul.f32 %v6370_v42, %v4216_v50  ;;  %v3747_v41 = vadd.f32 %v3671_v52, %v3093_v55  ;;  %v6448_v55 = vld [vmem:[%s5294_s10 + $0xac] sm:$0xf]  ;;  %v3462_v13 = vshll.u32 %v4983_v35, 16 }
 0x20f   : > { %v2658_v43 = vpack.c.b16 %v2638_v45, %v2637_v56  ;;  %v3447_v32 = vsel %vm5306_vm3, %v3442_v58, %v6422_v46  ;;  %v3457_v39 = vsel %vm5306_vm3, %v3452_v6, %v3456_v38  ;;  %v3468_v27 = vshll.u32 %v6448_v55, 16  ;;  %v5107_v6 = vld [vmem:[%s5294_s10 + $0x9c] sm:$0xff] }
 0x210   : > { %v4316_v22 = vsel %vm4248_vm11, %v4216_v50, %v4284_v15  ;;  %v4145_v62 = vadd.f32 %v4069_v9, %v3747_v41  ;;  %v3020_v5 = vpop.f32.mrf.mxu2  ;;  %v2587_v15 = vrot.slane %v5185_v40, 5  ;;  %v3472_v41 = vshrl.u32 %v6448_v55, 16 }
 0x211   : > { %4349 = vst.msk [vmem:[%s6387_s6 + $0x10] sm:$0xff] %vm4346_vm8, %v4316_v22  ;;  %v3094_v16 = vadd.f32 %v3020_v5, %v2807_v24  ;;  %v5039_v46 = vrot.slane %v5023_v63, 9  ;;  %v3921_v4 = vrot.slane %v3919_v57, 4  ;;  %v3922_v56 = vrot.slane %v6426_v19, 5 }
 0x212   : > { %v4181_v12 = vmul.f32 %v6348_v23, %v4145_v62  ;;  %5006 = vmatmul.msk.bf16.gmra.mxu3 %vm749_vm4, %v3598_v10  ;;  %v3461_v58 = vrot.slane %v3459_v28, 4  ;;  %v3464_v22 = vrot.slane %v3462_v13, 5  ;;  %v2808_v5 = vadd.f32 %v2735_v48, %v5824_v54 }
 0x213   : > { %v4813_v35 = vrot.slane %v4797_v7, 9  ;;  %v2589_v38 = vrot.slane %v2587_v15, 4  ;;  %v3474_v19 = vrot.slane %v3472_v41, 4  ;;  %v3578_v13 = vunpack.c.l.b16 %v3447_v32 }
 0x214   : > { %v4217_v50 = vadd.f32 %v6358_v53, %v4181_v12  ;;  %v4072_v9 = vpop.f32.mrf.mxu0  ;;  %v5186_v12 = vld [vmem:[%s5294_s10 + $0xa4] sm:$0x1]  ;;  %v3465_v54 = vor.u32 %v3464_v22, %v3461_v58  ;;  %v3923_v7 = vsel %vm5480_vm7, %v3921_v4, %v3922_v56 }
 0x215   : > { %v3674_v0 = vpop.f32.mrf.mxu3  ;;  %v2738_v52 = vpop.f32.mrf.mxu1  ;;  %v2588_v40 = vsel %vm5480_vm7, %v4813_v35, %v2587_v15  ;;  %v3977_v15 = vunpack.c.l.b16 %v3923_v7  ;;  %v4986_v35 = vld [vmem:[%s5294_s10 + $0xb4] sm:$0xf] }
 0x216   : > { %vm4249_vm12 = vcmp.ge.f32.partialorder %v4217_v50, 0.0  ;;  %v4285_v10 = vmul.f32 %v6370_v42, %v4217_v50  ;;  %v3748_v20 = vadd.f32 %v3674_v0, %v3094_v16  ;;  %v2590_v16 = vrot.slane %v5186_v12, 5 }
 0x217   : > { %5055 = vmatmul.msk.bf16.gmra.mxu0 %vm749_vm4, %v3996_v59  ;;  %v6471_v59 = vrot.slane %v3468_v27, 5  ;;  %v3920_v0 = vsel %vm5480_vm7, %v5039_v46, %v3919_v57  ;;  %v2639_v56 = vunpack.c.l.b16 %v2588_v40  ;;  %v3466_v58 = vrot.slane %v3465_v54, 4 }
 0x218   : > { %v4317_v62 = vsel %vm4249_vm12, %v4217_v50, %v4285_v10  ;;  %v4146_v24 = vadd.f32 %v4072_v9, %v3748_v20  ;;  %v3022_v45 = vpop.f32.mrf.mxu2  ;;  %4829 = vmatmul.msk.bf16.gmra.mxu1 %vm749_vm4, %v2658_v43  ;;  %v3579_v50 = vunpack.c.l.b16 %v3457_v39  ;;  %v6475_v9 = vld [vmem:[%s5294_s10 + $0xb0] sm:$0x1]  ;;  %v2591_v39 = vsel %vm5480_vm7, %v2589_v38, %v2590_v16 }
 0x219   : > { %4350 = vst.msk [vmem:[%s6387_s6 + $0x18] sm:$0xff] %vm4346_vm8, %v4317_v62  ;;  %v3095_v28 = vadd.f32 %v3022_v45, %v2808_v5  ;;  %v3475_v41 = vor.u32 %v3474_v19, %v6471_v59  ;;  %v3478_v10 = vshll.u32 %v6475_v9, 16  ;;  %v3976_v4 = vunpack.c.l.b16 %v3920_v0  ;;  %v6497_v19 = vld [vmem:[%s5294_s10 + $0xb8] sm:$0xf] }
 0x21a   : > { %v4182_v63 = vmul.f32 %v6348_v23, %v4146_v24  ;;  %v3599_v46 = vpack.c.b16 %v3579_v50, %v3578_v13  ;;  %v2809_v24 = vadd.f32 %v2738_v52, %v5837_v33  ;;  %v2640_v45 = vunpack.c.l.b16 %v2591_v39  ;;  %v5187_v39 = vld [vmem:[%s5294_s10 + $0xac] sm:$0xf] }
 0x21b   : > { %v3480_v38 = vrot.slane %v3478_v10, 5  ;;  %v3926_v33 = vrot.slane %v6448_v55, 5  ;;  %v3483_v52 = vshrl.u32 %v4986_v35, 16  ;;  %v3486_v13 = vshll.u32 %v4986_v35, 16 }
 0x21c   : > { %v4218_v48 = vadd.f32 %v6358_v53, %v4182_v63  ;;  %v4074_v43 = vpop.f32.mrf.mxu0  ;;  %v3997_v63 = vpack.c.b16 %v3977_v15, %v3976_v4  ;;  %v3492_v55 = vshll.u32 %v6497_v19, 16  ;;  %v3496_v10 = vshrl.u32 %v6497_v19, 16 }
 0x21d   : > { %v3676_v27 = vpop.f32.mrf.mxu3  ;;  %4942 = vmatmul.msk.bf16.gmra.mxu2 %vm749_vm4, %v5107_v6  ;;  %v2740_v32 = vpop.f32.mrf.mxu1  ;;  %v3476_v6 = vrot.slane %v3475_v41, 4  ;;  %v2594_v41 = vrot.slane %v5187_v39, 5  ;;  %v3929_v4 = vrot.slane %v6475_v9, 5  ;;  %v3485_v15 = vrot.slane %v3483_v52, 4 }
 0x21e   : > { %vm4250_vm13 = vcmp.ge.f32.partialorder %v4218_v48, 0.0  ;;  %v4286_v57 = vmul.f32 %v6370_v42, %v4218_v48  ;;  %v3749_v20 = vadd.f32 %v3676_v27, %v3095_v28  ;;  %v5024_v28 = vld [vmem:[%s5294_s10 + $0xa8] sm:$0xe]  ;;  %v3498_v9 = vrot.slane %v3496_v10, 4 }
 0x21f   : > { %v3481_v40 = vsel %vm5306_vm3, %v3476_v6, %v3480_v38  ;;  %v4798_v27 = vld [vmem:[%s5294_s10 + $0xa8] sm:$0xe]  ;;  %v2596_v35 = vrot.slane %v2594_v41, 4  ;;  %v5188_v6 = vld [vmem:[%s5294_s10 + $0xb0] sm:$0x1] }
 0x220   : > { %v4318_v22 = vsel %vm4250_vm13, %v4218_v48, %v4286_v57  ;;  %v4147_v62 = vadd.f32 %v4074_v43, %v3749_v20  ;;  %v3025_v5 = vpop.f32.mrf.mxu2  ;;  %v2659_v48 = vpack.c.b16 %v2640_v45, %v2639_v56  ;;  %v3471_v43 = vsel %vm5306_vm3, %v3466_v58, %v6471_v59  ;;  %v5108_v45 = vld [vmem:[%s5294_s10 + $0xa8] sm:$0xff] }
 0x221   : > { %4351 = vst.msk [vmem:[%s6387_s6 + $0x20] sm:$0xff] %vm4346_vm8, %v4318_v22  ;;  %v3096_v16 = vadd.f32 %v3025_v5, %v2809_v24  ;;  %v5040_v59 = vrot.slane %v5024_v28, 9  ;;  %v3488_v56 = vrot.slane %v3486_v13, 5  ;;  %v4814_v5 = vrot.slane %v4798_v27, 9  ;;  %v6524_v13 = vld [vmem:[%s5294_s10 + $0xbc] sm:$0x1] }
 0x222   : > { %v4183_v12 = vmul.f32 %v6348_v23, %v4147_v62  ;;  %5007 = vmatmul.msk.bf16.gmra.mxu3 %vm749_vm4, %v3599_v46  ;;  %v3928_v46 = vrot.slane %v3926_v33, 4  ;;  %v2810_v62 = vadd.f32 %v2740_v32, %v5850_v31  ;;  %v2597_v38 = vrot.slane %v5188_v6, 5  ;;  %v6546_v6 = vld [vmem:[%s5294_s10 + $0xc4] sm:$0xf] }
 0x223   : > { %v3580_v28 = vunpack.c.l.b16 %v3471_v43  ;;  %v3581_v52 = vunpack.c.l.b16 %v3481_v40  ;;  %v3489_v31 = vor.u32 %v3488_v56, %v3485_v15 }
 0x224   : > { %v4219_v50 = vadd.f32 %v6358_v53, %v4183_v12  ;;  %v4077_v54 = vpop.f32.mrf.mxu0  ;;  %v6520_v12 = vrot.slane %v3492_v55, 5  ;;  %v2598_v40 = vsel %vm5480_vm7, %v2596_v35, %v2597_v38  ;;  %v3502_v55 = vshll.u32 %v6524_v13, 16 }
 0x225   : > { %v3679_v0 = vpop.f32.mrf.mxu3  ;;  %v2743_v7 = vpop.f32.mrf.mxu1 }
 0x226   : > { %vm4251_vm14 = vcmp.ge.f32.partialorder %v4219_v50, 0.0  ;;  %v4287_v57 = vmul.f32 %v6370_v42, %v4219_v50  ;;  %v3750_v20 = vadd.f32 %v3679_v0, %v3096_v16  ;;  %v2595_v0 = vsel %vm5480_vm7, %v4814_v5, %v2594_v41 }
 0x227   : > { %5056 = vmatmul.msk.bf16.gmra.mxu0 %vm749_vm4, %v3997_v63  ;;  %v3499_v39 = vor.u32 %v3498_v9, %v6520_v12  ;;  %v2811_v56 = vadd.f32 %v2743_v7, %v5863_v1  ;;  %v3504_v5 = vrot.slane %v3502_v55, 5  ;;  %v5025_v9 = vld [vmem:[%s5294_s10 + $0xb4] sm:$0xe]  ;;  %v3933_v1 = vrot.slane %v6497_v19, 5 }
 0x228   : > { %v4319_v58 = vsel %vm4251_vm14, %v4219_v50, %v4287_v57  ;;  %v4148_v22 = vadd.f32 %v4077_v54, %v3750_v20  ;;  %v3027_v24 = vpop.f32.mrf.mxu2  ;;  %4830 = vmatmul.msk.bf16.gmra.mxu1 %vm749_vm4, %v2659_v48  ;;  %v3927_v54 = vsel %vm5480_vm7, %v5040_v59, %v3926_v33  ;;  %v3930_v48 = vsel %vm5480_vm7, %v3928_v46, %v3929_v4 }
 0x229   : > { %4352 = vst.msk [vmem:[%s6387_s6 + $0x28] sm:$0xff] %vm4346_vm8, %v4319_v58  ;;  %v3097_v63 = vadd.f32 %v3027_v24, %v2810_v62  ;;  %v3600_v57 = vpack.c.b16 %v3581_v52, %v3580_v28  ;;  %v3978_v20 = vunpack.c.l.b16 %v3927_v54  ;;  %v3979_v41 = vunpack.c.l.b16 %v3930_v48  ;;  %v4989_v62 = vld [vmem:[%s5294_s10 + $0xc0] sm:$0xf]  ;;  %v4799_v48 = vld [vmem:[%s5294_s10 + $0xb4] sm:$0xe] }
 0x22a   : > { %v4184_v16 = vmul.f32 %v6348_v23, %v4148_v22  ;;  %v2641_v59 = vunpack.c.l.b16 %v2595_v0  ;;  %v3490_v46 = vrot.slane %v3489_v31, 4  ;;  %v2642_v22 = vunpack.c.l.b16 %v2598_v40  ;;  %v5189_v0 = vld [vmem:[%s5294_s10 + $0xb8] sm:$0xf] }
 0x22b   : > { %v3500_v24 = vrot.slane %v3499_v39, 4  ;;  %v3998_v38 = vpack.c.b16 %v3979_v41, %v3978_v20  ;;  %v3507_v7 = vshrl.u32 %v4989_v62, 16  ;;  %v3516_v19 = vshll.u32 %v6546_v6, 16 }
 0x22c   : > { %v4220_v32 = vadd.f32 %v6358_v53, %v4184_v16  ;;  %v4079_v50 = vpop.f32.mrf.mxu0  ;;  %v3510_v16 = vshll.u32 %v4989_v62, 16  ;;  %v2660_v52 = vpack.c.b16 %v2642_v22, %v2641_v59  ;;  %v3495_v31 = vsel %vm5306_vm3, %v3490_v46, %v6520_v12  ;;  %v5190_v22 = vld [vmem:[%s5294_s10 + $0xbc] sm:$0x1] }
 0x22d   : > { %v3681_v27 = vpop.f32.mrf.mxu3  ;;  %4943 = vmatmul.msk.bf16.gmra.mxu2 %vm749_vm4, %v5108_v45  ;;  %v2745_v43 = vpop.f32.mrf.mxu1  ;;  %v3505_v54 = vsel %vm5306_vm3, %v3500_v24, %v3504_v5  ;;  %v3520_v40 = vshrl.u32 %v6546_v6, 16  ;;  %v5041_v12 = vrot.slane %v5025_v9, 9  ;;  %v2604_v62 = vrot.slane %v5190_v22, 5  ;;  %v6573_v9 = vld [vmem:[%s5294_s10 + $0xc8] sm:$0x1] }
 0x22e   : > { %vm4252_vm15 = vcmp.ge.f32.partialorder %v4220_v32, 0.0  ;;  %v4288_v33 = vmul.f32 %v6370_v42, %v4220_v32  ;;  %v3751_v10 = vadd.f32 %v3681_v27, %v3097_v63  ;;  %v2601_v27 = vrot.slane %v5189_v0, 5 }
 0x22f   : > { %v3512_v20 = vrot.slane %v3510_v16, 5  ;;  %v2812_v46 = vadd.f32 %v2745_v43, %v5877_v25  ;;  %v6569_v24 = vrot.slane %v3516_v19, 5  ;;  %v3934_v16 = vsel %vm5480_vm7, %v5041_v12, %v3933_v1 }
 0x230   : > { %v4320_v4 = vsel %vm4252_vm15, %v4220_v32, %v4288_v33  ;;  %v4149_v15 = vadd.f32 %v4079_v50, %v3751_v10  ;;  %v3030_v58 = vpop.f32.mrf.mxu2  ;;  %v3935_v33 = vrot.slane %v3933_v1, 4  ;;  %v3936_v10 = vrot.slane %v6524_v13, 5 }
 0x231   : > { %4353 = vst.msk [vmem:[%s6387_s6 + $0x30] sm:$0xff] %vm4346_vm8, %v4320_v4  ;;  %v3098_v35 = vadd.f32 %v3030_v58, %v2811_v56  ;;  %v5109_v56 = vld [vmem:[%s5294_s10 + $0xb4] sm:$0xff]  ;;  %v2603_v58 = vrot.slane %v2601_v27, 4  ;;  %v3522_v13 = vrot.slane %v3520_v40, 4  ;;  %v3980_v40 = vunpack.c.l.b16 %v3934_v16  ;;  %v4800_v16 = vld [vmem:[%s5294_s10 + $0xc0] sm:$0xe] }
 0x232   : > { %v4185_v45 = vmul.f32 %v6348_v23, %v4149_v15  ;;  %5008 = vmatmul.msk.bf16.gmra.mxu3 %vm749_vm4, %v3600_v57  ;;  %v3509_v57 = vrot.slane %v3507_v7, 4  ;;  %v4815_v15 = vrot.slane %v4799_v48, 9  ;;  %v3526_v48 = vshll.u32 %v6573_v9, 16 }
 0x234   : > { %v4221_v63 = vadd.f32 %v6358_v53, %v4185_v45  ;;  %v4082_v28 = vpop.f32.mrf.mxu0  ;;  %v3513_v25 = vor.u32 %v3512_v20, %v3509_v57 }
 0x235   : > { %v3684_v32 = vpop.f32.mrf.mxu3  ;;  %v2748_v50 = vpop.f32.mrf.mxu1 }
 0x236   : > { %vm4253_vm0 = vcmp.ge.f32.partialorder %v4221_v63, 0.0  ;;  %v4289_v39 = vmul.f32 %v6370_v42, %v4221_v63  ;;  %v3752_v55 = vadd.f32 %v3684_v32, %v3098_v35  ;;  %v3582_v35 = vunpack.c.l.b16 %v3495_v31 }
 0x237   : > { %5057 = vmatmul.msk.bf16.gmra.mxu0 %vm749_vm4, %v3998_v38  ;;  %v3583_v38 = vunpack.c.l.b16 %v3505_v54  ;;  %v2605_v32 = vsel %vm5480_vm7, %v2603_v58, %v2604_v62  ;;  %v3523_v54 = vor.u32 %v3522_v13, %v6569_v24  ;;  %v3940_v58 = vrot.slane %v6546_v6, 5 }
 0x238   : > { %v4321_v41 = vsel %vm4253_vm0, %v4221_v63, %v4289_v39  ;;  %v4150_v59 = vadd.f32 %v4082_v28, %v3752_v55  ;;  %v3032_v4 = vpop.f32.mrf.mxu2  ;;  %4831 = vmatmul.msk.bf16.gmra.mxu1 %vm749_vm4, %v2660_v52  ;;  %v3937_v63 = vsel %vm5480_vm7, %v3935_v33, %v3936_v10  ;;  %v2602_v28 = vsel %vm5480_vm7, %v4815_v15, %v2601_v27  ;;  %v6813_v10 = vld [vmem:[#allocation2_spill] sm:$0xff] }
 0x239   : > { %4354 = vst.msk [vmem:[%s6387_s6 + $0x38] sm:$0xff] %vm4346_vm8, %v4321_v41  ;;  %v3099_v45 = vadd.f32 %v3032_v4, %v2812_v46  ;;  %v3601_v19 = vpack.c.b16 %v3583_v38, %v3582_v35  ;;  %v3981_v27 = vunpack.c.l.b16 %v3937_v63  ;;  %v2643_v39 = vunpack.c.l.b16 %v2602_v28  ;;  %v6601_v35 = vld [vmem:[%s5294_s10 + $0xd0] sm:$0xf]  ;;  %v5191_v63 = vld [vmem:[%s5294_s10 + $0xc4] sm:$0xf] }
 0x23a   : > { %v4186_v5 = vmul.f32 %v6348_v23, %v4150_v59  ;;  %v3514_v55 = vrot.slane %v3513_v25, 4  ;;  %v2813_v57 = vadd.f32 %v2748_v50, %v6813_v10  ;;  %v2644_v41 = vunpack.c.l.b16 %v2605_v32 }
 0x23b   : > { %v3524_v59 = vrot.slane %v3523_v54, 4  ;;  %v3528_v46 = vrot.slane %v3526_v48, 5  ;;  %v3999_v22 = vpack.c.b16 %v3981_v27, %v3980_v40  ;;  %v3943_v6 = vrot.slane %v6573_v9, 5 }
 0x23c   : > { %v4222_v43 = vadd.f32 %v6358_v53, %v4186_v5  ;;  %v4084_v7 = vpop.f32.mrf.mxu0  ;;  %v2661_v13 = vpack.c.b16 %v2644_v41, %v2643_v39  ;;  %v3519_v5 = vsel %vm5306_vm3, %v3514_v55, %v6569_v24  ;;  %v2608_v28 = vrot.slane %v5191_v63, 5  ;;  %v5110_v55 = vld [vmem:[%s5294_s10 + $0xc0] sm:$0xff] }
 0x23d   : > { %v3686_v52 = vpop.f32.mrf.mxu3  ;;  %4944 = vmatmul.msk.bf16.gmra.mxu2 %vm749_vm4, %v5109_v56  ;;  %v2750_v31 = vpop.f32.mrf.mxu1  ;;  %v5026_v56 = vld [vmem:[%s5294_s10 + $0xc0] sm:$0xe]  ;;  %v3942_v32 = vrot.slane %v3940_v58, 4  ;;  %v4816_v39 = vrot.slane %v4800_v16, 9 }
 0x23e   : > { %vm4254_vm1 = vcmp.ge.f32.partialorder %v4222_v43, 0.0  ;;  %v4290_v1 = vmul.f32 %v6370_v42, %v4222_v43  ;;  %v3753_v0 = vadd.f32 %v3686_v52, %v3099_v45  ;;  %v4992_v45 = vld [vmem:[%s5294_s10 + $0xcc] sm:$0xf]  ;;  %v2814_v40 = vadd.f32 %v2750_v31, %v5924_v47 }
 0x23f   : > { %v3531_v54 = vshrl.u32 %v4992_v45, 16  ;;  %v3534_v48 = vshll.u32 %v4992_v45, 16  ;;  %v2610_v10 = vrot.slane %v2608_v28, 4  ;;  %v3944_v47 = vsel %vm5480_vm7, %v3942_v32, %v3943_v6 }
 0x240   : > { %v4322_v12 = vsel %vm4254_vm1, %v4222_v43, %v4290_v1  ;;  %v4151_v33 = vadd.f32 %v4084_v7, %v3753_v0  ;;  %v3035_v20 = vpop.f32.mrf.mxu2  ;;  %v3529_v43 = vsel %vm5306_vm3, %v3524_v59, %v3528_v46  ;;  %v5042_v7 = vrot.slane %v5026_v56, 9 }
 0x241   : > { %4355 = vst.msk [vmem:[%s6387_s6 + $0x40] sm:$0xff] %vm4346_vm8, %v4322_v12  ;;  %v3100_v15 = vadd.f32 %v3035_v20, %v2813_v57  ;;  %v3540_v1 = vshll.u32 %v6601_v35, 16  ;;  %v3544_v0 = vshrl.u32 %v6601_v35, 16  ;;  %v3584_v12 = vunpack.c.l.b16 %v3519_v5  ;;  %v5192_v57 = vld [vmem:[%s5294_s10 + $0xc8] sm:$0x1] }
 0x242   : > { %v4187_v4 = vmul.f32 %v6348_v23, %v4151_v33  ;;  %5009 = vmatmul.msk.bf16.gmra.mxu3 %vm749_vm4, %v3601_v19  ;;  %v3585_v33 = vunpack.c.l.b16 %v3529_v43  ;;  %v2611_v20 = vrot.slane %v5192_v57, 5  ;;  %v3941_v46 = vsel %vm5480_vm7, %v5042_v7, %v3940_v58  ;;  %v5027_v57 = vld [vmem:[%s5294_s10 + $0xcc] sm:$0xe] }
 0x243   : > { %v3533_v31 = vrot.slane %v3531_v54, 4  ;;  %v3546_v56 = vrot.slane %v3544_v0, 4  ;;  %v3983_v16 = vunpack.c.l.b16 %v3944_v47 }
 0x244   : > { %v4223_v50 = vadd.f32 %v6358_v53, %v4187_v4  ;;  %v4087_v62 = vpop.f32.mrf.mxu0  ;;  %v3536_v4 = vrot.slane %v3534_v48, 5  ;;  %v3602_v45 = vpack.c.b16 %v3585_v33, %v3584_v12  ;;  %v2612_v43 = vsel %vm5480_vm7, %v2610_v10, %v2611_v20 }
 0x245   : > { %v3689_v38 = vpop.f32.mrf.mxu3  ;;  %v2753_v25 = vpop.f32.mrf.mxu1  ;;  %v2646_v0 = vunpack.c.l.b16 %v2612_v43 }
 0x246   : > { %vm4255_vm2 = vcmp.ge.f32.partialorder %v4223_v50, 0.0  ;;  %v4291_v52 = vmul.f32 %v6370_v42, %v4223_v50  ;;  %v3754_v24 = vadd.f32 %v3689_v38, %v3100_v15  ;;  %v3542_v15 = vrot.slane %v3540_v1, 5 }
 0x247   : > { %5058 = vmatmul.msk.bf16.gmra.mxu0 %vm749_vm4, %v3999_v22  ;;  %v3982_v38 = vunpack.c.l.b16 %v3941_v46  ;;  %v2815_v48 = vadd.f32 %v2753_v25, %v5935_v51  ;;  %v3947_v51 = vrot.slane %v6601_v35, 5 }
 0x248   : > { %v4323_v9 = vsel %vm4255_vm2, %v4223_v50, %v4291_v52  ;;  %v4152_v19 = vadd.f32 %v4087_v62, %v3754_v24  ;;  %v3037_v27 = vpop.f32.mrf.mxu2  ;;  %4832 = vmatmul.msk.bf16.gmra.mxu1 %vm749_vm4, %v2661_v13  ;;  %v2609_v62 = vsel %vm5480_vm7, %v4816_v39, %v2608_v28  ;;  %v4994_v13 = vld [vmem:[%s5294_s10 + $0xd4] sm:$0x1]  ;;  %v3537_v52 = vor.u32 %v3536_v4, %v3533_v31 }
 0x249   : > { %4356 = vst.msk [vmem:[%s6387_s6 + $0x48] sm:$0xff] %vm4346_vm8, %v4323_v9  ;;  %v3101_v59 = vadd.f32 %v3037_v27, %v2814_v40  ;;  %v2645_v63 = vunpack.c.l.b16 %v2609_v62  ;;  %v3547_v24 = vor.u32 %v3546_v56, %v3542_v15  ;;  %v3550_v28 = vshll.u32 %v4994_v13, 16 }
 0x24a   : > { %v4188_v41 = vmul.f32 %v6348_v23, %v4152_v19  ;;  %v4000_v40 = vpack.c.b16 %v3983_v16, %v3982_v38  ;;  %v3538_v27 = vrot.slane %v3537_v52, 4  ;;  %v5043_v31 = vrot.slane %v5027_v57, 9 }
 0x24b   : > { %v3548_v39 = vrot.slane %v3547_v24, 4  ;;  %v2662_v10 = vpack.c.b16 %v2646_v0, %v2645_v63  ;;  %v3950_v4 = vrot.slane %v4994_v13, 5 }
 0x24c   : > { %v4224_v22 = vadd.f32 %v6358_v53, %v4188_v41  ;;  %v4089_v50 = vpop.f32.mrf.mxu0  ;;  %v3543_v46 = vsel %vm5306_vm3, %v3538_v27, %v3542_v15  ;;  %v3948_v13 = vsel %vm5480_vm7, %v5043_v31, %v3947_v51 }
 0x24d   : > { %v3691_v5 = vpop.f32.mrf.mxu3  ;;  %4945 = vmatmul.msk.bf16.gmra.mxu2 %vm749_vm4, %v5110_v55  ;;  %v2755_v58 = vpop.f32.mrf.mxu1  ;;  %v3552_v55 = vrot.slane %v3550_v28, 5  ;;  %v3586_v15 = vunpack.c.l.b16 %v3543_v46 }
 0x24e   : > { %vm4256_vm5 = vcmp.ge.f32.partialorder %v4224_v22, 0.0  ;;  %v4292_v7 = vmul.f32 %v6370_v42, %v4224_v22  ;;  %v3755_v6 = vadd.f32 %v3691_v5, %v3101_v59  ;;  %v3949_v5 = vrot.slane %v3947_v51, 4 }
 0x24f   : > { %v3553_v47 = vsel %vm5306_vm3, %v3548_v39, %v3552_v55 }
 0x250   : > { %v4324_v32 = vsel %vm4256_vm5, %v4224_v22, %v4292_v7  ;;  %v4153_v54 = vadd.f32 %v4089_v50, %v3755_v6  ;;  %v3040_v1 = vpop.f32.mrf.mxu2  ;;  %v6814_v22 = vld [vmem:[#allocation3_spill] sm:$0xff]  ;;  %v3587_v7 = vunpack.c.l.b16 %v3553_v47 }
 0x251   : > { %4357 = vst.msk [vmem:[%s6387_s6 + $0x50] sm:$0xff] %vm4346_vm8, %v4324_v32  ;;  %v3102_v19 = vadd.f32 %v3040_v1, %v2815_v48  ;;  %v2816_v50 = vadd.f32 %v2755_v58, %v6814_v22  ;;  %v3951_v58 = vsel %vm5480_vm7, %v3949_v5, %v3950_v4  ;;  %v3984_v32 = vunpack.c.l.b16 %v3948_v13 }
 0x252   : > { %v4189_v9 = vmul.f32 %v6348_v23, %v4153_v54  ;;  %5010 = vmatmul.msk.bf16.gmra.mxu3 %vm749_vm4, %v3602_v45  ;;  %v5111_v45 = vld [vmem:[%s5294_s10 + $0xcc] sm:$0xff]  ;;  %v3603_v28 = vpack.c.b16 %v3587_v7, %v3586_v15  ;;  %v3985_v54 = vunpack.c.l.b16 %v3951_v58 }
 0x254   : > { %v4225_v12 = vadd.f32 %v6358_v53, %v4189_v9  ;;  %v4092_v33 = vpop.f32.mrf.mxu0 }
 0x255   : > { %v3694_v25 = vpop.f32.mrf.mxu3  ;;  %v2758_v20 = vpop.f32.mrf.mxu1 }
 0x256   : > { %vm4257_vm6 = vcmp.ge.f32.partialorder %v4225_v12, 0.0  ;;  %v4293_v41 = vmul.f32 %v6370_v42, %v4225_v12  ;;  %v3756_v59 = vadd.f32 %v3694_v25, %v3102_v19  ;;  %v2817_v0 = vadd.f32 %v2758_v20, %v5971_v29 }
 0x257   : > { %5059 = vmatmul.msk.bf16.gmra.mxu0 %vm749_vm4, %v4000_v40  ;;  %v4001_v40 = vpack.c.b16 %v3985_v54, %v3984_v32 }
 0x258   : > { %v4325_v56 = vsel %vm4257_vm6, %v4225_v12, %v4293_v41  ;;  %v4154_v35 = vadd.f32 %v4092_v33, %v3756_v59  ;;  %v3042_v62 = vpop.f32.mrf.mxu2  ;;  %4833 = vmatmul.msk.bf16.gmra.mxu1 %vm749_vm4, %v2662_v10 }
 0x259   : > { %4358 = vst.msk [vmem:[%s6387_s6 + $0x58] sm:$0xff] %vm4346_vm8, %v4325_v56  ;;  %v3103_v43 = vadd.f32 %v3042_v62, %v2816_v50 }
 0x25a   : > { %v4190_v38 = vmul.f32 %v6348_v23, %v4154_v35 }
 0x25c   : > { %v4226_v36 = vadd.f32 %v6358_v53, %v4190_v38  ;;  %v4094_v6 = vpop.f32.mrf.mxu0 }
 0x25d   : > { %v3696_v16 = vpop.f32.mrf.mxu3  ;;  %4946 = vmatmul.msk.bf16.gmra.mxu2 %vm749_vm4, %v5111_v45  ;;  %v2760_v63 = vpop.f32.mrf.mxu1 }
 0x25e   : > { %vm4258_vm3 = vcmp.ge.f32.partialorder %v4226_v36, 0.0  ;;  %v4294_v52 = vmul.f32 %v6370_v42, %v4226_v36  ;;  %v3757_v24 = vadd.f32 %v3696_v16, %v3103_v43  ;;  %v2818_v51 = vadd.f32 %v2760_v63, %v5995_v37  ;;  %v6690_v63 = vld [vmem:[%s6802_s3] ss:$0 sm:$0xff] }
 0x260   : > { %v4326_v48 = vsel %vm4258_vm3, %v4226_v36, %v4294_v52  ;;  %v4155_v1 = vadd.f32 %v4094_v6, %v3757_v24  ;;  %v3045_v9 = vpop.f32.mrf.mxu2 }
 0x261   : > { %4359 = vst.msk [vmem:[%s6387_s6 + $0x60] sm:$0xff] %vm4346_vm8, %v4326_v48  ;;  %v3104_v19 = vadd.f32 %v3045_v9, %v2817_v0 }
 0x262   : > { %v4191_v18 = vmul.f32 %v6348_v23, %v4155_v1  ;;  %5011 = vmatmul.msk.bf16.gmra.mxu3 %vm749_vm4, %v3603_v28 }
 0x264   : > { %v4227_v27 = vadd.f32 %v6358_v53, %v4191_v18  ;;  %v4097_v39 = vpop.f32.mrf.mxu0 }
 0x265   : > { %v3699_v55 = vpop.f32.mrf.mxu3  ;;  %v2763_v12 = vpop.f32.mrf.mxu1 }
 0x266   : > { %vm4259_vm7 = vcmp.ge.f32.partialorder %v4227_v27, 0.0  ;;  %v4295_v33 = vmul.f32 %v6370_v42, %v4227_v27  ;;  %v3758_v10 = vadd.f32 %v3699_v55, %v3104_v19  ;;  %v2819_v37 = vadd.f32 %v2763_v12, %v6014_v34 }
 0x267   : > { %5060 = vmatmul.msk.bf16.gmra.mxu0 %vm749_vm4, %v4001_v40 }
 0x268   : > { %v4327_v29 = vsel %vm4259_vm7, %v4227_v27, %v4295_v33  ;;  %v4156_v57 = vadd.f32 %v4097_v39, %v3758_v10  ;;  %v3047_v25 = vpop.f32.mrf.mxu2 }
 0x269   : > { %4360 = vst.msk [vmem:[%s6387_s6 + $0x68] sm:$0xff] %vm4346_vm8, %v4327_v29  ;;  %v3105_v41 = vadd.f32 %v3047_v25, %v2818_v51 }
 0x26a   : > { %v4192_v20 = vmul.f32 %v6348_v23, %v4156_v57 }
 0x26c   : > { %v4228_v59 = vadd.f32 %v6358_v53, %v4192_v20  ;;  %v4099_v46 = vpop.f32.mrf.mxu0 }
 0x26d   : > { %v3701_v47 = vpop.f32.mrf.mxu3  ;;  %v2765_v31 = vpop.f32.mrf.mxu1 }
 0x26e   : > { %vm4260_vm9 = vcmp.ge.f32.partialorder %v4228_v59, 0.0  ;;  %v4296_v4 = vmul.f32 %v6370_v42, %v4228_v59  ;;  %v3759_v56 = vadd.f32 %v3701_v47, %v3105_v41  ;;  %v2820_v34 = vadd.f32 %v2765_v31, %v6038_v3 }
 0x270   : > { %v4328_v35 = vsel %vm4260_vm9, %v4228_v59, %v4296_v4  ;;  %v4157_v22 = vadd.f32 %v4099_v46, %v3759_v56  ;;  %v3050_v50 = vpop.f32.mrf.mxu2 }
 0x271   : > { %4361 = vst.msk [vmem:[%s6387_s6 + $0x70] sm:$0xff] %vm4346_vm8, %v4328_v35  ;;  %v3106_v5 = vadd.f32 %v3050_v50, %v2819_v37 }
 0x272   : > { %v4193_v62 = vmul.f32 %v6348_v23, %v4157_v22  ;;  %v6684_v23 = vld [vmem:[%s6801_s2] ss:$0 sm:$0xff] }
 0x274   : > { %v4229_v45 = vadd.f32 %v6358_v53, %v4193_v62  ;;  %v4102_v38 = vpop.f32.mrf.mxu0 }
 0x275   : > { %v3704_v43 = vpop.f32.mrf.mxu3  ;;  %v2768_v15 = vpop.f32.mrf.mxu1 }
 0x276   : > { %vm4261_vm4 = vcmp.ge.f32.partialorder %v4229_v45, 0.0  ;;  %v4297_v7 = vmul.f32 %v6370_v42, %v4229_v45  ;;  %v3760_v36 = vadd.f32 %v3704_v43, %v3106_v5  ;;  %v2821_v0 = vadd.f32 %v2768_v15, %v6057_v2 }
 0x278   : > { %v4329_v6 = vsel %vm4261_vm4, %v4229_v45, %v4297_v7  ;;  %v4158_v13 = vadd.f32 %v4102_v38, %v3760_v36  ;;  %v3052_v58 = vpop.f32.mrf.mxu2 }
 0x279   : > { %4362 = vst.msk [vmem:[%s6387_s6 + $0x78] sm:$0xff] %vm4346_vm8, %v4329_v6  ;;  %v3107_v16 = vadd.f32 %v3052_v58, %v2820_v34 }
 0x27a   : > { %v4194_v53 = vmul.f32 %v6684_v23, %v4158_v13 }
 0x27c   : > { %v4230_v52 = vadd.f32 %v6690_v63, %v4194_v53  ;;  %v4104_v3 = vpop.f32.mrf.mxu0 }
 0x27d   : > { %v3706_v24 = vpop.f32.mrf.mxu3  ;;  %v2770_v28 = vpop.f32.mrf.mxu1 }
 0x27e   : > { %vm4262_vm10 = vcmp.ge.f32.partialorder %v4230_v52, 0.0  ;;  %v4298_v32 = vmul.f32 %v6370_v42, %v4230_v52  ;;  %v3761_v54 = vadd.f32 %v3706_v24, %v3107_v16  ;;  %v6702_v42 = vld [vmem:[%s6803_s4] ss:$0 sm:$0xff]  ;;  %v2822_v29 = vadd.f32 %v2770_v28, %v6081_v26 }
 0x280   : > { %v4330_v48 = vsel %vm4262_vm10, %v4230_v52, %v4298_v32  ;;  %v4159_v1 = vadd.f32 %v4104_v3, %v3761_v54  ;;  %v3055_v9 = vpop.f32.mrf.mxu2 }
 0x281   : > { %4363 = vst.msk [vmem:[%s6387_s6 + $0x80] sm:$0xff] %vm4346_vm8, %v4330_v48  ;;  %v3108_v19 = vadd.f32 %v3055_v9, %v2821_v0 }
 0x282   : > { %v4195_v18 = vmul.f32 %v6684_v23, %v4159_v1 }
 0x284   : > { %v4231_v40 = vadd.f32 %v6690_v63, %v4195_v18  ;;  %v4107_v27 = vpop.f32.mrf.mxu0 }
 0x285   : > { %v3709_v39 = vpop.f32.mrf.mxu3  ;;  %v2773_v55 = vpop.f32.mrf.mxu1 }
 0x286   : > { %vm4263_vm11 = vcmp.ge.f32.partialorder %v4231_v40, 0.0  ;;  %v4299_v2 = vmul.f32 %v6702_v42, %v4231_v40  ;;  %v3762_v12 = vadd.f32 %v3709_v39, %v3108_v19  ;;  %v2823_v26 = vadd.f32 %v2773_v55, %v6100_v60 }
 0x288   : > { %v4331_v33 = vsel %vm4263_vm11, %v4231_v40, %v4299_v2  ;;  %v4160_v10 = vadd.f32 %v4107_v27, %v3762_v12  ;;  %v3057_v57 = vpop.f32.mrf.mxu2 }
 0x289   : > { %4364 = vst.msk [vmem:[%s6387_s6 + $0x88] sm:$0xff] %vm4346_vm8, %v4331_v33  ;;  %v3109_v25 = vadd.f32 %v3057_v57, %v2822_v29 }
 0x28a   : > { %v4196_v51 = vmul.f32 %v6684_v23, %v4160_v10 }
 0x28c   : > { %v4232_v20 = vadd.f32 %v6690_v63, %v4196_v51  ;;  %v4109_v41 = vpop.f32.mrf.mxu0 }
 0x28d   : > { %v3711_v59 = vpop.f32.mrf.mxu3  ;;  %v2775_v46 = vpop.f32.mrf.mxu1 }
 0x28e   : > { %vm4264_vm12 = vcmp.ge.f32.partialorder %v4232_v20, 0.0  ;;  %v4300_v47 = vmul.f32 %v6702_v42, %v4232_v20  ;;  %v3763_v31 = vadd.f32 %v3711_v59, %v3109_v25  ;;  %v2824_v60 = vadd.f32 %v2775_v46, %v6124_v14 }
 0x290   : > { %v4332_v4 = vsel %vm4264_vm12, %v4232_v20, %v4300_v47  ;;  %v4161_v56 = vadd.f32 %v4109_v41, %v3763_v31  ;;  %v3060_v35 = vpop.f32.mrf.mxu2 }
 0x291   : > { %4365 = vst.msk [vmem:[%s6387_s6 + $0x90] sm:$0xff] %vm4346_vm8, %v4332_v4  ;;  %v3110_v37 = vadd.f32 %v3060_v35, %v2823_v26 }
 0x292   : > { %v4197_v22 = vmul.f32 %v6684_v23, %v4161_v56 }
 0x294   : > { %v4233_v50 = vadd.f32 %v6690_v63, %v4197_v22  ;;  %v4112_v62 = vpop.f32.mrf.mxu0 }
 0x295   : > { %v3714_v5 = vpop.f32.mrf.mxu3  ;;  %v2778_v45 = vpop.f32.mrf.mxu1 }
 0x296   : > { %vm4265_vm13 = vcmp.ge.f32.partialorder %v4233_v50, 0.0  ;;  %v4301_v38 = vmul.f32 %v6702_v42, %v4233_v50  ;;  %v3764_v43 = vadd.f32 %v3714_v5, %v3110_v37  ;;  %v2825_v14 = vadd.f32 %v2778_v45, %v6143_v21 }
 0x298   : > { %v4333_v15 = vsel %vm4265_vm13, %v4233_v50, %v4301_v38  ;;  %v4162_v7 = vadd.f32 %v4112_v62, %v3764_v43  ;;  %v3062_v36 = vpop.f32.mrf.mxu2  ;;  %v6815_v62 = vld [vmem:[#allocation4_spill] sm:$0xff] }
 0x299   : > { %4366 = vst.msk [vmem:[%s6387_s6 + $0x98] sm:$0xff] %vm4346_vm8, %v4333_v15  ;;  %v3111_v13 = vadd.f32 %v3062_v36, %v2824_v60 }
 0x29a   : > { %v4198_v6 = vmul.f32 %v6684_v23, %v4162_v7 }
 0x29c   : > { %v4234_v34 = vadd.f32 %v6690_v63, %v4198_v6  ;;  %v4114_v58 = vpop.f32.mrf.mxu0 }
 0x29d   : > { %v3716_v53 = vpop.f32.mrf.mxu3  ;;  %v2780_v16 = vpop.f32.mrf.mxu1 }
 0x29e   : > { %vm4266_vm14 = vcmp.ge.f32.partialorder %v4234_v34, 0.0  ;;  %v4302_v52 = vmul.f32 %v6702_v42, %v4234_v34  ;;  %v3765_v3 = vadd.f32 %v3716_v53, %v3111_v13  ;;  %v2826_v21 = vadd.f32 %v2780_v16, %v6167_v49 }
 0x2a0   : > { %v4334_v24 = vsel %vm4266_vm14, %v4234_v34, %v4302_v52  ;;  %v4163_v28 = vadd.f32 %v4114_v58, %v3765_v3  ;;  %v3065_v32 = vpop.f32.mrf.mxu2 }
 0x2a1   : > { %4367 = vst.msk [vmem:[%s6387_s6 + $0xa0] sm:$0xff] %vm4346_vm8, %v4334_v24  ;;  %v3112_v48 = vadd.f32 %v3065_v32, %v2825_v14 }
 0x2a2   : > { %v4199_v54 = vmul.f32 %v6684_v23, %v4163_v28 }
 0x2a4   : > { %v4235_v1 = vadd.f32 %v6690_v63, %v4199_v54  ;;  %v4117_v0 = vpop.f32.mrf.mxu0 }
 0x2a5   : > { %v3719_v9 = vpop.f32.mrf.mxu3  ;;  %v2783_v18 = vpop.f32.mrf.mxu1 }
 0x2a6   : > { %vm4267_vm15 = vcmp.ge.f32.partialorder %v4235_v1, 0.0  ;;  %v4303_v19 = vmul.f32 %v6702_v42, %v4235_v1  ;;  %v3766_v40 = vadd.f32 %v3719_v9, %v3112_v48  ;;  %v2827_v49 = vadd.f32 %v2783_v18, %v6186_v17 }
 0x2a8   : > { %v4335_v27 = vsel %vm4267_vm15, %v4235_v1, %v4303_v19  ;;  %v4164_v39 = vadd.f32 %v4117_v0, %v3766_v40  ;;  %v3067_v55 = vpop.f32.mrf.mxu2 }
 0x2a9   : > { %4368 = vst.msk [vmem:[%s6387_s6 + $0xa8] sm:$0xff] %vm4346_vm8, %v4335_v27  ;;  %v3113_v12 = vadd.f32 %v3067_v55, %v2826_v21 }
 0x2aa   : > { %v4200_v2 = vmul.f32 %v6684_v23, %v4164_v39 }
 0x2ac   : > { %v4236_v33 = vadd.f32 %v6690_v63, %v4200_v2  ;;  %v4119_v10 = vpop.f32.mrf.mxu0 }
 0x2ad   : > { %v3721_v29 = vpop.f32.mrf.mxu3  ;;  %v2785_v57 = vpop.f32.mrf.mxu1 }
 0x2ae   : > { %vm4268_vm0 = vcmp.ge.f32.partialorder %v4236_v33, 0.0  ;;  %v4304_v51 = vmul.f32 %v6702_v42, %v4236_v33  ;;  %v3767_v25 = vadd.f32 %v3721_v29, %v3113_v12  ;;  %v2828_v17 = vadd.f32 %v2785_v57, %v6815_v62 }
 0x2b0   : > { %v4336_v20 = vsel %vm4268_vm0, %v4236_v33, %v4304_v51  ;;  %v4165_v41 = vadd.f32 %v4119_v10, %v3767_v25  ;;  %v3070_v59 = vpop.f32.mrf.mxu2 }
 0x2b1   : > { %4369 = vst.msk [vmem:[%s6387_s6 + $0xb0] sm:$0xff] %vm4346_vm8, %v4336_v20  ;;  %v3114_v47 = vadd.f32 %v3070_v59, %v2827_v49 }
 0x2b2   : > { %v4201_v46 = vmul.f32 %v6684_v23, %v4165_v41 }
 0x2b4   : > { %v4237_v31 = vadd.f32 %v6690_v63, %v4201_v46  ;;  %v4122_v4 = vpop.f32.mrf.mxu0 }
 0x2b5   : > { %v3724_v56 = vpop.f32.mrf.mxu3  ;;  %v2788_v26 = vpop.f32.mrf.mxu1 }
 0x2b6   : > { %vm4269_vm1 = vcmp.ge.f32.partialorder %v4237_v31, 0.0  ;;  %v4305_v35 = vmul.f32 %v6702_v42, %v4237_v31  ;;  %v3768_v22 = vadd.f32 %v3724_v56, %v3114_v47  ;;  %v2829_v58 = vadd.f32 %v2788_v26, %v6227_v44 }
 0x2b8   : > { %v4337_v37 = vsel %vm4269_vm1, %v4237_v31, %v4305_v35  ;;  %v4166_v50 = vadd.f32 %v4122_v4, %v3768_v22  ;;  %v3072_v5 = vpop.f32.mrf.mxu2 }
 0x2b9   : > { %4370 = vst.msk [vmem:[%s6387_s6 + $0xb8] sm:$0xff] %vm4346_vm8, %v4337_v37  ;;  %v3115_v38 = vadd.f32 %v3072_v5, %v2828_v17 }
 0x2ba   : > { %v4202_v45 = vmul.f32 %v6684_v23, %v4166_v50 }
 0x2bc   : > { %v4238_v43 = vadd.f32 %v6690_v63, %v4202_v45  ;;  %v4124_v15 = vpop.f32.mrf.mxu0 }
 0x2bd   : > { %v3726_v7 = vpop.f32.mrf.mxu3  ;;  %v2790_v60 = vpop.f32.mrf.mxu1 }
 0x2be   : > { %vm4270_vm2 = vcmp.ge.f32.partialorder %v4238_v43, 0.0  ;;  %v4306_v36 = vmul.f32 %v6702_v42, %v4238_v43  ;;  %v3769_v6 = vadd.f32 %v3726_v7, %v3115_v38  ;;  %v2830_v44 = vadd.f32 %v2790_v60, %v6248_v8 }
 0x2c0   : > { %v4338_v13 = vsel %vm4270_vm2, %v4238_v43, %v4306_v36  ;;  %v4167_v34 = vadd.f32 %v4124_v15, %v3769_v6  ;;  %v3075_v53 = vpop.f32.mrf.mxu2 }
 0x2c1   : > { %4371 = vst.msk [vmem:[%s6387_s6 + $0xc0] sm:$0xff] %vm4346_vm8, %v4338_v13  ;;  %v3116_v52 = vadd.f32 %v3075_v53, %v2829_v58 }
 0x2c2   : > { %v4203_v16 = vmul.f32 %v6684_v23, %v4167_v34 }
 0x2c4   : > { %v4239_v3 = vadd.f32 %v6690_v63, %v4203_v16  ;;  %v4127_v24 = vpop.f32.mrf.mxu0 }
 0x2c5   : > { %v3729_v28 = vpop.f32.mrf.mxu3  ;;  %v2793_v54 = vpop.f32.mrf.mxu1 }
 0x2c6   : > { %vm4271_vm5 = vcmp.ge.f32.partialorder %v4239_v3, 0.0  ;;  %v4307_v14 = vmul.f32 %v6702_v42, %v4239_v3  ;;  %v3770_v32 = vadd.f32 %v3729_v28, %v3116_v52  ;;  %v2831_v12 = vadd.f32 %v2793_v54, %v6266_v30 }
 0x2c8   : > { %v4339_v48 = vsel %vm4271_vm5, %v4239_v3, %v4307_v14  ;;  %v4168_v1 = vadd.f32 %v4127_v24, %v3770_v32  ;;  %v3077_v0 = vpop.f32.mrf.mxu2 }
 0x2c9   : > { %4372 = vst.msk [vmem:[%s6387_s6 + $0xc8] sm:$0xff] %vm4346_vm8, %v4339_v48  ;;  %v3117_v18 = vadd.f32 %v3077_v0, %v2830_v44 }
 0x2ca   : > { %v4204_v9 = vmul.f32 %v6684_v23, %v4168_v1 }
 0x2cc   : > { %v4240_v19 = vadd.f32 %v6690_v63, %v4204_v9  ;;  %v4129_v40 = vpop.f32.mrf.mxu0 }
 0x2cd   : > { %v3731_v27 = vpop.f32.mrf.mxu3  ;;  %v2795_v33 = vpop.f32.mrf.mxu1 }
 0x2ce   : > { %vm4272_vm6 = vcmp.ge.f32.partialorder %v4240_v19, 0.0  ;;  %v4308_v39 = vmul.f32 %v6702_v42, %v4240_v19  ;;  %v3771_v21 = vadd.f32 %v3731_v27, %v3117_v18  ;;  %v2832_v30 = vadd.f32 %v2795_v33, %v6294_v61 }
 0x2d0   : > { %v4340_v55 = vsel %vm4272_vm6, %v4240_v19, %v4308_v39  ;;  %v4169_v2 = vadd.f32 %v4129_v40, %v3771_v21  ;;  %v3080_v8 = vpop.f32.mrf.mxu2 }
 0x2d1   : > { %4373 = vst.msk [vmem:[%s6387_s6 + $0xd0] sm:$0xff] %vm4346_vm8, %v4340_v55  ;;  %v3118_v29 = vadd.f32 %v3080_v8, %v2831_v12 }
 0x2d2   : > { %v4205_v10 = vmul.f32 %v6684_v23, %v4169_v2 }
 0x2d4   : > { %v4241_v57 = vadd.f32 %v6690_v63, %v4205_v10  ;;  %v4132_v51 = vpop.f32.mrf.mxu0 }
 0x2d5   : > { %v3734_v25 = vpop.f32.mrf.mxu3  ;;  %v2798_v4 = vpop.f32.mrf.mxu1 }
 0x2d6   : > { %vm4273_vm3 = vcmp.ge.f32.partialorder %v4241_v57, 0.0  ;;  %v4309_v20 = vmul.f32 %v6702_v42, %v4241_v57  ;;  %v3772_v41 = vadd.f32 %v3734_v25, %v3118_v29  ;;  %v2833_v61 = vadd.f32 %v2798_v4, %v6314_v11  ;;  %v6816_v11 = vld [vmem:[#allocation5_spill] sm:$0xff] }
 0x2d8   : > { %v4341_v49 = vsel %vm4273_vm3, %v4241_v57, %v4309_v20  ;;  %v4170_v59 = vadd.f32 %v4132_v51, %v3772_v41  ;;  %v3082_v46 = vpop.f32.mrf.mxu2 }
 0x2d9   : > { %4374 = vst.msk [vmem:[%s6387_s6 + $0xd8] sm:$0xff] %vm4346_vm8, %v4341_v49  ;;  %v3119_v31 = vadd.f32 %v3082_v46, %v2832_v30 }
 0x2da   : > { %v4206_v47 = vmul.f32 %v6684_v23, %v4170_v59 }
 0x2dc   : > { %v4242_v56 = vadd.f32 %v6690_v63, %v4206_v47  ;;  %v4134_v26 = vpop.f32.mrf.mxu0 }
 0x2dd   : > { %v3736_v35 = vpop.f32.mrf.mxu3  ;;  %v2800_v43 = vpop.f32.mrf.mxu1 }
 0x2de   : > { %vm4274_vm7 = vcmp.ge.f32.partialorder %v4242_v56, 0.0  ;;  %v4310_v22 = vmul.f32 %v6702_v42, %v4242_v56  ;;  %v3773_v37 = vadd.f32 %v3736_v35, %v3119_v31  ;;  %v2834_v34 = vadd.f32 %v2800_v43, %v6816_v11 }
 0x2e0   : > { %v4342_v50 = vsel %vm4274_vm7, %v4242_v56, %v4310_v22  ;;  %v4171_v62 = vadd.f32 %v4134_v26, %v3773_v37  ;;  %v3085_v17 = vpop.f32.mrf.mxu2 }
 0x2e1   : > { %4375 = vst.msk [vmem:[%s6387_s6 + $0xe0] sm:$0xff] %vm4346_vm8, %v4342_v50  ;;  %v3120_v45 = vadd.f32 %v3085_v17, %v2833_v61 }
 0x2e2   : > { %v4207_v5 = vmul.f32 %v6684_v23, %v4171_v62 }
 0x2e4   : > { %v4243_v38 = vadd.f32 %v6690_v63, %v4207_v5  ;;  %v4137_v15 = vpop.f32.mrf.mxu0 }
 0x2e5   : > { %v3739_v7 = vpop.f32.mrf.mxu3 }
 0x2e6   : > { %vm4275_vm9 = vcmp.ge.f32.partialorder %v4243_v38, 0.0  ;;  %v4311_v60 = vmul.f32 %v6702_v42, %v4243_v38  ;;  %v3774_v36 = vadd.f32 %v3739_v7, %v3120_v45 }
 0x2e8   : > { %v4343_v6 = vsel %vm4275_vm9, %v4243_v38, %v4311_v60  ;;  %v4172_v13 = vadd.f32 %v4137_v15, %v3774_v36  ;;  %v3087_v58 = vpop.f32.mrf.mxu2 }
 0x2e9   : > { %4376 = vst.msk [vmem:[%s6387_s6 + $0xe8] sm:$0xff] %vm4346_vm8, %v4343_v6  ;;  %v3121_v16 = vadd.f32 %v3087_v58, %v2834_v34 }
 0x2ea   : > { %v4208_v53 = vmul.f32 %v6684_v23, %v4172_v13 }
 0x2ec   : > { %v4244_v52 = vadd.f32 %v6690_v63, %v4208_v53  ;;  %v4139_v14 = vpop.f32.mrf.mxu0 }
 0x2ed   : > { %v3741_v3 = vpop.f32.mrf.mxu3 }
 0x2ee   : > { %vm4276_vm4 = vcmp.ge.f32.partialorder %v4244_v52, 0.0  ;;  %v4312_v24 = vmul.f32 %v6702_v42, %v4244_v52  ;;  %v3775_v28 = vadd.f32 %v3741_v3, %v3121_v16 }
 0x2f0   : > { %v4344_v32 = vsel %vm4276_vm4, %v4244_v52, %v4312_v24  ;;  %v4173_v54 = vadd.f32 %v4139_v14, %v3775_v28 }
 0x2f1   : > { %4377 = vst.msk [vmem:[%s6387_s6 + $0xf0] sm:$0xff] %vm4346_vm8, %v4344_v32 }
 0x2f2   : > { %v4209_v48 = vmul.f32 %v6684_v23, %v4173_v54 }
 0x2f4   : > { %v4245_v1 = vadd.f32 %v6690_v63, %v4209_v48 }
 0x2f6   : > { %vm4277_vm10 = vcmp.ge.f32.partialorder %v4245_v1, 0.0  ;;  %v4313_v44 = vmul.f32 %v6702_v42, %v4245_v1 }
 0x2f8   : > { %v4345_v0 = vsel %vm4277_vm10, %v4245_v1, %v4313_v44 }
 0x2f9   : > { %4378 = vst.msk [vmem:[%s6387_s6 + $0xf8] sm:$0xff] %vm4346_vm8, %v4345_v0 }
 0x2fa PF: > { %s15_s20 = sadd.s32 1, %s5218_s20   ;;  %s6817_s18 = smov %s5214_s19 }
 0x2fb   : > { %p12_p5 = scmp.ge.s32.totalorder %s15_s20, 4   ;;  %s6818_s19 = smov %s6820_s21 }
 0x2fd   :  { %14 = sbr.rel (!%p12_p5) target bundleno = 2 (0x2), region = 80 }

</bundles_post_ra>
